<compile_context>
chip_gen: v7x
topology: tpu7x:2x2x1
jax: 0.10.0
libtpu: 0.0.40
codegen_flags: <defaults>
</compile_context>

<pallas_src>
import jax
import jax.numpy as jnp
import numpy as np
from jax.experimental import pallas as pl
from jax.experimental.pallas import tpu as pltpu


def _round_up(x, m):
    return (x + m - 1) // m * m


def output_layer_kernel(q_ref, p_ref, qmask_ref, pmask_ref,
                        hvec_ref, wq0_ref, wp0_ref, wsh_ref, wi_ref, b_ref,
                        pre_ref):
    Lq, Bt, Dq = q_ref.shape
    Lp, _, Dp = p_ref.shape
    H = wq0_ref.shape[-1]
    Hp = _round_up(H, 128)           # lane-aligned segment offsets in the
    Dqp = _round_up(Dq, 128)         # fused (packed) weights
    f32 = jnp.float32
    wdt = wsh_ref.dtype              # compute-input dtype (bf16 by default)

    q = q_ref[...]                                   # (Lq, Bt, Dq) bf16
    p = p_ref[...]                                   # (Lp, Bt, Dp) bf16
    # lane-dense (L, Bt) additive 0/-inf masks -> broadcastable (L, Bt, 1)
    qmask = qmask_ref[...][:, :, None]
    pmask = pmask_ref[...][:, :, None]

    wql, wpl, bias_q = hvec_ref[0], hvec_ref[1], hvec_ref[2]   # (1, H) f32

    # ---- question self-attention -> initial pointer state -------------------
    swq = (jnp.dot(q.reshape(Lq * Bt, Dq), wq0_ref[...],
                   preferred_element_type=f32) + bias_q).reshape(Lq, Bt, H)
    wq = jnp.sum(jnp.tanh(swq) * wql, axis=-1, keepdims=True) + qmask  # (Lq,Bt,1)
    mq = jnp.max(wq, axis=0, keepdims=True)
    eq = jnp.exp(wq - mq)
    denom_q = jnp.sum(eq, axis=0)                                      # (Bt, 1)
    state = (jnp.sum(eq * q, axis=0)
             * pl.reciprocal(denom_q, approx=True))                    # (Bt, Dq) f32

    # ---- passage projection shared across the 3 hops ------------------------
    p_temp = jnp.dot(p.reshape(Lp * Bt, Dp), wp0_ref[...],
                     preferred_element_type=f32).reshape(Lp, Bt, H)

    b_r, b_z, b_in, b_hn = b_ref[0], b_ref[1], b_ref[2], b_ref[3]      # (1, Dq)

    for t in range(3):                                # 3 pointer hops, unrolled
        # one fused matmul: [pointer-bias | gh_r | gh_z | gh_n]
        sh = jnp.dot(state.astype(wdt), wsh_ref[...],
                     preferred_element_type=f32)      # (Bt, Hp + 3*Dqp)
        pw = p_temp + sh[:, 0:H][None, :, :]          # (Lp, Bt, H)
        logits = (jnp.sum(jnp.tanh(pw) * wpl, axis=-1, keepdims=True)
                  + pmask)                            # (Lp, Bt, 1)
        m = jnp.max(logits, axis=0, keepdims=True)    # (1, Bt, 1)
        e = jnp.exp(logits - m)
        s = jnp.sum(e, axis=0, keepdims=True)         # (1, Bt, 1)
        if t > 0:
            # log-softmax over the passage dim, relayouted to a lane-dense
            # (Lp, Bt) plane right before the store (unmasked vst's).
            pre_ref[t - 1] = (logits - m - jnp.log(s)).reshape(Lp, Bt)
        if t < 2:
            # GRUCell(p_input_size, q_input_size), gate order (r, z, n); the
            # final hop's state is never consumed, so skip its update.
            p_vec = (jnp.sum(e * p, axis=0)
                     * pl.reciprocal(s[0], approx=True))               # (Bt, Dp)
            gi = jnp.dot(p_vec.astype(wdt), wi_ref[...],
                         preferred_element_type=f32)  # (Bt, 3*Dqp)
            gi_r = gi[:, 0:Dq]
            gi_z = gi[:, Dqp:Dqp + Dq]
            gi_n = gi[:, 2 * Dqp:2 * Dqp + Dq]
            gh_r = sh[:, Hp:Hp + Dq]
            gh_z = sh[:, Hp + Dqp:Hp + Dqp + Dq]
            gh_n = sh[:, Hp + 2 * Dqp:Hp + 2 * Dqp + Dq]
            r = jax.nn.sigmoid(gi_r + gh_r + b_r)
            z = jax.nn.sigmoid(gi_z + gh_z + b_z)
            n = jnp.tanh(gi_n + b_in + r * (gh_n + b_hn))
            state = (1.0 - z) * n + z * state


def _vmem_limit_bytes():
    """Generation-aware VMEM limit (v5e/v6e: 128 MiB, v7x: 64 MiB per TC)."""
    try:
        cap = int(pltpu.get_tpu_info().vmem_capacity_bytes)
    except Exception:
        cap = 64 * 1024 * 1024          # conservative default (v7x per-TC)
    return max(32 << 20, min(int(cap * 0.9), 128 << 20))


def _tensorcores_per_chip():
    try:
        kind = jax.devices()[0].device_kind.lower()
    except Exception:
        return 1
    return 2 if ("v7" in kind or "7x" in kind) else 1


def _pick_batch_tile(B, row_bytes, fixed_bytes, budget, two_cores):
    """Batch columns per grid step.  Multiples of 16 (bf16 sublane packing);
    when more than one grid step is needed, Bt is a multiple of 128 so the
    lane-dense (L, Bt) mask / (2, Lp, Bt) output blocks tile legally."""
    B16 = _round_up(max(B, 1), 16)
    avail = max(budget - fixed_bytes, 0)
    bt_cap = int(max(16, min(512, avail // max(row_bytes, 1))))
    want_multi = two_cores and B16 >= 256   # keep both v7x TensorCores busy
    if B16 <= bt_cap and not want_multi:
        return B16                          # one step; block dims == array dims
    cands = [c for c in (512, 384, 256, 128) if c <= max(bt_cap, 128)]
    if not cands:
        cands = [128]                       # TODO(synk): Lp-tiling for this regime
    bt = min(cands, key=lambda c: (-(-B16 // c) * c, -c))
    if two_cores:
        while bt > 128 and -(-B16 // bt) < 2:
            bt -= 128
    return bt


def output_layer_forward(params, q_input, p_input, q_mask, p_mask,
                         input_dtype=jnp.bfloat16):
    """Pallas wrapper.  PyTorch conventions: q_input (Lq, B, Dq), p_input
    (Lp, B, Dp), masks (L, B) bool (True == masked).  Returns (2, Lp, B) f32,
    same as torch.stack(pre)."""
    Lq, B, Dq = q_input.shape
    Lp, _, Dp = p_input.shape
    H = params["wq0"].shape[0]
    f32 = jnp.float32
    lane = 128
    Hp = _round_up(H, lane)
    Dqp = _round_up(Dq, lane)

    vmem_limit = _vmem_limit_bytes()
    budget = int(vmem_limit * 0.6)
    two_cores = _tensorcores_per_chip() >= 2

    # ---- weights: transposed for x @ W, bf16 for the MXU, fused + padded ----
    wq0T = params["wq0"].T.astype(input_dtype)                  # (Dq, H)
    wp0T = params["wp0"].T.astype(input_dtype)                  # (Dp, H)
    bias_q = (params["V_q"].astype(f32)
              @ params["wq1"].T.astype(f32)).reshape(1, H)      # hoisted bias
    hvecs = jnp.stack([params["wql"].astype(f32).reshape(1, H),
                       params["wpl"].astype(f32).reshape(1, H),
                       bias_q], axis=0)                         # (3, 1, H) f32

    w_ih = params["w_ih"].astype(f32)                           # (3Dq, Dp), (r,z,n)
    w_hh = params["w_hh"].astype(f32)                           # (3Dq, Dq)
    b_ih = params["b_ih"].astype(f32)
    b_hh = params["b_hh"].astype(f32)

    def pad_lanes(w, width):                                    # (K, n) -> (K, width)
        return jnp.pad(w, ((0, 0), (0, width - w.shape[1])))

    # state @ [wp1^T | W_hr^T | W_hz^T | W_hn^T]  (segments 128-lane aligned)
    wsh = jnp.concatenate([
        pad_lanes(params["wp1"].T.astype(f32), Hp),
        pad_lanes(w_hh[0:Dq].T, Dqp),
        pad_lanes(w_hh[Dq:2 * Dq].T, Dqp),
        pad_lanes(w_hh[2 * Dq:].T, Dqp)], axis=1).astype(input_dtype)
    # p_vec @ [W_ir^T | W_iz^T | W_in^T]
    wi = jnp.concatenate([
        pad_lanes(w_ih[0:Dq].T, Dqp),
        pad_lanes(w_ih[Dq:2 * Dq].T, Dqp),
        pad_lanes(w_ih[2 * Dq:].T, Dqp)], axis=1).astype(input_dtype)
    b4 = jnp.stack([(b_ih[0:Dq] + b_hh[0:Dq]).reshape(1, Dq),   # b_ir + b_hr
                    (b_ih[Dq:2 * Dq] + b_hh[Dq:2 * Dq]).reshape(1, Dq),
                    b_ih[2 * Dq:].reshape(1, Dq),               # b_in
                    b_hh[2 * Dq:].reshape(1, Dq)], axis=0)      # b_hn -> (4,1,Dq)

    rep_arrays = [hvecs, wq0T, wp0T, wsh, wi, b4]
    # 2x double-buffer, 2x tiling-pad fudge
    fixed_bytes = 4 * sum(int(a.size) * np.dtype(a.dtype).itemsize for a in rep_arrays)

    itm = np.dtype(input_dtype).itemsize
    row_bytes = (
        2 * itm * (Lq * Dq + Lp * Dp)            # double-buffered q/p input tiles
        + 2 * 4 * (Lq + Lp)                      # double-buffered lane-dense masks
        + 2 * 4 * 2 * Lp                         # double-buffered (2, Lp, Bt) output
        + 4 * (2 * Lq + 3 * Lp) * H              # f32 (L, Bt, H) projection temps
        + 4 * (3 * Lq + 4 * Lp) * lane           # lane-padded (L, Bt, 1) score temps
        + 4 * (4 * Dq + Dp + Hp + 6 * Dqp)       # state / gate / packed-dot temps
    )

    Bt = _pick_batch_tile(B, row_bytes, fixed_bytes, budget, two_cores)
    nb = -(-B // Bt)
    B_pad = nb * Bt

    # ---- data: sequence-major layout preserved, batch padded to B_pad -------
    q_b = q_input.astype(input_dtype)
    p_b = p_input.astype(input_dtype)
    qm_add = jnp.where(q_mask, -jnp.inf, 0.0).astype(f32)       # (Lq, B) lane-dense
    pm_add = jnp.where(p_mask, -jnp.inf, 0.0).astype(f32)       # (Lp, B)
    if B_pad != B:
        q_b = jnp.pad(q_b, ((0, 0), (0, B_pad - B), (0, 0)))
        p_b = jnp.pad(p_b, ((0, 0), (0, B_pad - B), (0, 0)))
        qm_add = jnp.pad(qm_add, ((0, 0), (0, B_pad - B)))      # padded cols unmasked
        pm_add = jnp.pad(pm_add, ((0, 0), (0, B_pad - B)))

    def rep_spec(arr):  # full-array block, replicated across the batch grid
        nd = arr.ndim
        return pl.BlockSpec(arr.shape, lambda i, nd=nd: (0,) * nd)

    in_specs = [
        pl.BlockSpec((Lq, Bt, Dq), lambda i: (0, i, 0)),        # q tile (bf16)
        pl.BlockSpec((Lp, Bt, Dp), lambda i: (0, i, 0)),        # p tile (bf16)
        pl.BlockSpec((Lq, Bt), lambda i: (0, i)),               # additive q mask
        pl.BlockSpec((Lp, Bt), lambda i: (0, i)),               # additive p mask
        rep_spec(hvecs), rep_spec(wq0T), rep_spec(wp0T),
        rep_spec(wsh), rep_spec(wi), rep_spec(b4),
    ]
    out_spec = pl.BlockSpec((2, Lp, Bt), lambda i: (0, 0, i))   # lane-dense output

    pre = pl.pallas_call(
        output_layer_kernel,
        out_shape=jax.ShapeDtypeStruct((2, Lp, B_pad), jnp.float32),
        grid_spec=pltpu.PrefetchScalarGridSpec(
            num_scalar_prefetch=0,
            grid=(nb,),
            in_specs=in_specs,
            out_specs=out_spec,
        ),
        compiler_params=pltpu.CompilerParams(
            dimension_semantics=("parallel",),
            vmem_limit_bytes=vmem_limit),
    )(q_b, p_b, qm_add, pm_add, hvecs, wq0T, wp0T, wsh, wi, b4)

    return pre[:, :, :B]                    # drop batch padding; no transpose


def reference_forward(params, q_input, p_input, q_mask, p_mask):
    """Pure-JAX (f32) transcription of the PyTorch forward (eval mode)."""
    Dq = q_input.shape[-1]

    def lin(x, w):  # w is (out, in), torch Linear convention
        return x @ w.T

    swq = lin(q_input, params["wq0"]) + lin(params["V_q"], params["wq1"])
    swq = lin(jnp.tanh(swq), params["wql"])                 # (Lq, B, 1)
    swq = jnp.where(q_mask[:, :, None], -jnp.inf, swq)
    aq = jax.nn.softmax(swq, axis=0)
    state = jnp.sum(aq * q_input, axis=0)                   # (B, Dq)

    p_temp = lin(p_input, params["wp0"])
    pre = []
    for t in range(3):
        pw = p_temp + lin(state, params["wp1"])
        pw = lin(jnp.tanh(pw), params["wpl"])
        pw = jnp.where(p_mask[:, :, None], -jnp.inf, pw)
        if t > 0:
            pre.append(jax.nn.log_softmax(jnp.squeeze(pw, -1), axis=0))
        ap = jax.nn.softmax(pw, axis=0)
        p_vec = jnp.sum(ap * p_input, axis=0)
        gi = p_vec @ params["w_ih"].T + params["b_ih"]
        gh = state @ params["w_hh"].T + params["b_hh"]
        r = jax.nn.sigmoid(gi[:, :Dq] + gh[:, :Dq])
        z = jax.nn.sigmoid(gi[:, Dq:2 * Dq] + gh[:, Dq:2 * Dq])
        n = jnp.tanh(gi[:, 2 * Dq:] + r * gh[:, 2 * Dq:])
        state = (1.0 - z) * n + z * state
    return jnp.stack(pre)


if __name__ == "__main__":
    Lq, Lp, B = 8, 12, 2
    Dq, Dp, H = 32, 48, 32   # q_input_size, p_input_size, hidden_size

    key = jax.random.PRNGKey(0)
    ks = jax.random.split(key, 16)
    s = 0.1
    params = {
        "wq0": jax.random.normal(ks[0], (H, Dq), jnp.float32) * s,   # question_w[0]
        "wq1": jax.random.normal(ks[1], (H, Dq), jnp.float32) * s,   # question_w[1]
        "wql": jax.random.normal(ks[2], (1, H), jnp.float32) * s,    # question_linear
        "V_q": jax.random.normal(ks[3], (Dq,), jnp.float32),
        "wp0": jax.random.normal(ks[4], (H, Dp), jnp.float32) * s,   # passage_w[0]
        "wp1": jax.random.normal(ks[5], (H, Dq), jnp.float32) * s,   # passage_w[1]
        "wpl": jax.random.normal(ks[6], (1, H), jnp.float32) * s,    # passage_linear
        "w_ih": jax.random.normal(ks[7], (3 * Dq, Dp), jnp.float32) * s,  # GRUCell
        "w_hh": jax.random.normal(ks[8], (3 * Dq, Dq), jnp.float32) * s,
        "b_ih": jax.random.normal(ks[9], (3 * Dq,), jnp.float32) * s,
        "b_hh": jax.random.normal(ks[10], (3 * Dq,), jnp.float32) * s,
    }

    q_input = jax.random.normal(ks[11], (Lq, B, Dq), jnp.float32)
    p_input = jax.random.normal(ks[12], (Lp, B, Dp), jnp.float32)
    q_mask = jnp.zeros((Lq, B), dtype=bool).at[Lq - 2:, 1].set(True)
    p_mask = jnp.zeros((Lp, B), dtype=bool).at[Lp - 3:, 0].set(True)

    out = output_layer_forward(params, q_input, p_input, q_mask, p_mask)
    out = jax.block_until_ready(out)
    ref = reference_forward(params, q_input, p_input, q_mask, p_mask)
    ref = jax.block_until_ready(ref)

    out_np = np.asarray(out)
    ref_np = np.asarray(ref)
    assert out_np.shape == (2, Lp, B), out_np.shape
    # masked passage rows of batch column 0 must be exactly -inf (torch parity)
    assert np.all(np.isneginf(out_np[:, Lp - 3:, 0])), "masked rows not -inf"
    # bf16 data path + approx reciprocal vs the all-f32 reference -> loose tol
    if not np.allclose(out_np, ref_np, rtol=5e-2, atol=5e-2):
        err = np.max(np.abs(np.where(np.isfinite(ref_np), out_np - ref_np, 0.0)))
        raise AssertionError(f"Pallas kernel does not match reference, max err={err}")

    print("KERNEL_OK")
</pallas_src>

<mosaic_0001>
module attributes {stable_mosaic.version = 11 : i64} {
  func.func @output_layer_kernel(%arg0: i32, %arg1: memref<8x16x32xbf16, #tpu.memory_space<vmem>>, %arg2: memref<12x16x48xbf16, #tpu.memory_space<vmem>>, %arg3: memref<8x16xf32, #tpu.memory_space<vmem>>, %arg4: memref<12x16xf32, #tpu.memory_space<vmem>>, %arg5: memref<3x1x32xf32, #tpu.memory_space<vmem>>, %arg6: memref<32x32xbf16, #tpu.memory_space<vmem>>, %arg7: memref<48x32xbf16, #tpu.memory_space<vmem>>, %arg8: memref<32x512xbf16, #tpu.memory_space<vmem>>, %arg9: memref<48x384xbf16, #tpu.memory_space<vmem>>, %arg10: memref<4x1x32xf32, #tpu.memory_space<vmem>>, %arg11: memref<2x12x16xf32, #tpu.memory_space<vmem>>) attributes {dimension_semantics = [#tpu.dimension_semantics<parallel>], iteration_bounds = array<i64: 1>, scalar_prefetch = 0 : i64, scratch_operands = 0 : i64, tpu.core_type = #tpu.core_type<tc>, window_params = [{transform_indices = @transform_0, window_bounds = array<i64: 8, 16, 32>}, {transform_indices = @transform_1, window_bounds = array<i64: 12, 16, 48>}, {transform_indices = @transform_2, window_bounds = array<i64: 8, 16>}, {transform_indices = @transform_3, window_bounds = array<i64: 12, 16>}, {pipeline_mode = #tpu.pipeline_mode<synchronous>, transform_indices = @transform_4, window_bounds = array<i64: 3, 1, 32>}, {pipeline_mode = #tpu.pipeline_mode<synchronous>, transform_indices = @transform_5, window_bounds = array<i64: 32, 32>}, {pipeline_mode = #tpu.pipeline_mode<synchronous>, transform_indices = @transform_6, window_bounds = array<i64: 48, 32>}, {pipeline_mode = #tpu.pipeline_mode<synchronous>, transform_indices = @transform_7, window_bounds = array<i64: 32, 512>}, {pipeline_mode = #tpu.pipeline_mode<synchronous>, transform_indices = @transform_8, window_bounds = array<i64: 48, 384>}, {pipeline_mode = #tpu.pipeline_mode<synchronous>, transform_indices = @transform_9, window_bounds = array<i64: 4, 1, 32>}, {transform_indices = @transform_10, window_bounds = array<i64: 2, 12, 16>}]} {
    %c0 = arith.constant 0 : index
    %c0_0 = arith.constant 0 : index
    %c0_1 = arith.constant 0 : index
    %0 = vector.load %arg1[%c0, %c0_0, %c0_1] : memref<8x16x32xbf16, #tpu.memory_space<vmem>>, vector<8x16x32xbf16>
    %c0_2 = arith.constant 0 : index
    %c0_3 = arith.constant 0 : index
    %c0_4 = arith.constant 0 : index
    %1 = vector.load %arg2[%c0_2, %c0_3, %c0_4] : memref<12x16x48xbf16, #tpu.memory_space<vmem>>, vector<12x16x48xbf16>
    %c0_5 = arith.constant 0 : index
    %c0_6 = arith.constant 0 : index
    %2 = vector.load %arg3[%c0_5, %c0_6] : memref<8x16xf32, #tpu.memory_space<vmem>>, vector<8x16xf32>
    %3 = vector.shape_cast %2 : vector<8x16xf32> to vector<8x16x1xf32>
    %c0_7 = arith.constant 0 : index
    %c0_8 = arith.constant 0 : index
    %4 = vector.load %arg4[%c0_7, %c0_8] : memref<12x16xf32, #tpu.memory_space<vmem>>, vector<12x16xf32>
    %5 = vector.shape_cast %4 : vector<12x16xf32> to vector<12x16x1xf32>
    %c0_9 = arith.constant 0 : index
    %c0_10 = arith.constant 0 : index
    %c0_11 = arith.constant 0 : index
    %6 = vector.load %arg5[%c0_9, %c0_10, %c0_11] : memref<3x1x32xf32, #tpu.memory_space<vmem>>, vector<1x1x32xf32>
    %7 = vector.shape_cast %6 : vector<1x1x32xf32> to vector<1x32xf32>
    %c1 = arith.constant 1 : index
    %c0_12 = arith.constant 0 : index
    %c0_13 = arith.constant 0 : index
    %8 = vector.load %arg5[%c1, %c0_12, %c0_13] : memref<3x1x32xf32, #tpu.memory_space<vmem>>, vector<1x1x32xf32>
    %9 = vector.shape_cast %8 : vector<1x1x32xf32> to vector<1x32xf32>
    %c2 = arith.constant 2 : index
    %c0_14 = arith.constant 0 : index
    %c0_15 = arith.constant 0 : index
    %10 = vector.load %arg5[%c2, %c0_14, %c0_15] : memref<3x1x32xf32, #tpu.memory_space<vmem>>, vector<1x1x32xf32>
    %11 = vector.shape_cast %10 : vector<1x1x32xf32> to vector<1x32xf32>
    %12 = vector.shape_cast %0 : vector<8x16x32xbf16> to vector<128x32xbf16>
    %c0_16 = arith.constant 0 : index
    %c0_17 = arith.constant 0 : index
    %13 = vector.load %arg6[%c0_16, %c0_17] : memref<32x32xbf16, #tpu.memory_space<vmem>>, vector<32x32xbf16>
    %cst = arith.constant dense<0.000000e+00> : vector<128x32xf32>
    %14 = tpu.matmul %12, %13, %cst {dimension_numbers = #tpu.dot_dimension_numbers<[1], [0], [0], [1], [0, 0, 1, 1], [], []>} : vector<128x32xbf16>, vector<32x32xbf16>, vector<128x32xf32> -> vector<128x32xf32>
    %15 = vector.broadcast %11 : vector<1x32xf32> to vector<128x32xf32>
    %16 = arith.addf %14, %15 : vector<128x32xf32>
    %17 = vector.shape_cast %16 : vector<128x32xf32> to vector<8x16x32xf32>
    %18 = math.tanh %17 : vector<8x16x32xf32>
    %19 = vector.shape_cast %7 : vector<1x32xf32> to vector<1x1x32xf32>
    %20 = vector.broadcast %19 : vector<1x1x32xf32> to vector<8x16x32xf32>
    %21 = arith.mulf %18, %20 : vector<8x16x32xf32>
    %cst_18 = arith.constant dense<0.000000e+00> : vector<8x16xf32>
    %22 = vector.multi_reduction <add>, %21, %cst_18 [2] : vector<8x16x32xf32> to vector<8x16xf32>
    %23 = vector.shape_cast %22 : vector<8x16xf32> to vector<8x16x1xf32>
    %24 = arith.addf %23, %3 : vector<8x16x1xf32>
    %cst_19 = arith.constant dense<0xFF800000> : vector<16x1xf32>
    %25 = vector.multi_reduction <maximumf>, %24, %cst_19 [0] : vector<8x16x1xf32> to vector<16x1xf32>
    %26 = vector.shape_cast %25 : vector<16x1xf32> to vector<1x16x1xf32>
    %27 = vector.broadcast %26 : vector<1x16x1xf32> to vector<8x16x1xf32>
    %28 = arith.subf %24, %27 : vector<8x16x1xf32>
    %29 = math.exp %28 : vector<8x16x1xf32>
    %cst_20 = arith.constant dense<0.000000e+00> : vector<16x1xf32>
    %30 = vector.multi_reduction <add>, %29, %cst_20 [0] : vector<8x16x1xf32> to vector<16x1xf32>
    %31 = arith.extf %0 : vector<8x16x32xbf16> to vector<8x16x32xf32>
    %32 = vector.broadcast %29 : vector<8x16x1xf32> to vector<8x16x32xf32>
    %33 = arith.mulf %32, %31 : vector<8x16x32xf32>
    %cst_21 = arith.constant dense<0.000000e+00> : vector<16x32xf32>
    %34 = vector.multi_reduction <add>, %33, %cst_21 [0] : vector<8x16x32xf32> to vector<16x32xf32>
    %35 = tpu.reciprocal %30 {approx = true} : vector<16x1xf32> -> vector<16x1xf32>
    %36 = vector.broadcast %35 : vector<16x1xf32> to vector<16x32xf32>
    %37 = arith.mulf %34, %36 : vector<16x32xf32>
    %38 = vector.shape_cast %1 : vector<12x16x48xbf16> to vector<192x48xbf16>
    %c0_22 = arith.constant 0 : index
    %c0_23 = arith.constant 0 : index
    %39 = vector.load %arg7[%c0_22, %c0_23] : memref<48x32xbf16, #tpu.memory_space<vmem>>, vector<48x32xbf16>
    %cst_24 = arith.constant dense<0.000000e+00> : vector<192x32xf32>
    %40 = tpu.matmul %38, %39, %cst_24 {dimension_numbers = #tpu.dot_dimension_numbers<[1], [0], [0], [1], [0, 0, 1, 1], [], []>} : vector<192x48xbf16>, vector<48x32xbf16>, vector<192x32xf32> -> vector<192x32xf32>
    %41 = vector.shape_cast %40 : vector<192x32xf32> to vector<12x16x32xf32>
    %c0_25 = arith.constant 0 : index
    %c0_26 = arith.constant 0 : index
    %c0_27 = arith.constant 0 : index
    %42 = vector.load %arg10[%c0_25, %c0_26, %c0_27] : memref<4x1x32xf32, #tpu.memory_space<vmem>>, vector<1x1x32xf32>
    %43 = vector.shape_cast %42 : vector<1x1x32xf32> to vector<1x32xf32>
    %c1_28 = arith.constant 1 : index
    %c0_29 = arith.constant 0 : index
    %c0_30 = arith.constant 0 : index
    %44 = vector.load %arg10[%c1_28, %c0_29, %c0_30] : memref<4x1x32xf32, #tpu.memory_space<vmem>>, vector<1x1x32xf32>
    %45 = vector.shape_cast %44 : vector<1x1x32xf32> to vector<1x32xf32>
    %c2_31 = arith.constant 2 : index
    %c0_32 = arith.constant 0 : index
    %c0_33 = arith.constant 0 : index
    %46 = vector.load %arg10[%c2_31, %c0_32, %c0_33] : memref<4x1x32xf32, #tpu.memory_space<vmem>>, vector<1x1x32xf32>
    %47 = vector.shape_cast %46 : vector<1x1x32xf32> to vector<1x32xf32>
    %c3 = arith.constant 3 : index
    %c0_34 = arith.constant 0 : index
    %c0_35 = arith.constant 0 : index
    %48 = vector.load %arg10[%c3, %c0_34, %c0_35] : memref<4x1x32xf32, #tpu.memory_space<vmem>>, vector<1x1x32xf32>
    %49 = vector.shape_cast %48 : vector<1x1x32xf32> to vector<1x32xf32>
    %50 = arith.truncf %37 : vector<16x32xf32> to vector<16x32xbf16>
    %c0_36 = arith.constant 0 : index
    %c0_37 = arith.constant 0 : index
    %51 = vector.load %arg8[%c0_36, %c0_37] : memref<32x512xbf16, #tpu.memory_space<vmem>>, vector<32x512xbf16>
    %cst_38 = arith.constant dense<0.000000e+00> : vector<16x512xf32>
    %52 = tpu.matmul %50, %51, %cst_38 {dimension_numbers = #tpu.dot_dimension_numbers<[1], [0], [0], [1], [0, 0, 1, 1], [], []>} : vector<16x32xbf16>, vector<32x512xbf16>, vector<16x512xf32> -> vector<16x512xf32>
    %53 = vector.extract_strided_slice %52 {offsets = [0, 0], sizes = [16, 32], strides = [1, 1]} : vector<16x512xf32> to vector<16x32xf32>
    %54 = vector.shape_cast %53 : vector<16x32xf32> to vector<1x16x32xf32>
    %55 = vector.broadcast %54 : vector<1x16x32xf32> to vector<12x16x32xf32>
    %56 = arith.addf %41, %55 : vector<12x16x32xf32>
    %57 = math.tanh %56 : vector<12x16x32xf32>
    %58 = vector.shape_cast %9 : vector<1x32xf32> to vector<1x1x32xf32>
    %59 = vector.broadcast %58 : vector<1x1x32xf32> to vector<12x16x32xf32>
    %60 = arith.mulf %57, %59 : vector<12x16x32xf32>
    %cst_39 = arith.constant dense<0.000000e+00> : vector<12x16xf32>
    %61 = vector.multi_reduction <add>, %60, %cst_39 [2] : vector<12x16x32xf32> to vector<12x16xf32>
    %62 = vector.shape_cast %61 : vector<12x16xf32> to vector<12x16x1xf32>
    %63 = arith.addf %62, %5 : vector<12x16x1xf32>
    %cst_40 = arith.constant dense<0xFF800000> : vector<16x1xf32>
    %64 = vector.multi_reduction <maximumf>, %63, %cst_40 [0] : vector<12x16x1xf32> to vector<16x1xf32>
    %65 = vector.shape_cast %64 : vector<16x1xf32> to vector<1x16x1xf32>
    %66 = vector.broadcast %65 : vector<1x16x1xf32> to vector<12x16x1xf32>
    %67 = arith.subf %63, %66 : vector<12x16x1xf32>
    %68 = math.exp %67 : vector<12x16x1xf32>
    %cst_41 = arith.constant dense<0.000000e+00> : vector<16x1xf32>
    %69 = vector.multi_reduction <add>, %68, %cst_41 [0] : vector<12x16x1xf32> to vector<16x1xf32>
    %70 = vector.shape_cast %69 : vector<16x1xf32> to vector<1x16x1xf32>
    %71 = arith.extf %1 : vector<12x16x48xbf16> to vector<12x16x48xf32>
    %72 = vector.broadcast %68 : vector<12x16x1xf32> to vector<12x16x48xf32>
    %73 = arith.mulf %72, %71 : vector<12x16x48xf32>
    %cst_42 = arith.constant dense<0.000000e+00> : vector<16x48xf32>
    %74 = vector.multi_reduction <add>, %73, %cst_42 [0] : vector<12x16x48xf32> to vector<16x48xf32>
    %75 = vector.shape_cast %70 : vector<1x16x1xf32> to vector<16x1xf32>
    %76 = tpu.reciprocal %75 {approx = true} : vector<16x1xf32> -> vector<16x1xf32>
    %77 = vector.broadcast %76 : vector<16x1xf32> to vector<16x48xf32>
    %78 = arith.mulf %74, %77 : vector<16x48xf32>
    %79 = arith.truncf %78 : vector<16x48xf32> to vector<16x48xbf16>
    %c0_43 = arith.constant 0 : index
    %c0_44 = arith.constant 0 : index
    %80 = vector.load %arg9[%c0_43, %c0_44] : memref<48x384xbf16, #tpu.memory_space<vmem>>, vector<48x384xbf16>
    %cst_45 = arith.constant dense<0.000000e+00> : vector<16x384xf32>
    %81 = tpu.matmul %79, %80, %cst_45 {dimension_numbers = #tpu.dot_dimension_numbers<[1], [0], [0], [1], [0, 0, 1, 1], [], []>} : vector<16x48xbf16>, vector<48x384xbf16>, vector<16x384xf32> -> vector<16x384xf32>
    %82 = vector.extract_strided_slice %81 {offsets = [0, 0], sizes = [16, 32], strides = [1, 1]} : vector<16x384xf32> to vector<16x32xf32>
    %83 = vector.extract_strided_slice %81 {offsets = [0, 128], sizes = [16, 32], strides = [1, 1]} : vector<16x384xf32> to vector<16x32xf32>
    %84 = vector.extract_strided_slice %81 {offsets = [0, 256], sizes = [16, 32], strides = [1, 1]} : vector<16x384xf32> to vector<16x32xf32>
    %85 = vector.extract_strided_slice %52 {offsets = [0, 128], sizes = [16, 32], strides = [1, 1]} : vector<16x512xf32> to vector<16x32xf32>
    %86 = vector.extract_strided_slice %52 {offsets = [0, 256], sizes = [16, 32], strides = [1, 1]} : vector<16x512xf32> to vector<16x32xf32>
    %87 = vector.extract_strided_slice %52 {offsets = [0, 384], sizes = [16, 32], strides = [1, 1]} : vector<16x512xf32> to vector<16x32xf32>
    %88 = arith.addf %82, %85 : vector<16x32xf32>
    %89 = vector.broadcast %43 : vector<1x32xf32> to vector<16x32xf32>
    %90 = arith.addf %88, %89 : vector<16x32xf32>
    %91 = arith.negf %90 : vector<16x32xf32>
    %92 = math.exp %91 : vector<16x32xf32>
    %cst_46 = arith.constant 1.000000e+00 : f32
    %93 = vector.broadcast %cst_46 : f32 to vector<16x32xf32>
    %94 = arith.addf %93, %92 : vector<16x32xf32>
    %95 = arith.divf %93, %94 : vector<16x32xf32>
    %96 = arith.addf %83, %86 : vector<16x32xf32>
    %97 = vector.broadcast %45 : vector<1x32xf32> to vector<16x32xf32>
    %98 = arith.addf %96, %97 : vector<16x32xf32>
    %99 = arith.negf %98 : vector<16x32xf32>
    %100 = math.exp %99 : vector<16x32xf32>
    %cst_47 = arith.constant 1.000000e+00 : f32
    %101 = vector.broadcast %cst_47 : f32 to vector<16x32xf32>
    %102 = arith.addf %101, %100 : vector<16x32xf32>
    %103 = arith.divf %101, %102 : vector<16x32xf32>
    %104 = vector.broadcast %47 : vector<1x32xf32> to vector<16x32xf32>
    %105 = arith.addf %84, %104 : vector<16x32xf32>
    %106 = vector.broadcast %49 : vector<1x32xf32> to vector<16x32xf32>
    %107 = arith.addf %87, %106 : vector<16x32xf32>
    %108 = arith.mulf %95, %107 : vector<16x32xf32>
    %109 = arith.addf %105, %108 : vector<16x32xf32>
    %110 = math.tanh %109 : vector<16x32xf32>
    %cst_48 = arith.constant 1.000000e+00 : f32
    %111 = vector.broadcast %cst_48 : f32 to vector<16x32xf32>
    %112 = arith.subf %111, %103 : vector<16x32xf32>
    %113 = arith.mulf %112, %110 : vector<16x32xf32>
    %114 = arith.mulf %103, %37 : vector<16x32xf32>
    %115 = arith.addf %113, %114 : vector<16x32xf32>
    %116 = arith.truncf %115 : vector<16x32xf32> to vector<16x32xbf16>
    %c0_49 = arith.constant 0 : index
    %c0_50 = arith.constant 0 : index
    %117 = vector.load %arg8[%c0_49, %c0_50] : memref<32x512xbf16, #tpu.memory_space<vmem>>, vector<32x512xbf16>
    %cst_51 = arith.constant dense<0.000000e+00> : vector<16x512xf32>
    %118 = tpu.matmul %116, %117, %cst_51 {dimension_numbers = #tpu.dot_dimension_numbers<[1], [0], [0], [1], [0, 0, 1, 1], [], []>} : vector<16x32xbf16>, vector<32x512xbf16>, vector<16x512xf32> -> vector<16x512xf32>
    %119 = vector.extract_strided_slice %118 {offsets = [0, 0], sizes = [16, 32], strides = [1, 1]} : vector<16x512xf32> to vector<16x32xf32>
    %120 = vector.shape_cast %119 : vector<16x32xf32> to vector<1x16x32xf32>
    %121 = vector.broadcast %120 : vector<1x16x32xf32> to vector<12x16x32xf32>
    %122 = arith.addf %41, %121 : vector<12x16x32xf32>
    %123 = math.tanh %122 : vector<12x16x32xf32>
    %124 = vector.shape_cast %9 : vector<1x32xf32> to vector<1x1x32xf32>
    %125 = vector.broadcast %124 : vector<1x1x32xf32> to vector<12x16x32xf32>
    %126 = arith.mulf %123, %125 : vector<12x16x32xf32>
    %cst_52 = arith.constant dense<0.000000e+00> : vector<12x16xf32>
    %127 = vector.multi_reduction <add>, %126, %cst_52 [2] : vector<12x16x32xf32> to vector<12x16xf32>
    %128 = vector.shape_cast %127 : vector<12x16xf32> to vector<12x16x1xf32>
    %129 = arith.addf %128, %5 : vector<12x16x1xf32>
    %cst_53 = arith.constant dense<0xFF800000> : vector<16x1xf32>
    %130 = vector.multi_reduction <maximumf>, %129, %cst_53 [0] : vector<12x16x1xf32> to vector<16x1xf32>
    %131 = vector.shape_cast %130 : vector<16x1xf32> to vector<1x16x1xf32>
    %132 = vector.broadcast %131 : vector<1x16x1xf32> to vector<12x16x1xf32>
    %133 = arith.subf %129, %132 : vector<12x16x1xf32>
    %134 = math.exp %133 : vector<12x16x1xf32>
    %cst_54 = arith.constant dense<0.000000e+00> : vector<16x1xf32>
    %135 = vector.multi_reduction <add>, %134, %cst_54 [0] : vector<12x16x1xf32> to vector<16x1xf32>
    %136 = vector.shape_cast %135 : vector<16x1xf32> to vector<1x16x1xf32>
    %137 = vector.broadcast %131 : vector<1x16x1xf32> to vector<12x16x1xf32>
    %138 = arith.subf %129, %137 : vector<12x16x1xf32>
    %139 = math.log %136 : vector<1x16x1xf32>
    %140 = vector.broadcast %139 : vector<1x16x1xf32> to vector<12x16x1xf32>
    %141 = arith.subf %138, %140 : vector<12x16x1xf32>
    %142 = vector.shape_cast %141 : vector<12x16x1xf32> to vector<12x16xf32>
    %c0_55 = arith.constant 0 : index
    %c0_56 = arith.constant 0 : index
    %c0_57 = arith.constant 0 : index
    %143 = vector.load %arg11[%c0_55, %c0_56, %c0_57] : memref<2x12x16xf32, #tpu.memory_space<vmem>>, vector<1x12x16xf32>
    %144 = vector.shape_cast %143 : vector<1x12x16xf32> to vector<12x16xf32>
    %145 = vector.shape_cast %142 : vector<12x16xf32> to vector<1x12x16xf32>
    tpu.vector_store %arg11[%c0_55, %c0_56, %c0_57], %145 {strides = array<i32>} : memref<2x12x16xf32, #tpu.memory_space<vmem>>, vector<1x12x16xf32>,
    %146 = arith.extf %1 : vector<12x16x48xbf16> to vector<12x16x48xf32>
    %147 = vector.broadcast %134 : vector<12x16x1xf32> to vector<12x16x48xf32>
    %148 = arith.mulf %147, %146 : vector<12x16x48xf32>
    %cst_58 = arith.constant dense<0.000000e+00> : vector<16x48xf32>
    %149 = vector.multi_reduction <add>, %148, %cst_58 [0] : vector<12x16x48xf32> to vector<16x48xf32>
    %150 = vector.shape_cast %136 : vector<1x16x1xf32> to vector<16x1xf32>
    %151 = tpu.reciprocal %150 {approx = true} : vector<16x1xf32> -> vector<16x1xf32>
    %152 = vector.broadcast %151 : vector<16x1xf32> to vector<16x48xf32>
    %153 = arith.mulf %149, %152 : vector<16x48xf32>
    %154 = arith.truncf %153 : vector<16x48xf32> to vector<16x48xbf16>
    %c0_59 = arith.constant 0 : index
    %c0_60 = arith.constant 0 : index
    %155 = vector.load %arg9[%c0_59, %c0_60] : memref<48x384xbf16, #tpu.memory_space<vmem>>, vector<48x384xbf16>
    %cst_61 = arith.constant dense<0.000000e+00> : vector<16x384xf32>
    %156 = tpu.matmul %154, %155, %cst_61 {dimension_numbers = #tpu.dot_dimension_numbers<[1], [0], [0], [1], [0, 0, 1, 1], [], []>} : vector<16x48xbf16>, vector<48x384xbf16>, vector<16x384xf32> -> vector<16x384xf32>
    %157 = vector.extract_strided_slice %156 {offsets = [0, 0], sizes = [16, 32], strides = [1, 1]} : vector<16x384xf32> to vector<16x32xf32>
    %158 = vector.extract_strided_slice %156 {offsets = [0, 128], sizes = [16, 32], strides = [1, 1]} : vector<16x384xf32> to vector<16x32xf32>
    %159 = vector.extract_strided_slice %156 {offsets = [0, 256], sizes = [16, 32], strides = [1, 1]} : vector<16x384xf32> to vector<16x32xf32>
    %160 = vector.extract_strided_slice %118 {offsets = [0, 128], sizes = [16, 32], strides = [1, 1]} : vector<16x512xf32> to vector<16x32xf32>
    %161 = vector.extract_strided_slice %118 {offsets = [0, 256], sizes = [16, 32], strides = [1, 1]} : vector<16x512xf32> to vector<16x32xf32>
    %162 = vector.extract_strided_slice %118 {offsets = [0, 384], sizes = [16, 32], strides = [1, 1]} : vector<16x512xf32> to vector<16x32xf32>
    %163 = arith.addf %157, %160 : vector<16x32xf32>
    %164 = vector.broadcast %43 : vector<1x32xf32> to vector<16x32xf32>
    %165 = arith.addf %163, %164 : vector<16x32xf32>
    %166 = arith.negf %165 : vector<16x32xf32>
    %167 = math.exp %166 : vector<16x32xf32>
    %cst_62 = arith.constant 1.000000e+00 : f32
    %168 = vector.broadcast %cst_62 : f32 to vector<16x32xf32>
    %169 = arith.addf %168, %167 : vector<16x32xf32>
    %170 = arith.divf %168, %169 : vector<16x32xf32>
    %171 = arith.addf %158, %161 : vector<16x32xf32>
    %172 = vector.broadcast %45 : vector<1x32xf32> to vector<16x32xf32>
    %173 = arith.addf %171, %172 : vector<16x32xf32>
    %174 = arith.negf %173 : vector<16x32xf32>
    %175 = math.exp %174 : vector<16x32xf32>
    %cst_63 = arith.constant 1.000000e+00 : f32
    %176 = vector.broadcast %cst_63 : f32 to vector<16x32xf32>
    %177 = arith.addf %176, %175 : vector<16x32xf32>
    %178 = arith.divf %176, %177 : vector<16x32xf32>
    %179 = vector.broadcast %47 : vector<1x32xf32> to vector<16x32xf32>
    %180 = arith.addf %159, %179 : vector<16x32xf32>
    %181 = vector.broadcast %49 : vector<1x32xf32> to vector<16x32xf32>
    %182 = arith.addf %162, %181 : vector<16x32xf32>
    %183 = arith.mulf %170, %182 : vector<16x32xf32>
    %184 = arith.addf %180, %183 : vector<16x32xf32>
    %185 = math.tanh %184 : vector<16x32xf32>
    %cst_64 = arith.constant 1.000000e+00 : f32
    %186 = vector.broadcast %cst_64 : f32 to vector<16x32xf32>
    %187 = arith.subf %186, %178 : vector<16x32xf32>
    %188 = arith.mulf %187, %185 : vector<16x32xf32>
    %189 = arith.mulf %178, %115 : vector<16x32xf32>
    %190 = arith.addf %188, %189 : vector<16x32xf32>
    %191 = arith.truncf %190 : vector<16x32xf32> to vector<16x32xbf16>
    %c0_65 = arith.constant 0 : index
    %c0_66 = arith.constant 0 : index
    %192 = vector.load %arg8[%c0_65, %c0_66] : memref<32x512xbf16, #tpu.memory_space<vmem>>, vector<32x512xbf16>
    %cst_67 = arith.constant dense<0.000000e+00> : vector<16x512xf32>
    %193 = tpu.matmul %191, %192, %cst_67 {dimension_numbers = #tpu.dot_dimension_numbers<[1], [0], [0], [1], [0, 0, 1, 1], [], []>} : vector<16x32xbf16>, vector<32x512xbf16>, vector<16x512xf32> -> vector<16x512xf32>
    %194 = vector.extract_strided_slice %193 {offsets = [0, 0], sizes = [16, 32], strides = [1, 1]} : vector<16x512xf32> to vector<16x32xf32>
    %195 = vector.shape_cast %194 : vector<16x32xf32> to vector<1x16x32xf32>
    %196 = vector.broadcast %195 : vector<1x16x32xf32> to vector<12x16x32xf32>
    %197 = arith.addf %41, %196 : vector<12x16x32xf32>
    %198 = math.tanh %197 : vector<12x16x32xf32>
    %199 = vector.shape_cast %9 : vector<1x32xf32> to vector<1x1x32xf32>
    %200 = vector.broadcast %199 : vector<1x1x32xf32> to vector<12x16x32xf32>
    %201 = arith.mulf %198, %200 : vector<12x16x32xf32>
    %cst_68 = arith.constant dense<0.000000e+00> : vector<12x16xf32>
    %202 = vector.multi_reduction <add>, %201, %cst_68 [2] : vector<12x16x32xf32> to vector<12x16xf32>
    %203 = vector.shape_cast %202 : vector<12x16xf32> to vector<12x16x1xf32>
    %204 = arith.addf %203, %5 : vector<12x16x1xf32>
    %cst_69 = arith.constant dense<0xFF800000> : vector<16x1xf32>
    %205 = vector.multi_reduction <maximumf>, %204, %cst_69 [0] : vector<12x16x1xf32> to vector<16x1xf32>
    %206 = vector.shape_cast %205 : vector<16x1xf32> to vector<1x16x1xf32>
    %207 = vector.broadcast %206 : vector<1x16x1xf32> to vector<12x16x1xf32>
    %208 = arith.subf %204, %207 : vector<12x16x1xf32>
    %209 = math.exp %208 : vector<12x16x1xf32>
    %cst_70 = arith.constant dense<0.000000e+00> : vector<16x1xf32>
    %210 = vector.multi_reduction <add>, %209, %cst_70 [0] : vector<12x16x1xf32> to vector<16x1xf32>
    %211 = vector.shape_cast %210 : vector<16x1xf32> to vector<1x16x1xf32>
    %212 = vector.broadcast %206 : vector<1x16x1xf32> to vector<12x16x1xf32>
    %213 = arith.subf %204, %212 : vector<12x16x1xf32>
    %214 = math.log %211 : vector<1x16x1xf32>
    %215 = vector.broadcast %214 : vector<1x16x1xf32> to vector<12x16x1xf32>
    %216 = arith.subf %213, %215 : vector<12x16x1xf32>
    %217 = vector.shape_cast %216 : vector<12x16x1xf32> to vector<12x16xf32>
    %c1_71 = arith.constant 1 : index
    %c0_72 = arith.constant 0 : index
    %c0_73 = arith.constant 0 : index
    %218 = vector.load %arg11[%c1_71, %c0_72, %c0_73] : memref<2x12x16xf32, #tpu.memory_space<vmem>>, vector<1x12x16xf32>
    %219 = vector.shape_cast %218 : vector<1x12x16xf32> to vector<12x16xf32>
    %220 = vector.shape_cast %217 : vector<12x16xf32> to vector<1x12x16xf32>
    tpu.vector_store %arg11[%c1_71, %c0_72, %c0_73], %220 {strides = array<i32>} : memref<2x12x16xf32, #tpu.memory_space<vmem>>, vector<1x12x16xf32>,
    return
  }
  func.func @transform_0(%arg0: i32) -> (i32, i32, i32) {
    %c0_i32 = arith.constant 0 : i32
    %c0_i32_0 = arith.constant 0 : i32
    %c0_i32_1 = arith.constant 0 : i32
    return %c0_i32, %arg0, %c0_i32_0 : i32, i32, i32
  }
  func.func @transform_1(%arg0: i32) -> (i32, i32, i32) {
    %c0_i32 = arith.constant 0 : i32
    %c0_i32_0 = arith.constant 0 : i32
    %c0_i32_1 = arith.constant 0 : i32
    return %c0_i32, %arg0, %c0_i32_0 : i32, i32, i32
  }
  func.func @transform_2(%arg0: i32) -> (i32, i32) {
    %c0_i32 = arith.constant 0 : i32
    %c0_i32_0 = arith.constant 0 : i32
    return %c0_i32, %arg0 : i32, i32
  }
  func.func @transform_3(%arg0: i32) -> (i32, i32) {
    %c0_i32 = arith.constant 0 : i32
    %c0_i32_0 = arith.constant 0 : i32
    return %c0_i32, %arg0 : i32, i32
  }
  func.func @transform_4(%arg0: i32) -> (i32, i32, i32) {
    %c0_i32 = arith.constant 0 : i32
    %c0_i32_0 = arith.constant 0 : i32
    %c0_i32_1 = arith.constant 0 : i32
    %c0_i32_2 = arith.constant 0 : i32
    return %c0_i32, %c0_i32_0, %c0_i32_1 : i32, i32, i32
  }
  func.func @transform_5(%arg0: i32) -> (i32, i32) {
    %c0_i32 = arith.constant 0 : i32
    %c0_i32_0 = arith.constant 0 : i32
    %c0_i32_1 = arith.constant 0 : i32
    return %c0_i32, %c0_i32_0 : i32, i32
  }
  func.func @transform_6(%arg0: i32) -> (i32, i32) {
    %c0_i32 = arith.constant 0 : i32
    %c0_i32_0 = arith.constant 0 : i32
    %c0_i32_1 = arith.constant 0 : i32
    return %c0_i32, %c0_i32_0 : i32, i32
  }
  func.func @transform_7(%arg0: i32) -> (i32, i32) {
    %c0_i32 = arith.constant 0 : i32
    %c0_i32_0 = arith.constant 0 : i32
    %c0_i32_1 = arith.constant 0 : i32
    return %c0_i32, %c0_i32_0 : i32, i32
  }
  func.func @transform_8(%arg0: i32) -> (i32, i32) {
    %c0_i32 = arith.constant 0 : i32
    %c0_i32_0 = arith.constant 0 : i32
    %c0_i32_1 = arith.constant 0 : i32
    return %c0_i32, %c0_i32_0 : i32, i32
  }
  func.func @transform_9(%arg0: i32) -> (i32, i32, i32) {
    %c0_i32 = arith.constant 0 : i32
    %c0_i32_0 = arith.constant 0 : i32
    %c0_i32_1 = arith.constant 0 : i32
    %c0_i32_2 = arith.constant 0 : i32
    return %c0_i32, %c0_i32_0, %c0_i32_1 : i32, i32, i32
  }
  func.func @transform_10(%arg0: i32) -> (i32, i32, i32) {
    %c0_i32 = arith.constant 0 : i32
    %c0_i32_0 = arith.constant 0 : i32
    %c0_i32_1 = arith.constant 0 : i32
    return %c0_i32, %c0_i32_0, %arg0 : i32, i32, i32
  }
}

</mosaic_0001>

<bundles_post_ra>
// kernel: tpu_custom_call.1
= control target key start
LH: loop header
LB: loop body
LE: loop exit
PB: predicated region body
PF: predicated region fallthrough
CT: control target
= control target key end

     0   :  { %15 = vsyncpa [#allocation3], 0  ;;  %s5886_s0 = inlined_call_operand.hbm [shape: bf16[8,16,32], index: 0, kind: input, shape index: {}]   ;;  %s5887_s1 = inlined_call_operand.hbm [shape: bf16[12,16,48], index: 1, kind: input, shape index: {}]   ;;  %s5888_s2 = inlined_call_operand.hbm [shape: f32[8,16], index: 2, kind: input, shape index: {}]   ;;  %s5889_s3 = inlined_call_operand.hbm [shape: f32[12,16], index: 3, kind: input, shape index: {}]   ;;  %s5890_s4 = inlined_call_operand.hbm [shape: f32[3,1,32], index: 4, kind: input, shape index: {}]   ;;  %s5891_s5 = inlined_call_operand.hbm [shape: bf16[32,32], index: 5, kind: input, shape index: {}]   ;;  %s5892_s6 = inlined_call_operand.vmem [shape: bf16[48,32], index: 6, kind: input, shape index: {}]   ;;  %s5893_s7 = inlined_call_operand.vmem [shape: bf16[32,512], index: 7, kind: input, shape index: {}]   ;;  %s5894_s8 = inlined_call_operand.hbm [shape: bf16[48,384], index: 8, kind: input, shape index: {}]   ;;  %s5895_s9 = inlined_call_operand.vmem [shape: f32[4,1,32], index: 9, kind: input, shape index: {}]   ;;  %s5896_s10 = inlined_call_operand.vmem [shape: f32[2,12,16], index: 10, kind: output, shape index: {}]  }
   0x1   :  { %16 = vsyncpa [#allocation5], 0 }
   0x2   :  { %17 = vsyncpa [#allocation8], 0 }
   0x3   :  { %18 = vsyncpa [#allocation11], 0  ;;  %s4109_s13 = smov [#allocation4]   ;;  %s4110_s15 = smov [#allocation7]  }
   0x4   :  { %s36_s14 = sshll.u32 %s4109_s13, 4  ;;  %s58_s16 = sshll.u32 %s4110_s15, 4  ;;  %s37_s14 = int_to_ptr.vmem [resolvable:$true] %s36_s14  ;;  %s4182_s16 = int_to_ptr.vmem [resolvable:$true] %s58_s16 }
   0x5   :  { %s3947_s19 = scalar_lea.hbm %s5887_s1, 1536 }
   0x6   :  { %p3948_p0 = scmp.ne.s32.totalorder %s5887_s1, %s3947_s19  ;;  %p3951_p1 = scmp.lt.u32.totalorder %s3947_s19, %s5887_s1 }
   0x8   :  { %p3953_p2 = pnand %p3951_p1, %p3948_p0 }
   0xa   :  { %3956 = shalt.err (!%p3953_p2)
}
   0xb   :  { %s3957_s24 = scalar_lea.vmem %s37_s14, 1536  ;;  %p3962_p4 = scmp.lt.s32.totalorder %s37_s14, %s37_s14 }
   0xc   :  { %p3958_p3 = scmp.ne.s32.totalorder %s37_s14, %s3957_s24  ;;  %p3963_p5 = scmp.lt.s32.totalorder %s3957_s24, %s3957_s24 }
   0xe   :  { %p3964_p6 = por %p3963_p5, %p3962_p4 }
  0x10   :  { %p3965_p7 = pnand %p3964_p6, %p3958_p3 }
  0x12   :  { %3968 = shalt.err (!%p3965_p7)
}
  0x13   :  { %s4111_s25 = smov 64   ;;  %s4112_s26 = smov 4  }
  0x14   :  { %42 = dma.hbm_to_vmem [thread:$0]  %s5887_s1, 1536, %s37_s14, [#allocation5], %s4111_s25, %s4111_s25, %s4112_s26  }
  0x15   :  { %s3969_s11 = scalar_lea.hbm %s5889_s3, 256 }
  0x16   :  { %p3970_p8 = scmp.ne.s32.totalorder %s5889_s3, %s3969_s11  ;;  %p3973_p9 = scmp.lt.u32.totalorder %s3969_s11, %s5889_s3 }
  0x18   :  { %p3975_p10 = pnand %p3973_p9, %p3970_p8 }
  0x1a   :  { %3978 = shalt.err (!%p3975_p10)
}
  0x1b   :  { %s3979_s18 = scalar_lea.vmem %s4182_s16, 256  ;;  %p3984_p12 = scmp.lt.s32.totalorder %s4182_s16, %s4182_s16 }
  0x1c   :  { %p3980_p11 = scmp.ne.s32.totalorder %s4182_s16, %s3979_s18  ;;  %p3985_p13 = scmp.lt.s32.totalorder %s3979_s18, %s3979_s18 }
  0x1e   :  { %p3986_p0 = por %p3985_p13, %p3984_p12 }
  0x20   :  { %p3987_p1 = pnand %p3986_p0, %p3980_p11 }
  0x22   :  { %3990 = shalt.err (!%p3987_p1)
}
  0x23   :  { %s4113_s1 = smov 128   ;;  %s4114_s14 = smov 8  }
  0x24   :  { %64 = dma.hbm_to_vmem [thread:$0]  %s5889_s3, 256, %s4182_s16, [#allocation8], %s4113_s1, %s4113_s1, %s4114_s14  }
  0x25   :  { %s4115_s21 = smov [#allocation10]   ;;  %s4116_s23 = smov [#allocation2]  }
  0x26   :  { %s82_s22 = sshll.u32 %s4115_s21, 4  ;;  %s24_s24 = sshll.u32 %s4116_s23, 4  ;;  %s83_s22 = int_to_ptr.vmem [resolvable:$true] %s82_s22  ;;  %s4216_s24 = int_to_ptr.vmem [resolvable:$true] %s24_s24 }
  0x27   :  { %s3991_s29 = scalar_lea.hbm %s5891_s5, 256 }
  0x28   :  { %p3992_p2 = scmp.ne.s32.totalorder %s5891_s5, %s3991_s29  ;;  %p3995_p3 = scmp.lt.u32.totalorder %s3991_s29, %s5891_s5 }
  0x2a   :  { %p3997_p4 = pnand %p3995_p3, %p3992_p2 }
  0x2c   :  { %4000 = shalt.err (!%p3997_p4)
}
  0x2d   :  { %s4001_s3 = scalar_lea.vmem %s83_s22, 256  ;;  %p4006_p6 = scmp.lt.s32.totalorder %s83_s22, %s83_s22 }
  0x2e   :  { %p4002_p5 = scmp.ne.s32.totalorder %s83_s22, %s4001_s3  ;;  %p4007_p7 = scmp.lt.s32.totalorder %s4001_s3, %s4001_s3 }
  0x30   :  { %p4008_p8 = por %p4007_p7, %p4006_p6 }
  0x32   :  { %p4009_p9 = pnand %p4008_p8, %p4002_p5 }
  0x34   :  { %4012 = shalt.err (!%p4009_p9)
}
  0x35   :  { %88 = dma.hbm_to_vmem [thread:$0]  %s5891_s5, 256, %s83_s22, [#allocation11], %s4111_s25, %s4111_s25, %s4112_s26  }
  0x36   :  { %s4013_s1 = scalar_lea.hbm %s5886_s0, 1024 }
  0x37   :  { %p4014_p10 = scmp.ne.s32.totalorder %s5886_s0, %s4013_s1  ;;  %p4017_p11 = scmp.lt.u32.totalorder %s4013_s1, %s5886_s0 }
  0x39   :  { %p4019_p12 = pnand %p4017_p11, %p4014_p10 }
  0x3b   :  { %4022 = shalt.err (!%p4019_p12)
}
  0x3c   :  { %s4023_s23 = scalar_lea.vmem %s4216_s24, 1024  ;;  %p4028_p0 = scmp.lt.s32.totalorder %s4216_s24, %s4216_s24 }
  0x3d   :  { %p4024_p13 = scmp.ne.s32.totalorder %s4216_s24, %s4023_s23  ;;  %p4029_p1 = scmp.lt.s32.totalorder %s4023_s23, %s4023_s23 }
  0x3f   :  { %p4030_p2 = por %p4029_p1, %p4028_p0 }
  0x41   :  { %p4031_p3 = pnand %p4030_p2, %p4024_p13 }
  0x43   :  { %4034 = shalt.err (!%p4031_p3)
}
  0x44   :  { %30 = dma.hbm_to_vmem [thread:$0]  %s5886_s0, 1024, %s4216_s24, [#allocation3], %s4111_s25, %s4111_s25, %s4112_s26  }
  0x45   :  { %s4117_s27 = smov [#allocation6]   ;;  %s4118_s29 = smov [#allocation9]  }
  0x46   :  { %s49_s28 = sshll.u32 %s4117_s27, 4  ;;  %s70_s30 = sshll.u32 %s4118_s29, 4  ;;  %s50_s28 = int_to_ptr.vmem [resolvable:$true] %s49_s28  ;;  %s4253_s30 = int_to_ptr.vmem [resolvable:$true] %s70_s30 }
  0x47   :  { %s4035_s13 = scalar_lea.hbm %s5888_s2, 128 }
  0x48   :  { %p4036_p4 = scmp.ne.s32.totalorder %s5888_s2, %s4035_s13  ;;  %p4039_p5 = scmp.lt.u32.totalorder %s4035_s13, %s5888_s2 }
  0x4a   :  { %p4041_p6 = pnand %p4039_p5, %p4036_p4 }
  0x4c   :  { %4044 = shalt.err (!%p4041_p6)
}
  0x4d   :  { %s4045_s0 = scalar_lea.vmem %s50_s28, 128  ;;  %p4050_p8 = scmp.lt.s32.totalorder %s50_s28, %s50_s28 }
  0x4e   :  { %p4046_p7 = scmp.ne.s32.totalorder %s50_s28, %s4045_s0  ;;  %p4051_p9 = scmp.lt.s32.totalorder %s4045_s0, %s4045_s0 }
  0x50   :  { %p4052_p10 = por %p4051_p9, %p4050_p8 }
  0x52   :  { %p4053_p11 = pnand %p4052_p10, %p4046_p7 }
  0x54   :  { %4056 = shalt.err (!%p4053_p11)
}
  0x55   :  { %52 = dma.hbm_to_vmem [thread:$0]  %s5888_s2, 128, %s50_s28, [#allocation5]  }
  0x56   :  { %s4057_s1 = scalar_lea.hbm %s5890_s4, 48 }
  0x57   :  { %p4058_p12 = scmp.ne.s32.totalorder %s5890_s4, %s4057_s1  ;;  %p4061_p13 = scmp.lt.u32.totalorder %s4057_s1, %s5890_s4 }
  0x59   :  { %p4063_p0 = pnand %p4061_p13, %p4058_p12 }
  0x5b   :  { %4066 = shalt.err (!%p4063_p0)
}
  0x5c   :  { %s4067_s23 = scalar_lea.vmem %s4253_s30, 48  ;;  %s4071_s2 = scalar_lea.vmem %s4253_s30, 64 }
  0x5d   :  { %p4068_p1 = scmp.ne.s32.totalorder %s4253_s30, %s4067_s23  ;;  %p4072_p2 = scmp.lt.s32.totalorder %s4253_s30, %s4253_s30 }
  0x5e   :  { %p4073_p3 = scmp.lt.s32.totalorder %s4071_s2, %s4067_s23 }
  0x60   :  { %p4074_p4 = por %p4073_p3, %p4072_p2 }
  0x62   :  { %p4075_p5 = pnand %p4074_p4, %p4068_p1 }
  0x64   :  { %4078 = shalt.err (!%p4075_p5)
}
  0x65   :  { %s4119_s5 = smov 16   ;;  %s4120_s22 = smov 1  }
  0x66   :  { %76 = dma.hbm_to_vmem [thread:$0]  %s5890_s4, 48, %s4253_s30, [#allocation8], %s4119_s5, %s4119_s5, %s4120_s22  }
  0x67   :  { %s4121_s29 = smov [#allocation12]   ;;  %s4079_s3 = scalar_lea.hbm %s5894_s8, 1152 }
  0x68   :  { %s98_s11 = sshll.u32 %s4121_s29, 4  ;;  %p4080_p6 = scmp.ne.s32.totalorder %s5894_s8, %s4079_s3  ;;  %s99_s11 = int_to_ptr.vmem [resolvable:$true] %s98_s11 }
  0x69   :  { %p4083_p7 = scmp.lt.u32.totalorder %s4079_s3, %s5894_s8 }
  0x6b   :  { %p4085_p8 = pnand %p4083_p7, %p4080_p6 }
  0x6d   :  { %4088 = shalt.err (!%p4085_p8)
}
  0x6e   :  { %s4089_s25 = scalar_lea.vmem %s99_s11, 1152  ;;  %p4094_p10 = scmp.lt.s32.totalorder %s99_s11, %s99_s11 }
  0x6f   :  { %p4090_p9 = scmp.ne.s32.totalorder %s99_s11, %s4089_s25  ;;  %p4095_p11 = scmp.lt.s32.totalorder %s4089_s25, %s4089_s25 }
  0x71   :  { %p4096_p12 = por %p4095_p11, %p4094_p10 }
  0x73   :  { %p4097_p13 = pnand %p4096_p12, %p4090_p9 }
  0x75   :  { %4100 = shalt.err (!%p4097_p13)
}
  0x76   :  { %s4122_s4 = smov 192   ;;  %s4123_s30 = smov 12  }
  0x77   :  { %104 = dma.hbm_to_vmem [thread:$0]  %s5894_s8, 1152, %s99_s11, [#allocation11], %s4122_s4, %s4122_s4, %s4123_s30  }
  0x78   :  { %4101 = dma.done.wait [#allocation3], 1024  }
  0x79   :  { %4102 = vsyncadd [#allocation3], 4294966272 }
  0x7a   :  { %4103 = dma.done.wait [#allocation5], 1664  }
  0x7b   :  { %4104 = vsyncadd [#allocation5], 4294965632 }
  0x7c   :  { %4105 = dma.done.wait [#allocation8], 304  }
  0x7d   :  { %4106 = vsyncadd [#allocation8], 4294966992 }
  0x7e   :  { %4107 = dma.done.wait [#allocation11], 1408  }
  0x7f   :  { %4108 = vsyncadd [#allocation11], 4294965888  ;;  %v5897_v0 = vlaneseq  ;;  %v3424_v1 = vld [vmem:[#allocation10] sm:$0xff]   ;;  %v3425_v3 = vld [vmem:[#allocation10 + $0x8] sm:$0xff]   ;;  %vm459_vm0 = vcmask 261120   ;;  %vm909_vm1 = vcmask 392192  }
  0x80   :  { %3336 = vmatprep.subr.bf16.mxu0 %v3424_v1  ;;  %v4300_v4 = vld [vmem:[#allocation2] sm:$0xff]   ;;  %v4302_v5 = vld [vmem:[#allocation2 + $0x8] sm:$0xff]   ;;  %v4304_v6 = vld [vmem:[#allocation2 + $0x10] sm:$0xff]   ;;  %vm4126_vm2 = vmmov 0   ;;  %vm2267_vm3 = vcmask 130112   ;;  %vm2368_vm4 = vcmask 1041409  }
  0x81   :  { %v4298_v2 = vshrl.u32 %v5897_v0, 7  ;;  %3337 = vmatpush3.bf16.msra.mxu0 %v3424_v1  ;;  %v4306_v7 = vld [vmem:[#allocation6] sm:$0xff]  ;;  %3340 = vmatprep.mubr.msk.bf16.mxu0 %vm459_vm0, %v4300_v4  ;;  %v4316_v10 = vld [vmem:[#allocation2 + $0x18] sm:$0xff]   ;;  %v4343_v19 = vld [vmem:[#allocation2 + $0x28] sm:$0xff]   ;;  %vm2370_vm5 = vcmask 1042434   ;;  %vm2372_vm6 = vcmask 1043459  }
  0x82   :  { %3338 = vmatprep.subr.bf16.mxu0 %v3425_v3  ;;  %v4322_v12 = vld [vmem:[#allocation2 + $0x20] sm:$0xff]   ;;  %v4345_v20 = vld [vmem:[#allocation2 + $0x30] sm:$0xff]   ;;  %v4359_v25 = vld [vmem:[#allocation2 + $0x38] sm:$0xff]   ;;  %vm2374_vm7 = vcmask 1044484   ;;  %vm2376_vm8 = vcmask 1045509   ;;  %vm2389_vm9 = vcmask 125952  }
  0x83   :  { %5998 = vst [vmem:[#allocation17_spill] sm:$0xff] %v4298_v2  ;;  %v4309_v8 = vsub.s32 0, %v4298_v2  ;;  %v4314_v9 = vsub.s32 1, %v4298_v2  ;;  %v4325_v13 = vsub.s32 2, %v4298_v2  ;;  %v4334_v16 = vsub.s32 3, %v4298_v2 }
  0x84   :  { %v216_v18 = vsub.s32 4, %v4298_v2  ;;  %v227_v22 = vsub.s32 5, %v4298_v2  ;;  %v238_v24 = vsub.s32 6, %v4298_v2  ;;  %v4366_v27 = vld [vmem:[#allocation9 + $0x2] ss:$0 sm:$0xff]  ;;  %vm2378_vm10 = vcmask 1046534  }
  0x85   :  { %3339 = vmatpush3.bf16.msra.mxu0 %v3425_v3  ;;  %v173_v11 = vrot.slane %v4306_v7, %v4309_v8  ;;  %v184_v14 = vrot.slane %v4306_v7, %v4314_v9  ;;  %v195_v15 = vrot.slane %v4306_v7, %v4325_v13  ;;  %v206_v17 = vrot.slane %v4306_v7, %v4334_v16  ;;  %v4375_v43 = vld [vmem:[#allocation9] ss:$0 sm:$0xff] }
  0x86   :  { %v217_v21 = vrot.slane %v4306_v7, %v216_v18  ;;  %v228_v23 = vrot.slane %v4306_v7, %v227_v22  ;;  %v239_v26 = vrot.slane %v4306_v7, %v238_v24  ;;  %vm2380_vm11 = vcmask 1047559  }
  0x87   :  { %179 = vbcast.lane.b32.xlu1 %v173_v11, 264  ;;  %175 = vbcast.lane.b32.xlu0 %v173_v11, 256  ;;  %vm2387_vm12 = vcmask 130048  }
  0x88   :  { %3341 = vmatmul.mubr.msk.bf16.vlgmr.msra.gmra.mrb[0].mxu0 %vm459_vm0, %v4302_v5 }
  0x89   :  { %3344 = vmatprep.mubr.msk.bf16.mxu0 %vm459_vm0, %v4304_v6 }
  0x8b   :  { %186 = vbcast.lane.b32.xlu1 %v184_v14, 256  ;;  %197 = vbcast.lane.b32.xlu0 %v195_v15, 256 }
  0x8f   :  { %190 = vbcast.lane.b32.xlu1 %v184_v14, 264  ;;  %208 = vbcast.lane.b32.xlu0 %v206_v17, 256 }
  0x90   :  { %3345 = vmatmul.mubr.msk.bf16.gmra.mrb[4].mxu0 %vm459_vm0, %v4316_v10 }
  0x91   :  { %3348 = vmatprep.mubr.msk.bf16.mxu0 %vm459_vm0, %v4322_v12 }
  0x93   :  { %201 = vbcast.lane.b32.xlu1 %v195_v15, 264  ;;  %219 = vbcast.lane.b32.xlu0 %v217_v21, 256 }
  0x97   :  { %212 = vbcast.lane.b32.xlu1 %v206_v17, 264  ;;  %230 = vbcast.lane.b32.xlu0 %v228_v23, 256 }
  0x98   :  { %3349 = vmatmul.mubr.msk.bf16.gmra.mrb[8].mxu0 %vm459_vm0, %v4343_v19 }
  0x99   :  { %3352 = vmatprep.mubr.msk.bf16.mxu0 %vm459_vm0, %v4345_v20 }
  0x9b   :  { %223 = vbcast.lane.b32.xlu1 %v217_v21, 264  ;;  %241 = vbcast.lane.b32.xlu0 %v239_v26, 256 }
  0x9f   :  { %234 = vbcast.lane.b32.xlu1 %v228_v23, 264 }
  0xa0   :  { %3353 = vmatmul.mubr.msk.bf16.gmra.mrb[12].mxu0 %vm459_vm0, %v4359_v25 }
  0xa3   :  { %245 = vbcast.lane.b32.xlu1 %v239_v26, 264 }
 0x15b   :  { %v3342_v28 = vpop.f32.mrb[0].mxu0 }
 0x15c   :  { %v527_v29 = vadd.f32 %v3342_v28, %v4366_v27  ;;  %v518_v30 = vpop.f32.mrb[1].mxu0 }
 0x15d   :  { %v519_v31 = vadd.f32 %v4366_v27, %v518_v30  ;;  %v3343_v32 = vpop.f32.mrb[2].mxu0 }
 0x15e   :  { %3511 = vtanh.f32 %v527_v29  ;;  %v530_v33 = vadd.f32 %v3343_v32, %v4366_v27  ;;  %v521_v34 = vpop.f32.mrb[3].mxu0 }
 0x15f   :  { %3513 = vtanh.f32 %v519_v31  ;;  %v522_v35 = vadd.f32 %v4366_v27, %v521_v34 }
 0x160   :  { %3515 = vtanh.f32 %v530_v33 }
 0x161   :  { %3517 = vtanh.f32 %v522_v35 }
 0x163   :  { %v3346_v36 = vpop.f32.mrb[4].mxu0 }
 0x164   :  { %v543_v37 = vadd.f32 %v3346_v36, %v4366_v27  ;;  %v534_v38 = vpop.f32.mrb[5].mxu0 }
 0x165   :  { %v535_v39 = vadd.f32 %v4366_v27, %v534_v38  ;;  %v3347_v40 = vpop.f32.mrb[6].mxu0 }
 0x166   :  { %3519 = vtanh.f32 %v543_v37  ;;  %v546_v41 = vadd.f32 %v3347_v40, %v4366_v27  ;;  %v537_v42 = vpop.f32.mrb[7].mxu0 }
 0x167   :  { %3521 = vtanh.f32 %v535_v39  ;;  %v538_v44 = vadd.f32 %v4366_v27, %v537_v42 }
 0x168   :  { %v3512_v45 = vpop.eup %3511  ;;  %3523 = vtanh.f32 %v546_v41 }
 0x169   :  { %v3514_v46 = vpop.eup %3513  ;;  %3525 = vtanh.f32 %v538_v44  ;;  %v605_v47 = vmul.f32 %v3512_v45, %v4375_v43 }
 0x16a   :  { %v3516_v48 = vpop.eup %3515  ;;  %v603_v49 = vmul.f32 %v3514_v46, %v4375_v43 }
 0x16b   :  { %v3518_v50 = vpop.eup %3517  ;;  %v3350_v51 = vpop.f32.mrb[8].mxu0  ;;  %v625_v52 = vsel %vm459_vm0, %v605_v47, 0.0  ;;  %v606_v53 = vmul.f32 %v3516_v48, %v4375_v43 }
 0x16c   :  { %v559_v54 = vadd.f32 %v3350_v51, %v4366_v27  ;;  %626 = vadd.xlane.f32.xlu1 %v625_v52  ;;  %v550_v55 = vpop.f32.mrb[9].mxu0  ;;  %v619_v56 = vsel %vm459_vm0, %v603_v49, 0.0  ;;  %v604_v57 = vmul.f32 %v3518_v50, %v4375_v43 }
 0x16d   :  { %v551_v58 = vadd.f32 %v4366_v27, %v550_v55  ;;  %v3351_v59 = vpop.f32.mrb[10].mxu0  ;;  %620 = vadd.xlane.f32.xlu0 %v619_v56  ;;  %v628_v63 = vsel %vm459_vm0, %v606_v53, 0.0 }
 0x16e   :  { %3527 = vtanh.f32 %v559_v54  ;;  %v562_v60 = vadd.f32 %v3351_v59, %v4366_v27  ;;  %v553_v61 = vpop.f32.mrb[11].mxu0  ;;  %v622_v3 = vsel %vm459_vm0, %v604_v57, 0.0 }
 0x16f   :  { %3529 = vtanh.f32 %v551_v58  ;;  %v554_v62 = vadd.f32 %v4366_v27, %v553_v61 }
 0x170   :  { %v3520_v1 = vpop.eup %3519  ;;  %3531 = vtanh.f32 %v562_v60  ;;  %629 = vadd.xlane.f32.xlu1 %v628_v63 }
 0x171   :  { %v3522_v11 = vpop.eup %3521  ;;  %3533 = vtanh.f32 %v554_v62  ;;  %623 = vadd.xlane.f32.xlu0 %v622_v3  ;;  %v609_v14 = vmul.f32 %v3520_v1, %v4375_v43  ;;  %v249_v1 = vsub.s32 7, %v4298_v2 }
 0x172   :  { %v3524_v15 = vpop.eup %3523  ;;  %v607_v30 = vmul.f32 %v3522_v11, %v4375_v43  ;;  %v3434_v11 = vld [vmem:[%s5892_s6] sm:$0xff]  }
 0x173   :  { %v3526_v17 = vpop.eup %3525  ;;  %v3354_v21 = vpop.f32.mrb[12].mxu0  ;;  %v637_v23 = vsel %vm459_vm0, %v609_v14, 0.0  ;;  %v610_v26 = vmul.f32 %v3524_v15, %v4375_v43  ;;  %v250_v3 = vrot.slane %v4306_v7, %v249_v1  ;;  %3356 = vmatprep.subr.bf16.mxu1 %v3434_v11  ;;  %v3436_v14 = vld [vmem:[%s5892_s6 + $0x10] sm:$0xff]   ;;  %v145_v7 = vld [vmem:[#allocation4] sm:$0xff]   ;;  %v147_v15 = vld [vmem:[#allocation4 + $0x8] sm:$0xff]  }
 0x174   :  { %v575_v28 = vadd.f32 %v3354_v21, %v4366_v27  ;;  %v566_v29 = vpop.f32.mrb[13].mxu0  ;;  %v608_v34 = vmul.f32 %v3526_v17, %v4375_v43  ;;  %v631_v39 = vsel %vm459_vm0, %v607_v30, 0.0  ;;  %3357 = vmatpush3.bf16.msra.mxu1 %v3434_v11  ;;  %3362 = vmatprep.mubr.msk.bf16.mxu1 %vm909_vm1, %v145_v7  ;;  %v149_v17 = vld [vmem:[#allocation4 + $0x10] sm:$0xff]   ;;  %v151_v21 = vld [vmem:[#allocation4 + $0x18] sm:$0xff]  }
 0x175   :  { %v567_v31 = vadd.f32 %v4366_v27, %v566_v29  ;;  %v3355_v32 = vpop.f32.mrb[14].mxu0  ;;  %638 = vadd.xlane.f32.xlu0 %v637_v23  ;;  %v640_v33 = vsel %vm459_vm0, %v610_v26, 0.0  ;;  %v153_v23 = vld [vmem:[#allocation4 + $0x20] sm:$0xff]   ;;  %v155_v26 = vld [vmem:[#allocation4 + $0x28] sm:$0xff]  }
 0x176   :  { %3535 = vtanh.f32 %v575_v28  ;;  %v578_v35 = vadd.f32 %v3355_v32, %v4366_v27  ;;  %641 = vadd.xlane.f32.xlu1 %v640_v33  ;;  %v569_v36 = vpop.f32.mrb[15].mxu0  ;;  %v634_v41 = vsel %vm459_vm0, %v608_v34, 0.0  ;;  %v157_v28 = vld [vmem:[#allocation4 + $0x30] sm:$0xff]   ;;  %v161_v33 = vld [vmem:[#allocation4 + $0x40] sm:$0xff]   ;;  %v4449_v34 = vpop.permute.xlu1 %179 }
 0x177   :  { %3537 = vtanh.f32 %v567_v31  ;;  %v570_v37 = vadd.f32 %v4366_v27, %v569_v36  ;;  %v3441_v29 = vld [vmem:[%s5893_s7] ss:$16 sps:$4 sm:$0xff]   ;;  %v4443_v30 = vld [vmem:[%s5893_s7 + $0x4] ss:$16 sps:$4 sm:$0xff]   ;;  %v159_v31 = vld [vmem:[#allocation4 + $0x38] sm:$0xff]  }
 0x178   :  { %v3528_v38 = vpop.eup %3527  ;;  %3539 = vtanh.f32 %v578_v35  ;;  %v3450_v32 = vld [vmem:[%s5893_s7 + $0x24] ss:$16 sps:$4 sm:$0xff]   ;;  %1134 = vmatprep.subr.bf16.mxu0 %v4443_v30  ;;  %v3448_v35 = vld [vmem:[%s5893_s7 + $0x20] ss:$16 sps:$4 sm:$0xff]   ;;  %v163_v36 = vld [vmem:[#allocation4 + $0x48] sm:$0xff]  }
 0x179   :  { %v3530_v40 = vpop.eup %3529  ;;  %3541 = vtanh.f32 %v570_v37  ;;  %632 = vadd.xlane.f32.xlu0 %v631_v39  ;;  %v613_v42 = vmul.f32 %v3528_v38, %v4375_v43  ;;  %1135 = vmatpush1.bf16.msra.mxu0 %v3441_v29  ;;  %v165_v37 = vld [vmem:[#allocation4 + $0x50] sm:$0xff]   ;;  %v5898_v38 = vmov 0  }
 0x17a   :  { %v3532_v44 = vpop.eup %3531  ;;  %635 = vadd.xlane.f32.xlu1 %v634_v41  ;;  %v611_v27 = vmul.f32 %v3530_v40, %v4375_v43  ;;  %1136 = vmatprep.subr.bf16.mxu0 %v3450_v32  ;;  %v4458_v39 = vpop.permute.xlu1 %186  ;;  %v4464_v40 = vld [vmem:[%s5893_s7 + $0xc] ss:$16 sps:$4 sm:$0xff]  }
 0x17b   :  { %v3534_v45 = vpop.eup %3533  ;;  %v649_v46 = vsel %vm459_vm0, %v613_v42, 0.0  ;;  %v614_v47 = vmul.f32 %v3532_v44, %v4375_v43  ;;  %1166 = vmatprep.mubr.bf16.mxu0 %v5898_v38  ;;  %v167_v42 = vld [vmem:[#allocation4 + $0x58] sm:$0xff]   ;;  %v4469_v44 = vpop.permute.xlu0 %175 }
 0x17c   :  { %v612_v49 = vmul.f32 %v3534_v45, %v4375_v43  ;;  %v643_v51 = vsel %vm459_vm0, %v611_v27, 0.0 }
 0x17d   :  { %650 = vadd.xlane.f32.xlu0 %v649_v46  ;;  %v652_v48 = vsel %vm459_vm0, %v614_v47, 0.0  ;;  %1137 = vmatpush1.bf16.msra.mxu0 %v3448_v35  ;;  %v258_v47 = vld [vmem:[#allocation7] sm:$0xff] }
 0x17e   :  { %653 = vadd.xlane.f32.xlu1 %v652_v48  ;;  %v646_v53 = vsel %vm459_vm0, %v612_v49, 0.0  ;;  %v4466_v41 = vpop.permute.xlu1 %190  ;;  %1177 = vmatprep.subr.bf16.mxu0 %v4464_v40  ;;  %v263_v27 = vrot.slane %v258_v47, %v4309_v8  ;;  %v274_v48 = vrot.slane %v258_v47, %v4314_v9 }
 0x17f   :  { %v198_v46 = vpop.permute.xlu0 %197 }
 0x180   :  { %v3536_v50 = vpop.eup %3535 }
 0x181   :  { %v3538_v52 = vpop.eup %3537  ;;  %644 = vadd.xlane.f32.xlu0 %v643_v51  ;;  %v617_v54 = vmul.f32 %v3536_v50, %v4375_v43  ;;  %v285_v50 = vrot.slane %v258_v47, %v4325_v13 }
 0x182   :  { %v3540_v55 = vpop.eup %3539  ;;  %647 = vadd.xlane.f32.xlu1 %v646_v53  ;;  %v615_v59 = vmul.f32 %v3538_v52, %v4375_v43  ;;  %v4472_v45 = vpop.permute.xlu1 %201  ;;  %v296_v52 = vrot.slane %v258_v47, %v4334_v16 }
 0x183   :  { %v3542_v56 = vpop.eup %3541  ;;  %v661_v57 = vsel %vm459_vm0, %v617_v54, 0.0  ;;  %v618_v58 = vmul.f32 %v3540_v55, %v4375_v43  ;;  %v209_v51 = vpop.permute.xlu0 %208  ;;  %v307_v55 = vrot.slane %v258_v47, %v216_v18  ;;  %v4487_v18 = vld [vmem:[#allocation7 + $0x8] sm:$0xf] }
 0x184   :  { %v616_v61 = vmul.f32 %v3542_v56, %v4375_v43  ;;  %v655_v62 = vsel %vm459_vm0, %v615_v59, 0.0  ;;  %v3435_v43 = vld [vmem:[%s5892_s6 + $0x8] sm:$0xff]   ;;  %v329_v59 = vrot.slane %v258_v47, %v238_v24 }
 0x185   :  { %662 = vadd.xlane.f32.xlu0 %v661_v57  ;;  %v664_v60 = vsel %vm459_vm0, %v618_v58, 0.0  ;;  %3358 = vmatprep.subr.bf16.mxu1 %v3435_v43  ;;  %v318_v57 = vrot.slane %v258_v47, %v227_v22  ;;  %v351_v22 = vrot.slane %v4487_v18, %v4309_v8  ;;  %v373_v8 = vrot.slane %v4487_v18, %v4325_v13 }
 0x186   :  { %665 = vadd.xlane.f32.xlu1 %v664_v60  ;;  %v658_v63 = vsel %vm459_vm0, %v616_v61, 0.0  ;;  %3359 = vmatpush3.bf16.msra.mxu1 %v3435_v43  ;;  %v213_v49 = vpop.permute.xlu1 %212 }
 0x187   :  { %3360 = vmatprep.subr.bf16.mxu1 %v3436_v14  ;;  %v220_v54 = vpop.permute.xlu0 %219 }
 0x189   :  { %656 = vadd.xlane.f32.xlu0 %v655_v62  ;;  %v340_v62 = vrot.slane %v258_v47, %v249_v1  ;;  %v362_v1 = vrot.slane %v4487_v18, %v4314_v9 }
 0x18a   :  { %659 = vadd.xlane.f32.xlu1 %v658_v63  ;;  %3361 = vmatpush3.bf16.msra.mxu1 %v3436_v14  ;;  %v224_v53 = vpop.permute.xlu1 %223 }
 0x18b   :  { %v231_v58 = vpop.permute.xlu0 %230 }
 0x18d   :  { %3363 = vmatmul.mubr.msk.bf16.vlgmr.msra.gmra.mrb[0].mxu1 %vm909_vm1, %v147_v15 }
 0x18e   :  { %3366 = vmatprep.mubr.msk.bf16.mxu1 %vm909_vm1, %v149_v17  ;;  %v235_v56 = vpop.permute.xlu1 %234 }
 0x18f   :  { %v242_v61 = vpop.permute.xlu0 %241 }
 0x192   :  { %v246_v60 = vpop.permute.xlu1 %245 }
 0x195   :  { %3367 = vmatmul.mubr.msk.bf16.gmra.mrb[4].mxu1 %vm909_vm1, %v151_v21 }
 0x196   :  { %3370 = vmatprep.mubr.msk.bf16.mxu1 %vm909_vm1, %v153_v23 }
 0x19b   :  { %256 = vbcast.lane.b32.xlu1 %v250_v3, 264 }
 0x19d   :  { %3371 = vmatmul.mubr.msk.bf16.gmra.mrb[8].mxu1 %vm909_vm1, %v155_v26 }
 0x19e   :  { %3374 = vmatprep.mubr.msk.bf16.mxu1 %vm909_vm1, %v157_v28 }
 0x19f   :  { %252 = vbcast.lane.b32.xlu0 %v250_v3, 256  ;;  %269 = vbcast.lane.b32.xlu1 %v263_v27, 264 }
 0x1a3   :  { %265 = vbcast.lane.b32.xlu0 %v263_v27, 256  ;;  %276 = vbcast.lane.b32.xlu1 %v274_v48, 256 }
 0x1a5   :  { %3375 = vmatmul.mubr.msk.bf16.gmra.mrb[12].mxu1 %vm909_vm1, %v159_v31 }
 0x1a6   :  { %3378 = vmatprep.mubr.msk.bf16.mxu1 %vm909_vm1, %v161_v33 }
 0x1a7   :  { %287 = vbcast.lane.b32.xlu0 %v285_v50, 256  ;;  %280 = vbcast.lane.b32.xlu1 %v274_v48, 264 }
 0x1ab   :  { %298 = vbcast.lane.b32.xlu0 %v296_v52, 256  ;;  %291 = vbcast.lane.b32.xlu1 %v285_v50, 264 }
 0x1ad   :  { %3379 = vmatmul.mubr.msk.bf16.gmra.mrb[16].mxu1 %vm909_vm1, %v163_v36 }
 0x1ae   :  { %3382 = vmatprep.mubr.msk.bf16.mxu1 %vm909_vm1, %v165_v37 }
 0x1af   :  { %309 = vbcast.lane.b32.xlu0 %v307_v55, 256  ;;  %302 = vbcast.lane.b32.xlu1 %v296_v52, 264 }
 0x1b3   :  { %320 = vbcast.lane.b32.xlu0 %v318_v57, 256  ;;  %313 = vbcast.lane.b32.xlu1 %v307_v55, 264 }
 0x1b5   :  { %3383 = vmatmul.mubr.msk.bf16.gmra.mrb[20].mxu1 %vm909_vm1, %v167_v42 }
 0x1b7   :  { %331 = vbcast.lane.b32.xlu0 %v329_v59, 256  ;;  %324 = vbcast.lane.b32.xlu1 %v318_v57, 264 }
 0x1bb   :  { %342 = vbcast.lane.b32.xlu0 %v340_v62, 256  ;;  %335 = vbcast.lane.b32.xlu1 %v329_v59, 264 }
 0x1bf   :  { %353 = vbcast.lane.b32.xlu0 %v351_v22, 256  ;;  %346 = vbcast.lane.b32.xlu1 %v340_v62, 264 }
 0x1c3   :  { %357 = vbcast.lane.b32.xlu1 %v351_v22, 264  ;;  %364 = vbcast.lane.b32.xlu0 %v362_v1, 256 }
 0x1c7   :  { %368 = vbcast.lane.b32.xlu1 %v362_v1, 264  ;;  %375 = vbcast.lane.b32.xlu0 %v373_v8, 256 }
 0x1cb   :  { %379 = vbcast.lane.b32.xlu1 %v373_v8, 264 }
 0x1f9   :  { %v627_v63 = vpop.xlane.xlu1 %626 }
 0x1fa   :  { %v621_v3 = vpop.xlane.xlu0 %620  ;;  %v669_v36 = vadd.f32 %v627_v63, %v4458_v39 }
 0x1fb   :  { %v667_v37 = vadd.f32 %v621_v3, %v4469_v44 }
 0x1fd   :  { %v630_v24 = vpop.xlane.xlu1 %629 }
 0x1fe   :  { %v624_v11 = vpop.xlane.xlu0 %623  ;;  %v670_v13 = vadd.f32 %v630_v24, %v4466_v41 }
 0x1ff   :  { %v668_v48 = vadd.f32 %v624_v11, %v4449_v34 }
 0x202   :  { %v639_v43 = vpop.xlane.xlu0 %638 }
 0x203   :  { %v642_v14 = vpop.xlane.xlu1 %641  ;;  %v673_v31 = vadd.f32 %v639_v43, %v209_v51 }
 0x204   :  { %v4495_v33 = vadd.f32 %v642_v14, %v213_v49 }
 0x206   :  { %v633_v7 = vpop.xlane.xlu0 %632 }
 0x207   :  { %v636_v15 = vpop.xlane.xlu1 %635  ;;  %v671_v32 = vadd.f32 %v633_v7, %v198_v46  ;;  %v684_v46 = vmax.f32 %v669_v36, %v673_v31 }
 0x208   :  { %v672_v9 = vadd.f32 %v636_v15, %v4472_v45  ;;  %v691_v45 = vmax.f32 %v670_v13, %v4495_v33 }
 0x209   :  { %v683_v49 = vmax.f32 %v667_v37, %v671_v32 }
 0x20a   :  { %v651_v17 = vpop.xlane.xlu0 %650  ;;  %v690_v55 = vmax.f32 %v668_v48, %v672_v9 }
 0x20b   :  { %v654_v21 = vpop.xlane.xlu1 %653  ;;  %v677_v42 = vadd.f32 %v651_v17, %v231_v58 }
 0x20c   :  { %v4502_v50 = vadd.f32 %v654_v21, %v235_v56 }
 0x20d   :  { %v686_v44 = vmax.f32 %v684_v46, %v677_v42 }
 0x20e   :  { %v645_v23 = vpop.xlane.xlu0 %644  ;;  %v693_v41 = vmax.f32 %v691_v45, %v4502_v50 }
 0x20f   :  { %v648_v26 = vpop.xlane.xlu1 %647  ;;  %v675_v47 = vadd.f32 %v645_v23, %v220_v54 }
 0x210   :  { %v676_v51 = vadd.f32 %v648_v26, %v224_v53 }
 0x211   :  { %v685_v58 = vmax.f32 %v683_v49, %v675_v47 }
 0x212   :  { %v663_v28 = vpop.xlane.xlu0 %662  ;;  %v692_v62 = vmax.f32 %v690_v55, %v676_v51 }
 0x213   :  { %v666_v29 = vpop.xlane.xlu1 %665 }
 0x216   :  { %v657_v35 = vpop.xlane.xlu0 %656 }
 0x217   :  { %v660_v27 = vpop.xlane.xlu1 %659  ;;  %v679_v52 = vadd.f32 %v657_v35, %v242_v61 }
 0x218   :  { %v4505_v57 = vadd.f32 %v660_v27, %v246_v60 }
 0x219   :  { %v687_v56 = vmax.f32 %v685_v58, %v679_v52 }
 0x21a   :  { %v253_v39 = vpop.permute.xlu0 %252  ;;  %v694_v63 = vmax.f32 %v692_v62, %v4505_v57  ;;  %v769_v62 = vunpack.c.l.bf16 %v4343_v19 }
 0x21b   :  { %v681_v54 = vadd.f32 %v663_v28, %v253_v39  ;;  %v257_v59 = vpop.permute.xlu1 %256  ;;  %v760_v39 = vunpack.c.h.bf16 %v4300_v4 }
 0x21c   :  { %v4508_v34 = vadd.f32 %v666_v29, %v257_v59 }
 0x21d   :  { %v688_v53 = vmax.f32 %v686_v44, %v681_v54  ;;  %v765_v44 = vunpack.c.l.bf16 %v4316_v10 }
 0x21e   :  { %v695_v61 = vmax.f32 %v693_v41, %v4508_v34 }
 0x21f   :  { %v689_v3 = vmax.f32 %v687_v56, %v688_v53 }
 0x220   :  { %v696_v22 = vmax.f32 %v694_v63, %v695_v61 }
 0x221   :  { %v697_v60 = vsub.f32 %v667_v37, %v689_v3  ;;  %v699_v11 = vsub.f32 %v669_v36, %v689_v3  ;;  %v701_v24 = vsub.f32 %v671_v32, %v689_v3  ;;  %v703_v43 = vsub.f32 %v673_v31, %v689_v3 }
 0x222   :  { %v705_v14 = vsub.f32 %v675_v47, %v689_v3  ;;  %v707_v7 = vsub.f32 %v677_v42, %v689_v3  ;;  %v709_v1 = vsub.f32 %v679_v52, %v689_v3  ;;  %v711_v23 = vsub.f32 %v681_v54, %v689_v3 }
 0x223   :  { %v713_v15 = vmul.f32 1.442695, %v697_v60  ;;  %v717_v17 = vmul.f32 1.442695, %v699_v11  ;;  %v721_v21 = vmul.f32 1.442695, %v701_v24  ;;  %v698_v28 = vsub.f32 %v668_v48, %v696_v22 }
 0x224   :  { %v725_v8 = vmul.f32 1.442695, %v703_v43  ;;  %v729_v26 = vmul.f32 1.442695, %v705_v14  ;;  %v733_v29 = vmul.f32 1.442695, %v707_v7  ;;  %v700_v35 = vsub.f32 %v670_v13, %v696_v22 }
 0x225   :  { %3543 = vpow2.f32 %v713_v15  ;;  %v737_v27 = vmul.f32 1.442695, %v709_v1  ;;  %v702_v37 = vsub.f32 %v672_v9, %v696_v22  ;;  %v741_v32 = vmul.f32 1.442695, %v711_v23 }
 0x226   :  { %3545 = vpow2.f32 %v717_v17  ;;  %v704_v31 = vsub.f32 %v4495_v33, %v696_v22  ;;  %v706_v36 = vsub.f32 %v676_v51, %v696_v22  ;;  %v715_v42 = vmul.f32 1.442695, %v698_v28 }
 0x227   :  { %3547 = vpow2.f32 %v721_v21  ;;  %v708_v47 = vsub.f32 %v4502_v50, %v696_v22  ;;  %v719_v46 = vmul.f32 1.442695, %v700_v35  ;;  %v723_v49 = vmul.f32 1.442695, %v702_v37 }
 0x228   :  { %3549 = vpow2.f32 %v725_v8  ;;  %v759_v48 = vunpack.c.l.bf16 %v4300_v4  ;;  %v710_v13 = vsub.f32 %v4505_v57, %v696_v22  ;;  %v727_v52 = vmul.f32 1.442695, %v704_v31 }
 0x229   :  { %3551 = vpow2.f32 %v729_v26  ;;  %v761_v9 = vunpack.c.l.bf16 %v4302_v5  ;;  %v731_v45 = vmul.f32 1.442695, %v706_v36  ;;  %v763_v33 = vunpack.c.l.bf16 %v4304_v6 }
 0x22a   :  { %3553 = vpow2.f32 %v733_v29  ;;  %v712_v51 = vsub.f32 %v4508_v34, %v696_v22  ;;  %v735_v55 = vmul.f32 1.442695, %v708_v47  ;;  %v767_v57 = vunpack.c.l.bf16 %v4322_v12 }
 0x22b   :  { %3555 = vpow2.f32 %v737_v27  ;;  %v739_v59 = vmul.f32 1.442695, %v710_v13  ;;  %v762_v22 = vunpack.c.h.bf16 %v4302_v5  ;;  %v771_v14 = vunpack.c.l.bf16 %v4345_v20 }
 0x22c   :  { %3557 = vpow2.f32 %v741_v32  ;;  %v743_v4 = vmul.f32 1.442695, %v712_v51  ;;  %v764_v17 = vunpack.c.h.bf16 %v4304_v6  ;;  %v773_v21 = vunpack.c.l.bf16 %v4359_v25 }
 0x22d   :  { %3559 = vpow2.f32 %v715_v42  ;;  %v766_v5 = vunpack.c.h.bf16 %v4316_v10  ;;  %v768_v27 = vunpack.c.h.bf16 %v4322_v12  ;;  %v770_v37 = vunpack.c.h.bf16 %v4343_v19 }
 0x22e   :  { %3561 = vpow2.f32 %v719_v46 }
 0x22f   :  { %v3544_v50 = vpop.eup %3543  ;;  %3563 = vpow2.f32 %v723_v49 }
 0x230   :  { %v3546_v58 = vpop.eup %3545  ;;  %v775_v54 = vmul.f32 %v3544_v50, %v759_v48  ;;  %3565 = vpow2.f32 %v727_v52 }
 0x231   :  { %v3548_v41 = vpop.eup %3547  ;;  %v745_v56 = vadd.f32 %v3546_v58, %v3544_v50  ;;  %v777_v53 = vmul.f32 %v3546_v58, %v761_v9  ;;  %3567 = vpow2.f32 %v731_v45 }
 0x232   :  { %v3550_v34 = vpop.eup %3549  ;;  %v779_v63 = vmul.f32 %v3548_v41, %v763_v33  ;;  %v791_v61 = vsel %vm459_vm0, %v775_v54, 0.0  ;;  %3569 = vpow2.f32 %v735_v55 }
 0x233   :  { %v3552_v3 = vpop.eup %3551  ;;  %v746_v60 = vadd.f32 %v3548_v41, %v745_v56  ;;  %v781_v11 = vmul.f32 %v3550_v34, %v765_v44  ;;  %v792_v24 = vsel %vm459_vm0, %v777_v53, 0.0  ;;  %3571 = vpow2.f32 %v739_v59 }
 0x234   :  { %v3554_v43 = vpop.eup %3553  ;;  %v783_v7 = vmul.f32 %v3552_v3, %v767_v57  ;;  %v793_v1 = vadd.f32 %v792_v24, %v791_v61  ;;  %v794_v8 = vsel %vm459_vm0, %v779_v63, 0.0  ;;  %3573 = vpow2.f32 %v743_v4 }
 0x235   :  { %v3556_v15 = vpop.eup %3555  ;;  %v747_v23 = vadd.f32 %v3550_v34, %v746_v60  ;;  %v785_v28 = vmul.f32 %v3554_v43, %v769_v62  ;;  %v796_v31 = vsel %vm459_vm0, %v781_v11, 0.0  ;;  %v774_v63 = vunpack.c.h.bf16 %v4359_v25 }
 0x236   :  { %v3558_v26 = vpop.eup %3557  ;;  %v795_v29 = vadd.f32 %v794_v8, %v793_v1  ;;  %v787_v36 = vmul.f32 %v3556_v15, %v771_v14  ;;  %v798_v47 = vsel %vm459_vm0, %v783_v7, 0.0 }
 0x237   :  { %v3560_v35 = vpop.eup %3559  ;;  %v748_v32 = vadd.f32 %v3552_v3, %v747_v23  ;;  %v789_v10 = vmul.f32 %v3558_v26, %v773_v21  ;;  %v800_v12 = vsel %vm459_vm0, %v785_v28, 0.0 }
 0x238   :  { %v3562_v6 = vpop.eup %3561  ;;  %v797_v42 = vadd.f32 %v796_v31, %v795_v29  ;;  %v776_v46 = vmul.f32 %v3560_v35, %v760_v39  ;;  %v772_v39 = vunpack.c.h.bf16 %v4345_v20  ;;  %v802_v41 = vsel %vm459_vm0, %v787_v36, 0.0 }
 0x239   :  { %v3564_v49 = vpop.eup %3563  ;;  %v749_v48 = vadd.f32 %v3554_v43, %v748_v32  ;;  %v752_v13 = vadd.f32 %v3562_v6, %v3560_v35  ;;  %v778_v52 = vmul.f32 %v3562_v6, %v762_v22  ;;  %v804_v4 = vsel %vm459_vm0, %v789_v10, 0.0  ;;  %v3455_v6 = vld [vmem:[%s5893_s7 + $0x8] ss:$16 sps:$4 sm:$0xff]  }
 0x23a   :  { %v3566_v9 = vpop.eup %3565  ;;  %v799_v45 = vadd.f32 %v798_v47, %v797_v42  ;;  %v780_v33 = vmul.f32 %v3564_v49, %v764_v17  ;;  %v806_v19 = vsel %vm459_vm0, %v776_v46, 0.0  ;;  %v3460_v42 = vld [vmem:[%s5893_s7 + $0x2c] ss:$16 sps:$4 sm:$0xff]   ;;  %v3458_v47 = vld [vmem:[%s5893_s7 + $0x28] ss:$16 sps:$4 sm:$0xff]  }
 0x23b   :  { %v3568_v51 = vpop.eup %3567  ;;  %v750_v55 = vadd.f32 %v3556_v15, %v749_v48  ;;  %v753_v50 = vadd.f32 %v3564_v49, %v752_v13  ;;  %v782_v44 = vmul.f32 %v3566_v9, %v766_v5  ;;  %v807_v58 = vsel %vm459_vm0, %v778_v52, 0.0 }
 0x23c   :  { %v3570_v57 = vpop.eup %3569  ;;  %v801_v54 = vadd.f32 %v800_v12, %v799_v45  ;;  %v808_v59 = vadd.f32 %v807_v58, %v806_v19  ;;  %v784_v56 = vmul.f32 %v3568_v51, %v768_v27  ;;  %v809_v53 = vsel %vm459_vm0, %v780_v33, 0.0 }
 0x23d   :  { %v754_v62 = vadd.f32 %v3566_v9, %v753_v50  ;;  %v3572_v34 = vpop.eup %3571  ;;  %v751_v22 = vadd.f32 %v3558_v26, %v750_v55  ;;  %v786_v11 = vmul.f32 %v3570_v57, %v770_v37  ;;  %v811_v20 = vsel %vm459_vm0, %v782_v44, 0.0 }
 0x23e   :  { %v803_v61 = vadd.f32 %v802_v41, %v801_v54  ;;  %v810_v3 = vadd.f32 %v809_v53, %v808_v59  ;;  %v3574_v24 = vpop.eup %3573  ;;  %v788_v1 = vmul.f32 %v3572_v34, %v772_v39  ;;  %v813_v15 = vsel %vm459_vm0, %v784_v56, 0.0 }
 0x23f   :  { %v755_v60 = vadd.f32 %v3568_v51, %v754_v62  ;;  %3575 = vrcp.f32 %v751_v22  ;;  %v790_v25 = vmul.f32 %v3574_v24, %v774_v63  ;;  %v815_v23 = vsel %vm459_vm0, %v786_v11, 0.0 }
 0x240   :  { %v805_v43 = vadd.f32 %v804_v4, %v803_v61  ;;  %v812_v14 = vadd.f32 %v811_v20, %v810_v3  ;;  %v817_v26 = vsel %vm459_vm0, %v788_v1, 0.0 }
 0x241   :  { %v756_v7 = vadd.f32 %v3570_v57, %v755_v60  ;;  %v819_v29 = vsel %vm459_vm0, %v790_v25, 0.0 }
 0x242   :  { %v814_v17 = vadd.f32 %v813_v15, %v812_v14 }
 0x243   :  { %v757_v21 = vadd.f32 %v3572_v34, %v756_v7 }
 0x244   :  { %v816_v8 = vadd.f32 %v815_v23, %v814_v17 }
 0x245   :  { %v758_v5 = vadd.f32 %v3574_v24, %v757_v21 }
 0x246   :  { %v818_v28 = vadd.f32 %v817_v26, %v816_v8 }
 0x247   :  { %3577 = vrcp.f32 %v758_v5 }
 0x248   :  { %v820_v35 = vadd.f32 %v819_v29, %v818_v28 }
 0x249   :  { %v3576_v27 = vpop.eup %3575 }
 0x24a   :  { %v4548_v37 = vmul.f32 %v3576_v27, %v805_v43 }
 0x251   :  { %v3578_v32 = vpop.eup %3577 }
 0x252   :  { %v4550_v31 = vmul.f32 %v3578_v32, %v820_v35 }
 0x254   :  { %v1082_v36 = vpack.c.bf16 %v4550_v31, %v4548_v37 }
 0x256   :  { %3257 = vmatmul.mubr.msk.bf16.vlgmr.msra.gmra.mrb[16].mxu0 %vm459_vm0, %v1082_v36 }
 0x257   :  { %1178 = vmatpush1.bf16.msra.mxu0 %v3455_v6  ;;  %1209 = vmatprep.mubr.bf16.mxu0 %v5898_v38 }
 0x258   :  { %1179 = vmatprep.subr.bf16.mxu0 %v3460_v42 }
 0x25b   :  { %1180 = vmatpush1.bf16.msra.mxu0 %v3458_v47 }
 0x25e   :  { %3258 = vmatmul.mubr.msk.bf16.vlgmr.msra.gmra.mrb[20].mxu0 %vm459_vm0, %v1082_v36 }
 0x25f   :  { %1704 = vmatprep.mubr.bf16.mxu0 %v5898_v38 }
 0x260   :  { %v4567_v46 = vpop.f32.mrb[0].mxu1 }
 0x261   :  { %5999 = vst [vmem:[#allocation18_spill] sm:$0xff] %v4567_v46  ;;  %v4569_v49 = vpop.f32.mrb[1].mxu1 }
 0x262   :  { %6000 = vst [vmem:[#allocation19_spill] sm:$0xff] %v4569_v49  ;;  %v4571_v48 = vpop.f32.mrb[2].mxu1 }
 0x263   :  { %6001 = vst [vmem:[#allocation20_spill] sm:$0xff] %v4571_v48  ;;  %v4573_v10 = vpop.f32.mrb[3].mxu1 }
 0x264   :  { %6002 = vst [vmem:[#allocation21_spill] sm:$0xff] %v4573_v10 }
 0x268   :  { %v4575_v13 = vpop.f32.mrb[4].mxu1 }
 0x269   :  { %6003 = vst [vmem:[#allocation22_spill] sm:$0xff] %v4575_v13  ;;  %v4577_v52 = vpop.f32.mrb[5].mxu1 }
 0x26a   :  { %6004 = vst [vmem:[#allocation23_spill] sm:$0xff] %v4577_v52  ;;  %v4579_v9 = vpop.f32.mrb[6].mxu1 }
 0x26b   :  { %6005 = vst [vmem:[#allocation24_spill] sm:$0xff] %v4579_v9  ;;  %v4581_v45 = vpop.f32.mrb[7].mxu1 }
 0x26c   :  { %6006 = vst [vmem:[#allocation25_spill] sm:$0xff] %v4581_v45 }
 0x270   :  { %v4583_v12 = vpop.f32.mrb[8].mxu1 }
 0x271   :  { %6007 = vst [vmem:[#allocation26_spill] sm:$0xff] %v4583_v12  ;;  %v4585_v33 = vpop.f32.mrb[9].mxu1 }
 0x272   :  { %6008 = vst [vmem:[#allocation27_spill] sm:$0xff] %v4585_v33  ;;  %v4587_v19 = vpop.f32.mrb[10].mxu1 }
 0x273   :  { %6009 = vst [vmem:[#allocation28_spill] sm:$0xff] %v4587_v19  ;;  %v4589_v51 = vpop.f32.mrb[11].mxu1 }
 0x274   :  { %6010 = vst [vmem:[#allocation29_spill] sm:$0xff] %v4589_v51 }
 0x278   :  { %v4591_v55 = vpop.f32.mrb[12].mxu1 }
 0x279   :  { %6011 = vst [vmem:[#allocation30_spill] sm:$0xff] %v4591_v55  ;;  %v4593_v50 = vpop.f32.mrb[13].mxu1 }
 0x27a   :  { %6012 = vst [vmem:[#allocation31_spill] sm:$0xff] %v4593_v50  ;;  %v4595_v44 = vpop.f32.mrb[14].mxu1 }
 0x27b   :  { %6013 = vst [vmem:[#allocation32_spill] sm:$0xff] %v4595_v44  ;;  %v4597_v58 = vpop.f32.mrb[15].mxu1 }
 0x27c   :  { %6014 = vst [vmem:[#allocation33_spill] sm:$0xff] %v4597_v58 }
 0x280   :  { %v4599_v57 = vpop.f32.mrb[16].mxu1 }
 0x281   :  { %6015 = vst [vmem:[#allocation34_spill] sm:$0xff] %v4599_v57  ;;  %v4601_v39 = vpop.f32.mrb[17].mxu1 }
 0x282   :  { %6016 = vst [vmem:[#allocation35_spill] sm:$0xff] %v4601_v39  ;;  %v4603_v54 = vpop.f32.mrb[18].mxu1 }
 0x283   :  { %6017 = vst [vmem:[#allocation36_spill] sm:$0xff] %v4603_v54  ;;  %v4605_v59 = vpop.f32.mrb[19].mxu1 }
 0x284   :  { %6018 = vst [vmem:[#allocation37_spill] sm:$0xff] %v4605_v59 }
 0x288   :  { %v4607_v41 = vpop.f32.mrb[20].mxu1 }
 0x289   :  { %6019 = vst [vmem:[#allocation38_spill] sm:$0xff] %v4607_v41  ;;  %v4609_v62 = vpop.f32.mrb[21].mxu1 }
 0x28a   :  { %6020 = vst [vmem:[#allocation39_spill] sm:$0xff] %v4609_v62  ;;  %v4611_v56 = vpop.f32.mrb[22].mxu1 }
 0x28b   :  { %6021 = vst [vmem:[#allocation40_spill] sm:$0xff] %v4611_v56  ;;  %v4613_v53 = vpop.f32.mrb[23].mxu1 }
 0x28c   :  { %6022 = vst [vmem:[#allocation41_spill] sm:$0xff] %v4613_v53 }
 0x329   :  { %v1168_v34 = vpop.f32.mrb[16].mxu0 }
 0x32a   :  { %v4615_v63 = vpop.f32.mrb[17].mxu0  ;;  %v1220_v61 = vadd.f32 %v1168_v34, %v4569_v49  ;;  %v1222_v4 = vadd.f32 %v4567_v46, %v1168_v34  ;;  %v1224_v3 = vadd.f32 %v1168_v34, %v4577_v52  ;;  %v1226_v22 = vadd.f32 %v4575_v13, %v1168_v34 }
 0x32b   :  { %v1172_v60 = vpop.f32.mrb[18].mxu0  ;;  %v1228_v11 = vadd.f32 %v1168_v34, %v4585_v33  ;;  %v1230_v20 = vadd.f32 %v4583_v12, %v1168_v34  ;;  %v1232_v24 = vadd.f32 %v1168_v34, %v4593_v50  ;;  %v4625_v43 = vadd.f32 %v4591_v55, %v1168_v34 }
 0x32c   :  { %v4627_v14 = vpop.f32.mrb[19].mxu0  ;;  %3579 = vtanh.f32 %v1220_v61  ;;  %v1221_v7 = vadd.f32 %v1172_v60, %v4573_v10  ;;  %v1225_v1 = vadd.f32 %v1172_v60, %v4581_v45  ;;  %v1227_v15 = vadd.f32 %v4579_v9, %v1172_v60 }
 0x32d   :  { %3581 = vtanh.f32 %v1222_v4  ;;  %v1229_v17 = vadd.f32 %v1172_v60, %v4589_v51  ;;  %v1231_v21 = vadd.f32 %v4587_v19, %v1172_v60  ;;  %v1233_v25 = vadd.f32 %v1172_v60, %v4597_v58  ;;  %v4669_v4 = vld [vmem:[#allocation9 + $0x1] ss:$0 sm:$0xff] }
 0x32e   :  { %3583 = vtanh.f32 %v1221_v7  ;;  %v1235_v23 = vadd.f32 %v4595_v44, %v1172_v60  ;;  %v1237_v8 = vadd.f32 %v1172_v60, %v4605_v59  ;;  %v4638_v5 = vadd.f32 %v1168_v34, %v4601_v39 }
 0x32f   :  { %3585 = vtanh.f32 %v1225_v1  ;;  %v4641_v26 = vadd.f32 %v4603_v54, %v1172_v60  ;;  %v4644_v28 = vadd.f32 %v4599_v57, %v1168_v34  ;;  %v4647_v29 = vadd.f32 %v1172_v60, %v4613_v53 }
 0x330   :  { %3587 = vtanh.f32 %v1224_v3  ;;  %v4650_v35 = vadd.f32 %v1168_v34, %v4609_v62  ;;  %v4653_v27 = vadd.f32 %v4611_v56, %v1172_v60  ;;  %v4656_v32 = vadd.f32 %v4607_v41, %v1168_v34 }
 0x331   :  { %v4658_v6 = vpop.f32.mrb[20].mxu0  ;;  %v4661_v36 = vadd.f32 %v4571_v48, %v1172_v60  ;;  %3589 = vtanh.f32 %v1227_v15 }
 0x332   :  { %v4663_v42 = vpop.f32.mrb[21].mxu0  ;;  %3591 = vtanh.f32 %v1226_v22 }
 0x333   :  { %v4665_v47 = vpop.f32.mrb[22].mxu0  ;;  %3593 = vtanh.f32 %v1229_v17 }
 0x334   :  { %v4667_v61 = vpop.f32.mrb[23].mxu0  ;;  %3595 = vtanh.f32 %v1228_v11 }
 0x335   :  { %3597 = vtanh.f32 %v1231_v21 }
 0x336   :  { %v3580_v3 = vpop.eup %3579  ;;  %3599 = vtanh.f32 %v1230_v20 }
 0x337   :  { %v3582_v7 = vpop.eup %3581  ;;  %v1274_v34 = vmul.f32 %v3580_v3, %v4669_v4  ;;  %3601 = vtanh.f32 %v1233_v25 }
 0x338   :  { %v3584_v1 = vpop.eup %3583  ;;  %v1276_v15 = vmul.f32 %v3582_v7, %v4669_v4  ;;  %3603 = vtanh.f32 %v1232_v24 }
 0x339   :  { %v3586_v0 = vpop.eup %3585  ;;  %v1298_v60 = vsel %vm459_vm0, %v1274_v34, 0.0  ;;  %v1275_v38 = vmul.f32 %v3584_v1, %v4669_v4  ;;  %3605 = vtanh.f32 %v1235_v23 }
 0x33a   :  { %v3588_v2 = vpop.eup %3587  ;;  %1299 = vadd.xlane.f32.xlu0 %v1298_v60  ;;  %v1279_v22 = vmul.f32 %v3586_v0, %v4669_v4  ;;  %v1304_v3 = vsel %vm459_vm0, %v1276_v15, 0.0  ;;  %3607 = vtanh.f32 %v4625_v43 }
 0x33b   :  { %v1301_v41 = vsel %vm459_vm0, %v1275_v38, 0.0  ;;  %v3590_v17 = vpop.eup %3589  ;;  %v1278_v11 = vmul.f32 %v3588_v2, %v4669_v4  ;;  %3609 = vtanh.f32 %v1237_v8 }
 0x33c   :  { %1302 = vadd.xlane.f32.xlu1 %v1301_v41  ;;  %v3592_v62 = vpop.eup %3591  ;;  %v1313_v34 = vsel %vm459_vm0, %v1279_v22, 0.0  ;;  %v1281_v7 = vmul.f32 %v3590_v17, %v4669_v4  ;;  %3611 = vtanh.f32 %v4638_v5 }
 0x33d   :  { %v3594_v1 = vpop.eup %3593  ;;  %v1310_v38 = vsel %vm459_vm0, %v1278_v11, 0.0  ;;  %v1280_v0 = vmul.f32 %v3592_v62, %v4669_v4  ;;  %3613 = vtanh.f32 %v4641_v26 }
 0x33e   :  { %1305 = vadd.xlane.f32.xlu0 %v1304_v3  ;;  %v3596_v41 = vpop.eup %3595  ;;  %v1319_v20 = vsel %vm459_vm0, %v1281_v7, 0.0  ;;  %v1283_v2 = vmul.f32 %v3594_v1, %v4669_v4  ;;  %3615 = vtanh.f32 %v4644_v28 }
 0x33f   :  { %v3598_v21 = vpop.eup %3597  ;;  %v1316_v25 = vsel %vm459_vm0, %v1280_v0, 0.0  ;;  %v1282_v60 = vmul.f32 %v3596_v41, %v4669_v4  ;;  %3617 = vtanh.f32 %v4647_v29 }
 0x340   :  { %1314 = vadd.xlane.f32.xlu1 %v1313_v34  ;;  %v3600_v24 = vpop.eup %3599  ;;  %v1325_v62 = vsel %vm459_vm0, %v1283_v2, 0.0  ;;  %v1285_v15 = vmul.f32 %v3598_v21, %v4669_v4  ;;  %3619 = vtanh.f32 %v4650_v35 }
 0x341   :  { %v3602_v23 = vpop.eup %3601  ;;  %v1322_v22 = vsel %vm459_vm0, %v1282_v60, 0.0  ;;  %v1284_v17 = vmul.f32 %v3600_v24, %v4669_v4  ;;  %3621 = vtanh.f32 %v4653_v27 }
 0x342   :  { %1311 = vadd.xlane.f32.xlu0 %v1310_v38  ;;  %v3604_v43 = vpop.eup %3603  ;;  %v1331_v3 = vsel %vm459_vm0, %v1285_v15, 0.0  ;;  %v1287_v8 = vmul.f32 %v3602_v23, %v4669_v4  ;;  %3623 = vtanh.f32 %v4656_v32 }
 0x343   :  { %v3606_v11 = vpop.eup %3605  ;;  %v1328_v34 = vsel %vm459_vm0, %v1284_v17, 0.0  ;;  %v1286_v5 = vmul.f32 %v3604_v43, %v4669_v4  ;;  %3625 = vtanh.f32 %v4661_v36 }
 0x344   :  { %1320 = vadd.xlane.f32.xlu1 %v1319_v20  ;;  %v3608_v7 = vpop.eup %3607  ;;  %v1337_v1 = vsel %vm459_vm0, %v1287_v8, 0.0  ;;  %v1289_v26 = vmul.f32 %v3606_v11, %v4669_v4 }
 0x345   :  { %v3610_v38 = vpop.eup %3609  ;;  %v1334_v0 = vsel %vm459_vm0, %v1286_v5, 0.0  ;;  %v1288_v28 = vmul.f32 %v3608_v7, %v4669_v4 }
 0x346   :  { %1317 = vadd.xlane.f32.xlu0 %v1316_v25  ;;  %v3612_v41 = vpop.eup %3611  ;;  %v1343_v20 = vsel %vm459_vm0, %v1289_v26, 0.0  ;;  %v1291_v29 = vmul.f32 %v3610_v38, %v4669_v4 }
 0x347   :  { %v3614_v2 = vpop.eup %3613  ;;  %v1340_v21 = vsel %vm459_vm0, %v1288_v28, 0.0  ;;  %v1290_v35 = vmul.f32 %v3612_v41, %v4669_v4  ;;  %v384_v28 = vrot.slane %v4487_v18, %v4334_v16  ;;  %v4730_v41 = vpop.permute.xlu1 %269 }
 0x348   :  { %1326 = vadd.xlane.f32.xlu1 %v1325_v62  ;;  %v3616_v25 = vpop.eup %3615  ;;  %v1349_v60 = vsel %vm459_vm0, %v1291_v29, 0.0  ;;  %v1293_v24 = vmul.f32 %v3614_v2, %v4669_v4  ;;  %6023 = vst [vmem:[#allocation42_spill] sm:$0xff] %v4730_v41  ;;  %v4734_v29 = vpop.permute.xlu0 %265 }
 0x349   :  { %v3618_v62 = vpop.eup %3617  ;;  %v1346_v27 = vsel %vm459_vm0, %v1290_v35, 0.0  ;;  %v1292_v15 = vmul.f32 %v3616_v25, %v4669_v4  ;;  %6025 = vst [vmem:[#allocation44_spill] sm:$0xff] %v4734_v29 }
 0x34a   :  { %1323 = vadd.xlane.f32.xlu0 %v1322_v22  ;;  %v3620_v23 = vpop.eup %3619  ;;  %v1355_v32 = vsel %vm459_vm0, %v1293_v24, 0.0  ;;  %v1295_v22 = vmul.f32 %v3618_v62, %v4669_v4 }
 0x34b   :  { %v3622_v17 = vpop.eup %3621  ;;  %v1352_v43 = vsel %vm459_vm0, %v1292_v15, 0.0 }
 0x34c   :  { %1332 = vadd.xlane.f32.xlu1 %v1331_v3  ;;  %v1294_v3 = vmul.f32 %v3620_v23, %v4669_v4  ;;  %v3624_v8 = vpop.eup %3623  ;;  %v1361_v36 = vsel %vm459_vm0, %v1295_v22, 0.0  ;;  %v1297_v11 = vmul.f32 %v3622_v17, %v4669_v4  ;;  %v3462_v22 = vld [vmem:[#allocation12] ss:$12 sps:$4 sm:$0xff]   ;;  %v5906_v17 = vmov 0.0  }
 0x34d   :  { %v1296_v5 = vmul.f32 %v3624_v8, %v4669_v4  ;;  %v3626_v7 = vpop.eup %3625  ;;  %3386 = vmatprep.subr.bf16.mxu1 %v5906_v17  ;;  %3392 = vmatprep.mubr.msk.bf16.mxu1 %vm4126_vm2, %v5906_v17  ;;  %v3468_v8 = vld [vmem:[#allocation12 + $0x20] ss:$12 sps:$4 sm:$0xff]  }
 0x34e   :  { %1329 = vadd.xlane.f32.xlu0 %v1328_v34  ;;  %v1358_v34 = vsel %vm459_vm0, %v1294_v3, 0.0  ;;  %v1277_v38 = vmul.f32 %v3626_v7, %v4669_v4  ;;  %v3467_v3 = vld [vmem:[#allocation12 + $0x1c] ss:$12 sps:$4 sm:$0xff]   ;;  %v3472_v7 = vld [vmem:[#allocation12 + $0x38] ss:$12 sps:$4 sm:$0xff]  }
 0x34f   :  { %v1364_v26 = vsel %vm459_vm0, %v1296_v5, 0.0  ;;  %v3471_v5 = vld [vmem:[#allocation12 + $0x34] ss:$12 sps:$4 sm:$0xff]  }
 0x350   :  { %1338 = vadd.xlane.f32.xlu1 %v1337_v1  ;;  %v1367_v1 = vsel %vm459_vm0, %v1297_v11, 0.0  ;;  %v3465_v11 = vld [vmem:[#allocation12 + $0x18] ss:$12 sps:$4 sm:$0xff]  }
 0x352   :  { %1335 = vadd.xlane.f32.xlu0 %v1334_v0  ;;  %v1307_v0 = vsel %vm459_vm0, %v1277_v38, 0.0 }
 0x354   :  { %1344 = vadd.xlane.f32.xlu1 %v1343_v20  ;;  %v4732_v20 = vpop.permute.xlu1 %276 }
 0x355   :  { %6024 = vst [vmem:[#allocation43_spill] sm:$0xff] %v4732_v20 }
 0x356   :  { %1341 = vadd.xlane.f32.xlu0 %v1340_v21  ;;  %v4738_v21 = vpop.permute.xlu0 %287 }
 0x357   :  { %6027 = vst [vmem:[#allocation46_spill] sm:$0xff] %v4738_v21 }
 0x358   :  { %1350 = vadd.xlane.f32.xlu1 %v1349_v60  ;;  %v4736_v2 = vpop.permute.xlu1 %280 }
 0x359   :  { %6026 = vst [vmem:[#allocation45_spill] sm:$0xff] %v4736_v2 }
 0x35a   :  { %1347 = vadd.xlane.f32.xlu0 %v1346_v27  ;;  %v4742_v35 = vpop.permute.xlu0 %298 }
 0x35b   :  { %6029 = vst [vmem:[#allocation48_spill] sm:$0xff] %v4742_v35 }
 0x35c   :  { %1356 = vadd.xlane.f32.xlu1 %v1355_v32  ;;  %v4740_v4 = vpop.permute.xlu1 %291  ;;  %v3461_v32 = vld [vmem:[#allocation12 + $0x8] ss:$12 sps:$4 sm:$0xff]  }
 0x35d   :  { %6028 = vst [vmem:[#allocation47_spill] sm:$0xff] %v4740_v4  ;;  %3387 = vmatpush3.bf16.msra.mxu1 %v3461_v32 }
 0x35e   :  { %1353 = vadd.xlane.f32.xlu0 %v1352_v43  ;;  %v4746_v60 = vpop.permute.xlu0 %309  ;;  %v3464_v43 = vld [vmem:[#allocation12 + $0x4] ss:$12 sps:$4 sm:$0xff]   ;;  %3388 = vmatprep.subr.bf16.mxu1 %v5906_v17 }
 0x35f   :  { %6031 = vst [vmem:[#allocation50_spill] sm:$0xff] %v4746_v60  ;;  %1672 = vmatprep.subr.bf16.mxu0 %v3464_v43 }
 0x360   :  { %1362 = vadd.xlane.f32.xlu1 %v1361_v36  ;;  %v4744_v25 = vpop.permute.xlu1 %302  ;;  %1673 = vmatpush1.bf16.msra.mxu0 %v3462_v22 }
 0x361   :  { %6030 = vst [vmem:[#allocation49_spill] sm:$0xff] %v4744_v25  ;;  %1674 = vmatprep.subr.bf16.mxu0 %v3467_v3  ;;  %3389 = vmatpush3.bf16.msra.mxu1 %v3468_v8 }
 0x362   :  { %1359 = vadd.xlane.f32.xlu0 %v1358_v34  ;;  %v4750_v18 = vpop.permute.xlu0 %320  ;;  %3390 = vmatprep.subr.bf16.mxu1 %v5906_v17 }
 0x363   :  { %6033 = vst [vmem:[#allocation52_spill] sm:$0xff] %v4750_v18 }
 0x364   :  { %1368 = vadd.xlane.f32.xlu1 %v1367_v1  ;;  %v4748_v16 = vpop.permute.xlu1 %313  ;;  %1675 = vmatpush1.bf16.msra.mxu0 %v3465_v11  ;;  %v3469_v1 = vld [vmem:[#allocation12 + $0x30] ss:$12 sps:$4 sm:$0xff]  }
 0x365   :  { %6032 = vst [vmem:[#allocation51_spill] sm:$0xff] %v4748_v16  ;;  %1676 = vmatprep.subr.bf16.mxu0 %v3471_v5  ;;  %3391 = vmatpush3.bf16.msra.mxu1 %v3472_v7 }
 0x366   :  { %1365 = vadd.xlane.f32.xlu0 %v1364_v26  ;;  %v4754_v62 = vpop.permute.xlu0 %331  ;;  %1877 = vmatprep.subr.bf16.mxu1 %v4464_v40 }
 0x367   :  { %6035 = vst [vmem:[#allocation54_spill] sm:$0xff] %v4754_v62 }
 0x368   :  { %v4752_v24 = vpop.permute.xlu1 %324  ;;  %1677 = vmatpush1.bf16.msra.mxu0 %v3469_v1 }
 0x369   :  { %6034 = vst [vmem:[#allocation53_spill] sm:$0xff] %v4752_v24  ;;  %1834 = vmatprep.subr.bf16.mxu0 %v4443_v30 }
 0x36a   :  { %1308 = vadd.xlane.f32.xlu0 %v1307_v0  ;;  %v4758_v15 = vpop.permute.xlu0 %342 }
 0x36b   :  { %6037 = vst [vmem:[#allocation56_spill] sm:$0xff] %v4758_v15 }
 0x36c   :  { %v4756_v27 = vpop.permute.xlu1 %335 }
 0x36d   :  { %6036 = vst [vmem:[#allocation55_spill] sm:$0xff] %v4756_v27 }
 0x36e   :  { %v4765_v36 = vpop.permute.xlu0 %353 }
 0x36f   :  { %6039 = vst [vmem:[#allocation58_spill] sm:$0xff] %v4765_v36 }
 0x370   :  { %v4760_v23 = vpop.permute.xlu1 %346 }
 0x371   :  { %6038 = vst [vmem:[#allocation57_spill] sm:$0xff] %v4760_v23 }
 0x372   :  { %v4771_v26 = vpop.permute.xlu0 %364 }
 0x373   :  { %6041 = vst [vmem:[#allocation60_spill] sm:$0xff] %v4771_v26 }
 0x374   :  { %v4768_v34 = vpop.permute.xlu1 %357 }
 0x375   :  { %390 = vbcast.lane.b32.xlu1 %v384_v28, 264  ;;  %6040 = vst [vmem:[#allocation59_spill] sm:$0xff] %v4768_v34 }
 0x376   :  { %v4777_v0 = vpop.permute.xlu0 %375 }
 0x377   :  { %6043 = vst [vmem:[#allocation62_spill] sm:$0xff] %v4777_v0 }
 0x378   :  { %v4773_v38 = vpop.permute.xlu1 %368 }
 0x379   :  { %6042 = vst [vmem:[#allocation61_spill] sm:$0xff] %v4773_v38 }
 0x380   :  { %386 = vbcast.lane.b32.xlu0 %v384_v28, 256  ;;  %v4779_v28 = vpop.permute.xlu1 %379 }
 0x381   :  { %6044 = vst [vmem:[#allocation63_spill] sm:$0xff] %v4779_v28 }
 0x3c7   :  { %v1300_v32 = vpop.xlane.xlu0 %1299 }
 0x3c8   :  { %v1370_v51 = vadd.f32 %v1300_v32, %v4734_v29 }
 0x3c9   :  { %v1303_v22 = vpop.xlane.xlu1 %1302 }
 0x3cb   :  { %v1306_v43 = vpop.xlane.xlu0 %1305 }
 0x3cc   :  { %v4792_v10 = vadd.f32 %v1306_v43, %v4732_v20 }
 0x3cd   :  { %v1315_v3 = vpop.xlane.xlu1 %1314 }
 0x3ce   :  { %v1375_v12 = vadd.f32 %v1315_v3, %v4740_v4 }
 0x3cf   :  { %v1312_v8 = vpop.xlane.xlu0 %1311 }
 0x3d0   :  { %v4782_v44 = vadd.f32 %v1312_v8, %v4738_v21 }
 0x3d1   :  { %v1321_v11 = vpop.xlane.xlu1 %1320 }
 0x3d2   :  { %v1394_v8 = vmax.f32 %v1370_v51, %v4782_v44  ;;  %v1377_v43 = vadd.f32 %v1321_v11, %v4744_v25 }
 0x3d3   :  { %v1318_v17 = vpop.xlane.xlu0 %1317 }
 0x3d4   :  { %v4785_v19 = vadd.f32 %v1318_v17, %v4742_v35 }
 0x3d5   :  { %v1327_v5 = vpop.xlane.xlu1 %1326 }
 0x3d6   :  { %v1395_v17 = vmax.f32 %v4792_v10, %v4785_v19 }
 0x3d7   :  { %v1324_v7 = vpop.xlane.xlu0 %1323 }
 0x3d8   :  { %v4789_v9 = vadd.f32 %v1324_v7, %v4746_v60  ;;  %v1371_v7 = vadd.f32 %v1303_v22, %v4730_v41 }
 0x3d9   :  { %v1333_v56 = vpop.xlane.xlu1 %1332 }
 0x3da   :  { %v1381_v22 = vadd.f32 %v1333_v56, %v4752_v24 }
 0x3db   :  { %v1330_v48 = vpop.xlane.xlu0 %1329 }
 0x3dc   :  { %v4795_v50 = vadd.f32 %v1330_v48, %v4750_v18  ;;  %v1379_v48 = vadd.f32 %v1327_v5, %v4748_v16  ;;  %v1396_v18 = vmax.f32 %v1394_v8, %v4789_v9 }
 0x3dd   :  { %v1339_v53 = vpop.xlane.xlu1 %1338 }
 0x3de   :  { %v1397_v20 = vmax.f32 %v1395_v17, %v4795_v50  ;;  %v4821_v11 = vadd.f32 %v1339_v53, %v4756_v27 }
 0x3df   :  { %v1336_v40 = vpop.xlane.xlu0 %1335 }
 0x3e0   :  { %v4802_v35 = vadd.f32 %v1336_v40, %v4754_v62 }
 0x3e1   :  { %v1345_v1 = vpop.xlane.xlu1 %1344 }
 0x3e2   :  { %v1398_v5 = vmax.f32 %v1396_v18, %v4802_v35 }
 0x3e3   :  { %v1342_v57 = vpop.xlane.xlu0 %1341 }
 0x3e4   :  { %v4805_v32 = vadd.f32 %v1342_v57, %v4758_v15  ;;  %v1405_v15 = vmax.f32 %v1371_v7, %v1375_v12 }
 0x3e5   :  { %v1351_v30 = vpop.xlane.xlu1 %1350 }
 0x3e6   :  { %v1399_v8 = vmax.f32 %v1397_v20, %v4805_v32 }
 0x3e7   :  { %v1348_v54 = vpop.xlane.xlu0 %1347 }
 0x3e8   :  { %v4813_v29 = vadd.f32 %v1348_v54, %v4765_v36  ;;  %v1407_v36 = vmax.f32 %v1405_v15, %v1379_v48 }
 0x3e9   :  { %v1357_v39 = vpop.xlane.xlu1 %1356 }
 0x3ea   :  { %v1400_v56 = vmax.f32 %v1398_v5, %v4813_v29  ;;  %v4843_v15 = vadd.f32 %v1357_v39, %v4773_v38 }
 0x3eb   :  { %v1354_v59 = vpop.xlane.xlu0 %1353 }
 0x3ec   :  { %v4816_v40 = vadd.f32 %v1354_v59, %v4771_v26  ;;  %v4829_v59 = vadd.f32 %v1345_v1, %v4760_v23 }
 0x3ed   :  { %v1363_v58 = vpop.xlane.xlu1 %1362 }
 0x3ee   :  { %v1401_v53 = vmax.f32 %v1399_v8, %v4816_v40 }
 0x3ef   :  { %v1360_v55 = vpop.xlane.xlu0 %1359 }
 0x3f0   :  { %v4826_v17 = vadd.f32 %v1360_v55, %v4777_v0  ;;  %v1409_v55 = vmax.f32 %v1407_v36, %v4821_v11 }
 0x3f1   :  { %v1369_v3 = vpop.xlane.xlu1 %1368 }
 0x3f2   :  { %v1402_v0 = vmax.f32 %v1400_v56, %v4826_v17 }
 0x3f3   :  { %v1366_v45 = vpop.xlane.xlu0 %1365 }
 0x3f5   :  { %v4845_v1 = vpop.permute.xlu1 %390 }
 0x3f6   :  { %6046 = vst [vmem:[#allocation65_spill] sm:$0xff] %v4845_v1 }
 0x3f7   :  { %v1309_v60 = vpop.xlane.xlu0 %1308 }
 0x3f8   :  { %v1373_v57 = vadd.f32 %v1309_v60, %v4736_v2  ;;  %v4832_v60 = vadd.f32 %v1351_v30, %v4768_v34  ;;  %v4848_v30 = vadd.f32 %v1363_v58, %v4779_v28  ;;  %v4885_v28 = vld [vmem:[#allocation4 + $0x18] sm:$0xff]  }
 0x3fa   :  { %v1406_v54 = vmax.f32 %v1373_v57, %v1377_v43 }
 0x3fb   :  { %v4834_v26 = vpop.permute.xlu0 %386 }
 0x3fc   :  { %6045 = vst [vmem:[#allocation64_spill] sm:$0xff] %v4834_v26  ;;  %v1408_v18 = vmax.f32 %v1406_v54, %v1381_v22  ;;  %v4839_v20 = vadd.f32 %v1366_v45, %v4834_v26  ;;  %v1411_v54 = vmax.f32 %v1409_v55, %v4832_v60  ;;  %v4855_v45 = vadd.f32 %v1369_v3, %v4845_v1 }
 0x3fe   :  { %v1410_v5 = vmax.f32 %v1408_v18, %v4829_v59  ;;  %v1403_v8 = vmax.f32 %v1401_v53, %v4839_v20  ;;  %v1413_v26 = vmax.f32 %v1411_v54, %v4848_v30  ;;  %v4873_v54 = vld [vmem:[#allocation4 + $0x8] sm:$0xff]  }
 0x400   :  { %v1412_v36 = vmax.f32 %v1410_v5, %v4843_v15  ;;  %v4858_v39 = vmax.f32 %v1402_v0, %v1403_v8  ;;  %v4869_v5 = vld [vmem:[#allocation4] sm:$0xff]  }
 0x402   :  { %v1414_v58 = vmax.f32 %v1412_v36, %v4855_v45  ;;  %v1416_v62 = vsub.f32 %v1370_v51, %v4858_v39 }
 0x404   :  { %v4863_v56 = vmax.f32 %v1413_v26, %v1414_v58  ;;  %v1440_v18 = vmul.f32 1.442695, %v1416_v62 }
 0x406   :  { %v1417_v53 = vsub.f32 %v1371_v7, %v4863_v56  ;;  %v1419_v55 = vsub.f32 %v1373_v57, %v4863_v56  ;;  %v1421_v3 = vsub.f32 %v1375_v12, %v4863_v56  ;;  %v1423_v1 = vsub.f32 %v1377_v43, %v4863_v56  ;;  %v4879_v43 = vld [vmem:[#allocation4 + $0x10] sm:$0xff]  }
 0x407   :  { %v1425_v62 = vsub.f32 %v1379_v48, %v4863_v56  ;;  %v1427_v26 = vsub.f32 %v1381_v22, %v4863_v56  ;;  %3627 = vpow2.f32 %v1440_v18  ;;  %v1429_v51 = vsub.f32 %v4821_v11, %v4863_v56 }
 0x408   :  { %v1442_v7 = vmul.f32 1.442695, %v1417_v53  ;;  %v1446_v57 = vmul.f32 1.442695, %v1419_v55  ;;  %v1450_v36 = vmul.f32 1.442695, %v1421_v3  ;;  %v1418_v55 = vsub.f32 %v4792_v10, %v4858_v39 }
 0x409   :  { %v1454_v0 = vmul.f32 1.442695, %v1423_v1  ;;  %v1458_v48 = vmul.f32 1.442695, %v1425_v62  ;;  %v4891_v3 = vld [vmem:[#allocation4 + $0x20] sm:$0xff]   ;;  %v1420_v11 = vsub.f32 %v4782_v44, %v4858_v39  ;;  %v1431_v1 = vsub.f32 %v4829_v59, %v4863_v56  ;;  %v4921_v62 = vld [vmem:[#allocation4 + $0x38] sm:$0xff]  }
 0x40a   :  { %3629 = vpow2.f32 %v1442_v7  ;;  %v1462_v18 = vmul.f32 1.442695, %v1427_v26  ;;  %v4897_v7 = vld [vmem:[#allocation4 + $0x28] sm:$0xff]   ;;  %v1466_v58 = vmul.f32 1.442695, %v1429_v51  ;;  %v1424_v26 = vsub.f32 %v4789_v9, %v4858_v39 }
 0x40b   :  { %3631 = vpow2.f32 %v1446_v57  ;;  %v1422_v57 = vsub.f32 %v4785_v19, %v4858_v39  ;;  %v1444_v22 = vmul.f32 1.442695, %v1418_v55  ;;  %v1433_v19 = vsub.f32 %v4832_v60, %v4863_v56 }
 0x40c   :  { %3633 = vpow2.f32 %v1450_v36  ;;  %v4905_v36 = vld [vmem:[#allocation4 + $0x30] sm:$0xff]   ;;  %v1428_v51 = vsub.f32 %v4802_v35, %v4858_v39  ;;  %v1430_v44 = vsub.f32 %v4805_v32, %v4858_v39  ;;  %v1432_v59 = vsub.f32 %v4813_v29, %v4858_v39 }
 0x40d   :  { %3635 = vpow2.f32 %v1454_v0  ;;  %v1426_v0 = vsub.f32 %v4795_v50, %v4858_v39  ;;  %v1452_v10 = vmul.f32 1.442695, %v1422_v57  ;;  %v1434_v60 = vsub.f32 %v4816_v40, %v4858_v39 }
 0x40e   :  { %3637 = vpow2.f32 %v1458_v48  ;;  %v1448_v48 = vmul.f32 1.442695, %v1420_v11  ;;  %v1456_v55 = vmul.f32 1.442695, %v1424_v26  ;;  %v1436_v11 = vsub.f32 %v4826_v17, %v4858_v39 }
 0x40f   :  { %3639 = vpow2.f32 %v1462_v18  ;;  %v1470_v18 = vmul.f32 1.442695, %v1431_v1  ;;  %v1438_v32 = vsub.f32 %v4839_v20, %v4858_v39  ;;  %v1474_v57 = vmul.f32 1.442695, %v1433_v19 }
 0x410   :  { %3641 = vpow2.f32 %v1466_v58  ;;  %v1460_v9 = vmul.f32 1.442695, %v1426_v0  ;;  %v1464_v53 = vmul.f32 1.442695, %v1428_v51  ;;  %v6047_v58 = vunpack.c.h.bf16 %v4869_v5 }
 0x411   :  { %v3628_v35 = vpop.eup %3627  ;;  %3643 = vpow2.f32 %v1444_v22  ;;  %v1468_v40 = vmul.f32 1.442695, %v1430_v44  ;;  %v1472_v26 = vmul.f32 1.442695, %v1432_v59  ;;  %v6048_v17 = vunpack.c.h.bf16 %v4873_v54 }
 0x412   :  { %3645 = vpow2.f32 %v1448_v48  ;;  %v1435_v20 = vsub.f32 %v4843_v15, %v4863_v56  ;;  %v6049_v22 = vunpack.c.h.bf16 %v4879_v43  ;;  %v6050_v48 = vunpack.c.h.bf16 %v4885_v28 }
 0x413   :  { %3647 = vpow2.f32 %v1452_v10  ;;  %v1437_v10 = vsub.f32 %v4848_v30, %v4863_v56  ;;  %v6051_v15 = vunpack.c.h.bf16 %v4891_v3 }
 0x414   :  { %v3630_v29 = vpop.eup %3629  ;;  %3649 = vpow2.f32 %v1456_v55 }
 0x415   :  { %v3632_v50 = vpop.eup %3631  ;;  %v1535_v8 = vmul.f32 %v3630_v29, %v6047_v58  ;;  %3651 = vpow2.f32 %v1470_v18 }
 0x416   :  { %v3634_v1 = vpop.eup %3633  ;;  %v1499_v12 = vadd.f32 %v3632_v50, %v3630_v29  ;;  %v1537_v38 = vmul.f32 %v3632_v50, %v6048_v17  ;;  %3653 = vpow2.f32 %v1460_v9  ;;  %v1439_v29 = vsub.f32 %v4855_v45, %v4863_v56 }
 0x417   :  { %v3636_v39 = vpop.eup %3635  ;;  %v1539_v0 = vmul.f32 %v3634_v1, %v6049_v22  ;;  %v1581_v19 = vsel %vm909_vm1, %v1535_v8, 0.0  ;;  %3655 = vpow2.f32 %v1474_v57  ;;  %v1476_v17 = vmul.f32 1.442695, %v1434_v60 }
 0x418   :  { %v3638_v44 = vpop.eup %3637  ;;  %v1500_v51 = vadd.f32 %v3634_v1, %v1499_v12  ;;  %v1541_v59 = vmul.f32 %v3636_v39, %v6050_v48  ;;  %v1582_v50 = vsel %vm909_vm1, %v1537_v38, 0.0  ;;  %3657 = vpow2.f32 %v1464_v53 }
 0x419   :  { %v1543_v55 = vmul.f32 %v3638_v44, %v6051_v15  ;;  %v1583_v18 = vadd.f32 %v1582_v50, %v1581_v19  ;;  %v3640_v8 = vpop.eup %3639  ;;  %v1584_v30 = vsel %vm909_vm1, %v1539_v0, 0.0  ;;  %v1478_v12 = vmul.f32 1.442695, %v1435_v20 }
 0x41a   :  { %v1501_v58 = vadd.f32 %v3636_v39, %v1500_v51  ;;  %v1480_v22 = vmul.f32 1.442695, %v1436_v11  ;;  %v6052_v38 = vunpack.c.l.bf16 %v4869_v5  ;;  %v3642_v57 = vpop.eup %3641  ;;  %v1586_v15 = vsel %vm909_vm1, %v1541_v59, 0.0 }
 0x41b   :  { %v1585_v1 = vadd.f32 %v1584_v30, %v1583_v18  ;;  %3659 = vpow2.f32 %v1468_v40  ;;  %v1482_v19 = vmul.f32 1.442695, %v1437_v10  ;;  %v3644_v50 = vpop.eup %3643  ;;  %v6053_v45 = vunpack.c.h.bf16 %v4897_v7 }
 0x41c   :  { %v1534_v9 = vmul.f32 %v3628_v35, %v6052_v38  ;;  %v1502_v48 = vadd.f32 %v3638_v44, %v1501_v58  ;;  %v1588_v53 = vsel %vm909_vm1, %v1543_v55, 0.0  ;;  %v1486_v20 = vmul.f32 1.442695, %v1439_v29  ;;  %v3646_v0 = vpop.eup %3645 }
 0x41d   :  { %v1545_v56 = vmul.f32 %v3640_v8, %v6053_v45  ;;  %v1587_v39 = vadd.f32 %v1586_v15, %v1585_v1  ;;  %v1488_v11 = vadd.f32 %v3644_v50, %v3628_v35  ;;  %3661 = vpow2.f32 %v1478_v12  ;;  %v3648_v44 = vpop.eup %3647 }
 0x41e   :  { %v1503_v60 = vadd.f32 %v3640_v8, %v1502_v48  ;;  %v6054_v51 = vunpack.c.l.bf16 %v4873_v54  ;;  %3663 = vpow2.f32 %v1472_v26  ;;  %v6055_v40 = vunpack.c.l.bf16 %v4879_v43  ;;  %v3650_v30 = vpop.eup %3649 }
 0x41f   :  { %v1589_v58 = vadd.f32 %v1588_v53, %v1587_v39  ;;  %v1558_v59 = vsel %vm909_vm1, %v1534_v9, 0.0  ;;  %v1484_v38 = vmul.f32 1.442695, %v1438_v32  ;;  %v1489_v55 = vadd.f32 %v3646_v0, %v1488_v11  ;;  %v3652_v29 = vpop.eup %3651 }
 0x420   :  { %v1536_v18 = vmul.f32 %v3644_v50, %v6054_v51  ;;  %v1538_v10 = vmul.f32 %v3646_v0, %v6055_v40  ;;  %v1504_v1 = vadd.f32 %v3642_v57, %v1503_v60  ;;  %3665 = vpow2.f32 %v1482_v19  ;;  %v3654_v50 = vpop.eup %3653  ;;  %v4970_v51 = vld [vmem:[#allocation4 + $0x40] sm:$0xff]  }
 0x421   :  { %v1590_v35 = vsel %vm909_vm1, %v1545_v56, 0.0  ;;  %v6056_v8 = vunpack.c.l.bf16 %v4885_v28  ;;  %v6057_v48 = vunpack.c.h.bf16 %v4905_v36  ;;  %v1490_v39 = vadd.f32 %v3648_v44, %v1489_v55  ;;  %v3656_v53 = vpop.eup %3655 }
 0x422   :  { %v1559_v26 = vsel %vm909_vm1, %v1536_v18, 0.0  ;;  %v1505_v45 = vadd.f32 %v3652_v29, %v1504_v1  ;;  %3667 = vpow2.f32 %v1486_v20  ;;  %v1591_v32 = vadd.f32 %v1590_v35, %v1589_v58  ;;  %v3658_v60 = vpop.eup %3657 }
 0x423   :  { %v1540_v12 = vmul.f32 %v3648_v44, %v6056_v8  ;;  %v1547_v15 = vmul.f32 %v3642_v57, %v6057_v48  ;;  %v1560_v9 = vadd.f32 %v1559_v26, %v1558_v59  ;;  %3669 = vpow2.f32 %v1476_v17 }
 0x424   :  { %v6058_v19 = vunpack.c.l.bf16 %v4891_v3  ;;  %v1561_v56 = vsel %vm909_vm1, %v1538_v10, 0.0  ;;  %v5977_v11 = vunpack.c.l.bf16 %v4921_v62  ;;  %v5978_v57 = vunpack.c.h.bf16 %v4970_v51 }
 0x425   :  { %v1491_v18 = vadd.f32 %v3650_v30, %v1490_v39  ;;  %v1562_v40 = vadd.f32 %v1561_v56, %v1560_v9  ;;  %v1506_v44 = vadd.f32 %v3656_v53, %v1505_v45  ;;  %3671 = vpow2.f32 %v1480_v22  ;;  %v3660_v59 = vpop.eup %3659 }
 0x426   :  { %v1542_v0 = vmul.f32 %v3650_v30, %v6058_v19  ;;  %v6059_v20 = vunpack.c.l.bf16 %v4897_v7  ;;  %v1563_v17 = vsel %vm909_vm1, %v1540_v12, 0.0  ;;  %v6060_v10 = vunpack.c.h.bf16 %v4921_v62 }
 0x427   :  { %v1492_v1 = vadd.f32 %v3654_v50, %v1491_v18  ;;  %v1564_v35 = vadd.f32 %v1563_v17, %v1562_v40  ;;  %v1592_v8 = vsel %vm909_vm1, %v1547_v15, 0.0  ;;  %3673 = vpow2.f32 %v1484_v38  ;;  %v3662_v45 = vpop.eup %3661 }
 0x428   :  { %v1544_v58 = vmul.f32 %v3654_v50, %v6059_v20  ;;  %v1549_v55 = vmul.f32 %v3652_v29, %v6060_v10  ;;  %v6061_v48 = vunpack.c.l.bf16 %v4905_v36  ;;  %v1565_v26 = vsel %vm909_vm1, %v1542_v0, 0.0  ;;  %v3664_v19 = vpop.eup %3663  ;;  %v4983_v50 = vld [vmem:[#allocation4 + $0x48] sm:$0xff]  }
 0x429   :  { %v1593_v22 = vadd.f32 %v1592_v8, %v1591_v32  ;;  %v5975_v39 = vunpack.c.l.bf16 %v4970_v51  ;;  %v1493_v9 = vadd.f32 %v3658_v60, %v1492_v1  ;;  %v1566_v12 = vadd.f32 %v1565_v26, %v1564_v35 }
 0x42a   :  { %v1546_v30 = vmul.f32 %v3658_v60, %v6061_v48  ;;  %v5976_v29 = vunpack.c.h.bf16 %v4983_v50  ;;  %v1507_v56 = vadd.f32 %v3662_v45, %v1506_v44  ;;  %v1548_v38 = vmul.f32 %v3660_v59, %v5977_v11  ;;  %v3666_v18 = vpop.eup %3665  ;;  %v6081_v11 = vld [vmem:[#allocation30_spill] sm:$0xff] }
 0x42b   :  { %v1567_v15 = vsel %vm909_vm1, %v1544_v58, 0.0  ;;  %v1494_v40 = vadd.f32 %v3660_v59, %v1493_v9  ;;  %v1551_v32 = vmul.f32 %v3656_v53, %v5978_v57  ;;  %v1594_v60 = vsel %vm909_vm1, %v1549_v55, 0.0  ;;  %v4996_v59 = vld [vmem:[#allocation4 + $0x50] sm:$0xff]  }
 0x42c   :  { %v1568_v0 = vadd.f32 %v1567_v15, %v1566_v12  ;;  %v1508_v20 = vadd.f32 %v3666_v18, %v1507_v56  ;;  %v1569_v17 = vsel %vm909_vm1, %v1546_v30, 0.0  ;;  %v1595_v1 = vadd.f32 %v1594_v60, %v1593_v22  ;;  %v3668_v10 = vpop.eup %3667 }
 0x42d   :  { %v5973_v44 = vunpack.c.l.bf16 %v4983_v50  ;;  %v1495_v35 = vadd.f32 %v3664_v19, %v1494_v40  ;;  %v1550_v8 = vmul.f32 %v3664_v19, %v5975_v39  ;;  %v3670_v48 = vpop.eup %3669  ;;  %v5974_v53 = vunpack.c.h.bf16 %v4996_v59  ;;  %v6080_v39 = vld [vmem:[#allocation32_spill] sm:$0xff] }
 0x42e   :  { %v1570_v58 = vadd.f32 %v1569_v17, %v1568_v0  ;;  %v1509_v26 = vadd.f32 %v3668_v10, %v1508_v20  ;;  %v1571_v55 = vsel %vm909_vm1, %v1548_v38, 0.0  ;;  %v1553_v30 = vmul.f32 %v3662_v45, %v5976_v29  ;;  %v5007_v17 = vld [vmem:[#allocation4 + $0x58] sm:$0xff]  }
 0x42f   :  { %v1496_v9 = vadd.f32 %v3670_v48, %v1495_v35  ;;  %v1596_v12 = vsel %vm909_vm1, %v1551_v32, 0.0  ;;  %v3672_v56 = vpop.eup %3671  ;;  %v5971_v15 = vunpack.c.l.bf16 %v4996_v59  ;;  %v1552_v0 = vmul.f32 %v3670_v48, %v5973_v44  ;;  %v6079_v44 = vld [vmem:[#allocation33_spill] sm:$0xff] }
 0x430   :  { %v1572_v22 = vadd.f32 %v1571_v55, %v1570_v58  ;;  %v1597_v19 = vadd.f32 %v1596_v12, %v1595_v1  ;;  %v1573_v60 = vsel %vm909_vm1, %v1550_v8, 0.0  ;;  %3675 = vrcp.f32 %v1509_v26 }
 0x431   :  { %v1497_v40 = vadd.f32 %v3672_v56, %v1496_v9  ;;  %v3674_v20 = vpop.eup %3673  ;;  %v5972_v45 = vunpack.c.h.bf16 %v5007_v17  ;;  %v1555_v32 = vmul.f32 %v3666_v18, %v5974_v53  ;;  %v1598_v58 = vsel %vm909_vm1, %v1553_v30, 0.0 }
 0x432   :  { %v1574_v38 = vadd.f32 %v1573_v60, %v1572_v22  ;;  %v1599_v1 = vadd.f32 %v1598_v58, %v1597_v19  ;;  %v5970_v55 = vunpack.c.l.bf16 %v5007_v17  ;;  %v1554_v8 = vmul.f32 %v3672_v56, %v5971_v15  ;;  %v6078_v15 = vld [vmem:[#allocation28_spill] sm:$0xff] }
 0x433   :  { %v1498_v35 = vadd.f32 %v3674_v20, %v1497_v40  ;;  %v1575_v48 = vsel %vm909_vm1, %v1552_v0, 0.0  ;;  %v1557_v9 = vmul.f32 %v3668_v10, %v5972_v45  ;;  %v1600_v22 = vsel %vm909_vm1, %v1555_v32, 0.0  ;;  %v3936_v32 = vld [vmem:[%s5893_s7 + $0x8] ss:$16 sps:$4 sm:$0xff]  }
 0x434   :  { %v1576_v26 = vadd.f32 %v1575_v48, %v1574_v38  ;;  %v1601_v12 = vadd.f32 %v1600_v22, %v1599_v1  ;;  %v1556_v18 = vmul.f32 %v3674_v20, %v5970_v55  ;;  %v1577_v30 = vsel %vm909_vm1, %v1554_v8, 0.0  ;;  %v3935_v20 = vld [vmem:[%s5893_s7] ss:$16 sps:$4 sm:$0xff]   ;;  %v3937_v1 = vld [vmem:[%s5893_s7 + $0x24] ss:$16 sps:$4 sm:$0xff]  }
 0x435   :  { %3677 = vrcp.f32 %v1498_v35  ;;  %v1602_v60 = vsel %vm909_vm1, %v1557_v9, 0.0  ;;  %v3938_v8 = vld [vmem:[%s5893_s7 + $0x2c] ss:$16 sps:$4 sm:$0xff]   ;;  %v3939_v9 = vld [vmem:[%s5893_s7 + $0x20] ss:$16 sps:$4 sm:$0xff]  }
 0x436   :  { %v1578_v19 = vadd.f32 %v1577_v30, %v1576_v26  ;;  %v1603_v35 = vadd.f32 %v1602_v60, %v1601_v12  ;;  %v1579_v56 = vsel %vm909_vm1, %v1556_v18, 0.0  ;;  %v6062_v26 = vmov 0   ;;  %v3940_v22 = vld [vmem:[%s5893_s7 + $0x28] ss:$16 sps:$4 sm:$0xff]   ;;  %v3271_v18 = vld [vmem:[%s5895_s9] ss:$0 sm:$0xff] }
 0x437   :  { %v6063_v12 = vmov 0.0  }
 0x438   :  { %v1580_v0 = vadd.f32 %v1579_v56, %v1578_v19 }
 0x43a   :  { %v3676_v40 = vpop.eup %3675 }
 0x43b   :  { %v1607_v38 = vmul.f32 %v3676_v40, %v1603_v35 }
 0x43f   :  { %v3678_v58 = vpop.eup %3677 }
 0x440   :  { %v1606_v48 = vmul.f32 %v3678_v58, %v1580_v0 }
 0x442   :  { %v1608_v10 = vpack.c.bf16 %v1607_v38, %v1606_v48  ;;  %v3274_v48 = vld [vmem:[%s5895_s9 + $0x1] ss:$0 sm:$0xff] }
 0x444   :  { %3269 = vmatmul.mubr.msk.bf16.vlgmr.msra.gmra.mrb[24].mxu0 %vm909_vm1, %v1608_v10  ;;  %3393 = vmatmul.mubr.msk.bf16.vlgmr.msra.gmra.mrb[24].mxu1 %vm909_vm1, %v1608_v10 }
 0x445   :  { %1835 = vmatpush1.bf16.msra.mxu0 %v3935_v20  ;;  %1878 = vmatpush1.bf16.msra.mxu1 %v3936_v32 }
 0x446   :  { %1836 = vmatprep.subr.bf16.mxu0 %v3937_v1  ;;  %1879 = vmatprep.subr.bf16.mxu1 %v3938_v8 }
 0x447   :  { %1866 = vmatprep.mubr.bf16.mxu0 %v6062_v26  ;;  %1909 = vmatprep.mubr.bf16.mxu1 %v6062_v26 }
 0x449   :  { %1837 = vmatpush1.bf16.msra.mxu0 %v3939_v9  ;;  %1880 = vmatpush1.bf16.msra.mxu1 %v3940_v22 }
 0x44a   :  { %3396 = vmatprep.subr.bf16.mxu1 %v6063_v12 }
 0x517   :  { %v1706_v30 = vpop.f32.mrb[24].mxu0  ;;  %v1749_v19 = vpop.f32.mrb[24].mxu1 }
 0x518   :  { %v1756_v40 = vadd.f32 %v1706_v30, %v4615_v63  ;;  %v1708_v60 = vpop.f32.mrb[25].mxu0  ;;  %v3394_v35 = vpop.f32.mrb[25].mxu1 }
 0x519   :  { %v1778_v56 = vadd.f32 %v1708_v60, %v4658_v6  ;;  %v1710_v0 = vpop.f32.mrb[26].mxu0  ;;  %v1752_v38 = vpop.f32.mrb[26].mxu1 }
 0x51a   :  { %v1764_v58 = vadd.f32 %v3271_v18, %v1756_v40  ;;  %v1757_v10 = vadd.f32 %v1710_v0, %v4627_v14  ;;  %v1712_v20 = vpop.f32.mrb[27].mxu0  ;;  %v3395_v32 = vpop.f32.mrb[27].mxu1 }
 0x51b   :  { %v1779_v1 = vadd.f32 %v1712_v20, %v4665_v47  ;;  %v1786_v63 = vadd.f32 %v3274_v48, %v1778_v56  ;;  %v3278_v47 = vld [vmem:[%s5895_s9 + $0x3] ss:$0 sm:$0xff]  ;;  %v3277_v56 = vld [vmem:[%s5895_s9 + $0x2] ss:$0 sm:$0xff] }
 0x51c   :  { %v3272_v8 = vmul.f32 -1.442695, %v1764_v58  ;;  %v1765_v9 = vadd.f32 %v3271_v18, %v1757_v10  ;;  %v1814_v58 = vadd.f32 %v3278_v47, %v4663_v42  ;;  %v1815_v20 = vadd.f32 %v3278_v47, %v4667_v61 }
 0x51d   :  { %v1787_v30 = vadd.f32 %v3274_v48, %v1779_v1  ;;  %v3275_v6 = vmul.f32 -1.442695, %v1786_v63  ;;  %v1806_v1 = vadd.f32 %v3277_v56, %v1749_v19  ;;  %v1807_v63 = vadd.f32 %v3277_v56, %v1752_v38 }
 0x51e   :  { %3679 = vpow2.f32 %v3272_v8  ;;  %v3273_v22 = vmul.f32 -1.442695, %v1765_v9 }
 0x51f   :  { %v3276_v60 = vmul.f32 -1.442695, %v1787_v30 }
 0x520   :  { %3681 = vpow2.f32 %v3273_v22 }
 0x521   :  { %3683 = vpow2.f32 %v3275_v6 }
 0x522   :  { %3685 = vpow2.f32 %v3276_v60 }
 0x528   :  { %v3680_v40 = vpop.eup %3679 }
 0x529   :  { %v1772_v35 = vadd.f32 1.0, %v3680_v40 }
 0x52a   :  { %v3682_v55 = vpop.eup %3681 }
 0x52b   :  { %3687 = vrcp.f32 %v1772_v35  ;;  %v1773_v14 = vadd.f32 1.0, %v3682_v55  ;;  %v3684_v0 = vpop.eup %3683 }
 0x52c   :  { %v3686_v32 = vpop.eup %3685  ;;  %v1794_v18 = vadd.f32 1.0, %v3684_v0 }
 0x52d   :  { %3689 = vrcp.f32 %v1773_v14  ;;  %v1795_v48 = vadd.f32 1.0, %v3686_v32 }
 0x52e   :  { %3691 = vrcp.f32 %v1794_v18 }
 0x52f   :  { %3693 = vrcp.f32 %v1795_v48 }
 0x535   :  { %v3688_v10 = vpop.eup %3687 }
 0x536   :  { %v1816_v55 = vmul.f32 %v3688_v10, %v1814_v58 }
 0x537   :  { %v3690_v8 = vpop.eup %3689 }
 0x538   :  { %v1818_v9 = vadd.f32 %v1816_v55, %v1806_v1  ;;  %v1817_v22 = vmul.f32 %v3690_v8, %v1815_v20  ;;  %v3692_v6 = vpop.eup %3691 }
 0x539   :  { %v3694_v60 = vpop.eup %3693  ;;  %v1822_v40 = vsub.f32 1.0, %v3692_v6  ;;  %v1826_v0 = vmul.f32 %v3692_v6, %v4548_v37 }
 0x53a   :  { %3695 = vtanh.f32 %v1818_v9  ;;  %v1819_v30 = vadd.f32 %v1817_v22, %v1807_v63  ;;  %v1823_v42 = vsub.f32 1.0, %v3694_v60  ;;  %v1827_v32 = vmul.f32 %v3694_v60, %v4550_v31  ;;  %v6070_v63 = vld [vmem:[#allocation26_spill] sm:$0xff] }
 0x53c   :  { %3697 = vtanh.f32 %v1819_v30  ;;  %v6071_v30 = vld [vmem:[#allocation31_spill] sm:$0xff] }
 0x544   :  { %v3696_v35 = vpop.eup %3695 }
 0x545   :  { %v1824_v14 = vmul.f32 %v3696_v35, %v1822_v40  ;;  %v6074_v35 = vld [vmem:[#allocation21_spill] sm:$0xff] }
 0x546   :  { %v3698_v61 = vpop.eup %3697 }
 0x547   :  { %v1825_v19 = vmul.f32 %v3698_v61, %v1823_v42  ;;  %v5068_v47 = vadd.f32 %v1826_v0, %v1824_v14  ;;  %v6075_v14 = vld [vmem:[#allocation25_spill] sm:$0xff]  ;;  %v6076_v61 = vld [vmem:[#allocation24_spill] sm:$0xff] }
 0x549   :  { %6064 = vst [vmem:[#allocation66_spill] sm:$0xff] %v5068_v47  ;;  %v5070_v38 = vadd.f32 %v1827_v32, %v1825_v19  ;;  %v6077_v32 = vld [vmem:[#allocation29_spill] sm:$0xff] }
 0x54b   :  { %6065 = vst [vmem:[#allocation67_spill] sm:$0xff] %v5070_v38  ;;  %v1830_v18 = vpack.c.bf16 %v5070_v38, %v5068_v47 }
 0x54d   :  { %3279 = vmatmul.mubr.msk.bf16.vlgmr.msra.gmra.mrb[28].mxu0 %vm459_vm0, %v1830_v18  ;;  %3280 = vmatmul.mubr.msk.bf16.vlgmr.msra.gmra.mrb[28].mxu1 %vm459_vm0, %v1830_v18 }
 0x54e   :  { %2561 = vmatprep.mubr.bf16.mxu0 %v6062_v26  ;;  %3402 = vmatprep.mubr.msk.bf16.mxu1 %vm4126_vm2, %v6063_v12 }
 0x620   :  { %v1868_v37 = vpop.f32.mrb[28].mxu0  ;;  %v5079_v56 = vpop.f32.mrb[28].mxu1 }
 0x621   :  { %6066 = vst [vmem:[#allocation68_spill] sm:$0xff] %v5079_v56  ;;  %v5081_v31 = vpop.f32.mrb[29].mxu0  ;;  %v5083_v58 = vpop.f32.mrb[29].mxu1  ;;  %v1920_v48 = vadd.f32 %v1868_v37, %v4569_v49  ;;  %v1922_v10 = vadd.f32 %v4567_v46, %v1868_v37  ;;  %v1924_v20 = vadd.f32 %v1868_v37, %v4577_v52  ;;  %v1926_v1 = vadd.f32 %v4575_v13, %v1868_v37  ;;  %v6097_v49 = vld [vmem:[#allocation63_spill] sm:$0xff] }
 0x622   :  { %6067 = vst [vmem:[#allocation69_spill] sm:$0xff] %v5081_v31  ;;  %6068 = vst [vmem:[#allocation70_spill] sm:$0xff] %v5083_v58  ;;  %v1872_v55 = vpop.f32.mrb[30].mxu0  ;;  %v5089_v8 = vpop.f32.mrb[30].mxu1  ;;  %v1928_v9 = vadd.f32 %v1868_v37, %v4585_v33  ;;  %v1930_v22 = vadd.f32 %v6070_v63, %v1868_v37  ;;  %v1932_v6 = vadd.f32 %v1868_v37, %v6071_v30  ;;  %v6114_v56 = vunpack.c.l.bf16 %v4879_v43 }
 0x623   :  { %6069 = vst [vmem:[#allocation71_spill] sm:$0xff] %v5089_v8  ;;  %v5094_v60 = vpop.f32.mrb[31].mxu0  ;;  %v5096_v40 = vpop.f32.mrb[31].mxu1  ;;  %3699 = vtanh.f32 %v1920_v48  ;;  %v1921_v42 = vadd.f32 %v1872_v55, %v6074_v35  ;;  %v1925_v0 = vadd.f32 %v1872_v55, %v6075_v14  ;;  %v1927_v19 = vadd.f32 %v6076_v61, %v1872_v55  ;;  %v6082_v48 = vld [vmem:[#allocation37_spill] sm:$0xff]  ;;  %v6083_v35 = vld [vmem:[#allocation35_spill] sm:$0xff]  ;;  %v6084_v14 = vld [vmem:[#allocation36_spill] sm:$0xff] }
 0x624   :  { %6072 = vst [vmem:[#allocation72_spill] sm:$0xff] %v5094_v60  ;;  %6073 = vst [vmem:[#allocation73_spill] sm:$0xff] %v5096_v40  ;;  %3701 = vtanh.f32 %v1922_v10  ;;  %v1929_v18 = vadd.f32 %v1872_v55, %v6077_v32  ;;  %v1931_v45 = vadd.f32 %v6078_v15, %v1872_v55  ;;  %v1933_v53 = vadd.f32 %v1872_v55, %v6079_v44  ;;  %v6085_v10 = vld [vmem:[#allocation34_spill] sm:$0xff]  ;;  %v6086_v32 = vld [vmem:[#allocation41_spill] sm:$0xff] }
 0x625   :  { %3703 = vtanh.f32 %v1921_v42  ;;  %v1935_v29 = vadd.f32 %v6080_v39, %v1872_v55  ;;  %v1934_v57 = vadd.f32 %v6081_v11, %v1868_v37  ;;  %v1937_v30 = vadd.f32 %v1872_v55, %v6082_v48  ;;  %v6087_v42 = vld [vmem:[#allocation20_spill] sm:$0xff]  ;;  %v6090_v48 = vld [vmem:[#allocation38_spill] sm:$0xff] }
 0x626   :  { %3705 = vtanh.f32 %v1925_v0  ;;  %v1936_v63 = vadd.f32 %v1868_v37, %v6083_v35  ;;  %v1939_v33 = vadd.f32 %v6084_v14, %v1872_v55  ;;  %v5110_v61 = vadd.f32 %v6085_v10, %v1868_v37  ;;  %v6088_v39 = vld [vmem:[#allocation40_spill] sm:$0xff]  ;;  %v6089_v0 = vld [vmem:[#allocation39_spill] sm:$0xff]  ;;  %v5127_v10 = vld [vmem:[#allocation9 + $0x1] ss:$0 sm:$0xff] }
 0x627   :  { %3707 = vtanh.f32 %v1924_v20  ;;  %v5113_v15 = vadd.f32 %v1872_v55, %v6086_v32  ;;  %v5116_v44 = vadd.f32 %v6087_v42, %v1872_v55  ;;  %v5119_v13 = vadd.f32 %v6088_v39, %v1872_v55 }
 0x628   :  { %v5122_v11 = vadd.f32 %v1868_v37, %v6089_v0  ;;  %v5125_v35 = vadd.f32 %v6090_v48, %v1868_v37  ;;  %3709 = vtanh.f32 %v1927_v19  ;;  %v6113_v8 = vunpack.c.l.bf16 %v4873_v54 }
 0x629   :  { %3711 = vtanh.f32 %v1926_v1 }
 0x62a   :  { %3713 = vtanh.f32 %v1929_v18 }
 0x62b   :  { %3715 = vtanh.f32 %v1928_v9 }
 0x62c   :  { %3717 = vtanh.f32 %v1931_v45 }
 0x62d   :  { %v3700_v20 = vpop.eup %3699  ;;  %3719 = vtanh.f32 %v1930_v22 }
 0x62e   :  { %v3702_v14 = vpop.eup %3701  ;;  %v1968_v32 = vmul.f32 %v5127_v10, %v3700_v20  ;;  %3721 = vtanh.f32 %v1933_v53 }
 0x62f   :  { %v3704_v42 = vpop.eup %3703  ;;  %v1970_v0 = vmul.f32 %v5127_v10, %v3702_v14  ;;  %3723 = vtanh.f32 %v1932_v6 }
 0x630   :  { %v3706_v52 = vpop.eup %3705  ;;  %v1992_v55 = vsel %vm459_vm0, %v1968_v32, 0.0  ;;  %v1969_v39 = vmul.f32 %v5127_v10, %v3704_v42  ;;  %3725 = vtanh.f32 %v1935_v29 }
 0x631   :  { %v3708_v37 = vpop.eup %3707  ;;  %1993 = vadd.xlane.f32.xlu0 %v1992_v55  ;;  %v1973_v19 = vmul.f32 %v5127_v10, %v3706_v52  ;;  %v1998_v20 = vsel %vm459_vm0, %v1970_v0, 0.0  ;;  %3727 = vtanh.f32 %v1934_v57 }
 0x632   :  { %v1995_v1 = vsel %vm459_vm0, %v1969_v39, 0.0  ;;  %v3710_v18 = vpop.eup %3709  ;;  %v1972_v9 = vmul.f32 %v5127_v10, %v3708_v37  ;;  %3729 = vtanh.f32 %v1937_v30 }
 0x633   :  { %1996 = vadd.xlane.f32.xlu1 %v1995_v1  ;;  %v3712_v48 = vpop.eup %3711  ;;  %v2007_v32 = vsel %vm459_vm0, %v1973_v19, 0.0  ;;  %v1975_v14 = vmul.f32 %v5127_v10, %v3710_v18  ;;  %3731 = vtanh.f32 %v1936_v63 }
 0x634   :  { %v3714_v42 = vpop.eup %3713  ;;  %v2004_v39 = vsel %vm459_vm0, %v1972_v9, 0.0  ;;  %v1974_v52 = vmul.f32 %v5127_v10, %v3712_v48  ;;  %3733 = vtanh.f32 %v1939_v33 }
 0x635   :  { %1999 = vadd.xlane.f32.xlu0 %v1998_v20  ;;  %v3716_v45 = vpop.eup %3715  ;;  %v2013_v22 = vsel %vm459_vm0, %v1975_v14, 0.0  ;;  %v1977_v0 = vmul.f32 %v5127_v10, %v3714_v42  ;;  %3735 = vtanh.f32 %v5110_v61 }
 0x636   :  { %v3718_v55 = vpop.eup %3717  ;;  %v2010_v53 = vsel %vm459_vm0, %v1974_v52, 0.0  ;;  %v1976_v37 = vmul.f32 %v5127_v10, %v3716_v45  ;;  %3737 = vtanh.f32 %v5113_v15 }
 0x637   :  { %2008 = vadd.xlane.f32.xlu1 %v2007_v32  ;;  %v3720_v1 = vpop.eup %3719  ;;  %v2019_v6 = vsel %vm459_vm0, %v1977_v0, 0.0  ;;  %v1979_v48 = vmul.f32 %v5127_v10, %v3718_v55  ;;  %3739 = vtanh.f32 %v5116_v44 }
 0x638   :  { %v3722_v19 = vpop.eup %3721  ;;  %v2016_v29 = vsel %vm459_vm0, %v1976_v37, 0.0  ;;  %v1978_v18 = vmul.f32 %v5127_v10, %v3720_v1  ;;  %3741 = vtanh.f32 %v5119_v13 }
 0x639   :  { %2005 = vadd.xlane.f32.xlu0 %v2004_v39  ;;  %v3724_v20 = vpop.eup %3723  ;;  %v2025_v57 = vsel %vm459_vm0, %v1979_v48, 0.0  ;;  %v1981_v9 = vmul.f32 %v5127_v10, %v3722_v19  ;;  %3743 = vtanh.f32 %v5122_v11 }
 0x63a   :  { %v3726_v32 = vpop.eup %3725  ;;  %v2022_v30 = vsel %vm459_vm0, %v1978_v18, 0.0  ;;  %v1980_v14 = vmul.f32 %v5127_v10, %v3724_v20  ;;  %3745 = vtanh.f32 %v5125_v35 }
 0x63b   :  { %2014 = vadd.xlane.f32.xlu1 %v2013_v22  ;;  %v3728_v63 = vpop.eup %3727  ;;  %v2031_v42 = vsel %vm459_vm0, %v1981_v9, 0.0  ;;  %v1983_v33 = vmul.f32 %v5127_v10, %v3726_v32 }
 0x63c   :  { %v3730_v39 = vpop.eup %3729  ;;  %v2028_v52 = vsel %vm459_vm0, %v1980_v14, 0.0  ;;  %v1982_v61 = vmul.f32 %v5127_v10, %v3728_v63 }
 0x63d   :  { %2011 = vadd.xlane.f32.xlu0 %v2010_v53  ;;  %v3732_v45 = vpop.eup %3731  ;;  %v2037_v22 = vsel %vm459_vm0, %v1983_v33, 0.0  ;;  %v1985_v15 = vmul.f32 %v5127_v10, %v3730_v39 }
 0x63e   :  { %v3734_v0 = vpop.eup %3733  ;;  %v2034_v55 = vsel %vm459_vm0, %v1982_v61, 0.0  ;;  %v1984_v44 = vmul.f32 %v5127_v10, %v3732_v45  ;;  %v3475_v61 = vld [vmem:[#allocation12 + $0x4] ss:$12 sps:$4 sm:$0xff]   ;;  %v3473_v45 = vld [vmem:[#allocation12] ss:$12 sps:$4 sm:$0xff]  }
 0x63f   :  { %2020 = vadd.xlane.f32.xlu1 %v2019_v6  ;;  %v3736_v53 = vpop.eup %3735  ;;  %v2043_v37 = vsel %vm459_vm0, %v1985_v15, 0.0  ;;  %v1987_v1 = vmul.f32 %v5127_v10, %v3734_v0  ;;  %2529 = vmatprep.subr.bf16.mxu0 %v3475_v61  ;;  %v3479_v15 = vld [vmem:[#allocation12 + $0x1c] ss:$12 sps:$4 sm:$0xff]   ;;  %v3477_v0 = vld [vmem:[#allocation12 + $0x18] ss:$12 sps:$4 sm:$0xff]  }
 0x640   :  { %v3738_v6 = vpop.eup %3737  ;;  %v2040_v13 = vsel %vm459_vm0, %v1984_v44, 0.0  ;;  %v1986_v48 = vmul.f32 %v5127_v10, %v3736_v53  ;;  %2530 = vmatpush1.bf16.msra.mxu0 %v3473_v45  ;;  %v3483_v44 = vld [vmem:[#allocation12 + $0x34] ss:$12 sps:$4 sm:$0xff]   ;;  %v3484_v53 = vld [vmem:[#allocation12 + $0x38] ss:$12 sps:$4 sm:$0xff]  }
 0x641   :  { %2017 = vadd.xlane.f32.xlu0 %v2016_v29  ;;  %v3740_v19 = vpop.eup %3739  ;;  %v2049_v11 = vsel %vm459_vm0, %v1987_v1, 0.0  ;;  %v1989_v29 = vmul.f32 %v5127_v10, %v3738_v6  ;;  %2531 = vmatprep.subr.bf16.mxu0 %v3479_v15 }
 0x642   :  { %v3742_v18 = vpop.eup %3741  ;;  %v2046_v20 = vsel %vm459_vm0, %v1986_v48, 0.0 }
 0x643   :  { %2026 = vadd.xlane.f32.xlu1 %v2025_v57  ;;  %v1971_v57 = vmul.f32 %v5127_v10, %v3740_v19  ;;  %v3744_v9 = vpop.eup %3743  ;;  %v2055_v35 = vsel %vm459_vm0, %v1989_v29, 0.0  ;;  %v1991_v32 = vmul.f32 %v5127_v10, %v3742_v18 }
 0x644   :  { %v1988_v14 = vmul.f32 %v5127_v10, %v3744_v9  ;;  %v3746_v63 = vpop.eup %3745  ;;  %2532 = vmatpush1.bf16.msra.mxu0 %v3477_v0 }
 0x645   :  { %2023 = vadd.xlane.f32.xlu0 %v2022_v30  ;;  %v2001_v30 = vsel %vm459_vm0, %v1971_v57, 0.0  ;;  %v1990_v39 = vmul.f32 %v5127_v10, %v3746_v63  ;;  %v3481_v10 = vld [vmem:[#allocation12 + $0x30] ss:$12 sps:$4 sm:$0xff]   ;;  %2533 = vmatprep.subr.bf16.mxu0 %v3483_v44 }
 0x646   :  { %v2052_v33 = vsel %vm459_vm0, %v1988_v14, 0.0 }
 0x647   :  { %2032 = vadd.xlane.f32.xlu1 %v2031_v42  ;;  %v2061_v42 = vsel %vm459_vm0, %v1991_v32, 0.0 }
 0x648   :  { %2534 = vmatpush1.bf16.msra.mxu0 %v3481_v10 }
 0x649   :  { %2029 = vadd.xlane.f32.xlu0 %v2028_v52  ;;  %v2058_v52 = vsel %vm459_vm0, %v1990_v39, 0.0 }
 0x64b   :  { %2038 = vadd.xlane.f32.xlu1 %v2037_v22  ;;  %v3476_v22 = vld [vmem:[#allocation12 + $0x8] ss:$12 sps:$4 sm:$0xff]  }
 0x64c   :  { %3397 = vmatpush3.bf16.msra.mxu1 %v3476_v22 }
 0x64d   :  { %2035 = vadd.xlane.f32.xlu0 %v2034_v55  ;;  %3398 = vmatprep.subr.bf16.mxu1 %v6063_v12  ;;  %v3480_v55 = vld [vmem:[#allocation12 + $0x20] ss:$12 sps:$4 sm:$0xff]  }
 0x64f   :  { %2044 = vadd.xlane.f32.xlu1 %v2043_v37 }
 0x650   :  { %3399 = vmatpush3.bf16.msra.mxu1 %v3480_v55 }
 0x651   :  { %2041 = vadd.xlane.f32.xlu0 %v2040_v13  ;;  %3400 = vmatprep.subr.bf16.mxu1 %v6063_v12 }
 0x653   :  { %2050 = vadd.xlane.f32.xlu1 %v2049_v11 }
 0x654   :  { %3401 = vmatpush3.bf16.msra.mxu1 %v3484_v53 }
 0x655   :  { %2047 = vadd.xlane.f32.xlu0 %v2046_v20 }
 0x657   :  { %2056 = vadd.xlane.f32.xlu1 %v2055_v35 }
 0x659   :  { %2002 = vadd.xlane.f32.xlu0 %v2001_v30 }
 0x65b   :  { %2062 = vadd.xlane.f32.xlu1 %v2061_v42 }
 0x65d   :  { %2053 = vadd.xlane.f32.xlu0 %v2052_v33 }
 0x661   :  { %2059 = vadd.xlane.f32.xlu0 %v2058_v52 }
 0x6be   :  { %v1994_v37 = vpop.xlane.xlu0 %1993 }
 0x6c0   :  { %v1997_v1 = vpop.xlane.xlu1 %1996 }
 0x6c1   :  { %v2065_v61 = vadd.f32 %v1997_v1, %v4730_v41 }
 0x6c2   :  { %v2000_v6 = vpop.xlane.xlu0 %1999 }
 0x6c4   :  { %v2009_v13 = vpop.xlane.xlu1 %2008 }
 0x6c5   :  { %v2069_v33 = vadd.f32 %v2009_v13, %v4740_v4  ;;  %v6091_v13 = vld [vmem:[#allocation48_spill] sm:$0xff] }
 0x6c6   :  { %v2006_v48 = vpop.xlane.xlu0 %2005 }
 0x6c7   :  { %v2099_v0 = vmax.f32 %v2065_v61, %v2069_v33  ;;  %v5193_v53 = vadd.f32 %v2006_v48, %v4738_v21 }
 0x6c8   :  { %v2015_v19 = vpop.xlane.xlu1 %2014 }
 0x6c9   :  { %v2071_v45 = vadd.f32 %v2015_v19, %v4744_v25 }
 0x6ca   :  { %v2012_v11 = vpop.xlane.xlu0 %2011 }
 0x6cb   :  { %v5196_v4 = vadd.f32 %v2012_v11, %v6091_v13  ;;  %v6096_v11 = vld [vmem:[#allocation61_spill] sm:$0xff] }
 0x6cc   :  { %v2021_v29 = vpop.xlane.xlu1 %2020 }
 0x6cd   :  { %v2073_v22 = vadd.f32 %v2021_v29, %v4748_v16 }
 0x6ce   :  { %v2018_v18 = vpop.xlane.xlu0 %2017 }
 0x6cf   :  { %v2101_v1 = vmax.f32 %v2099_v0, %v2073_v22 }
 0x6d0   :  { %v2027_v20 = vpop.xlane.xlu1 %2026 }
 0x6d1   :  { %v2075_v55 = vadd.f32 %v2027_v20, %v4752_v24  ;;  %v6094_v24 = vld [vmem:[#allocation50_spill] sm:$0xff] }
 0x6d2   :  { %v2024_v57 = vpop.xlane.xlu0 %2023 }
 0x6d4   :  { %v2033_v9 = vpop.xlane.xlu1 %2032 }
 0x6d5   :  { %v2077_v44 = vadd.f32 %v2033_v9, %v4756_v27  ;;  %v2072_v9 = vadd.f32 %v2018_v18, %v6094_v24  ;;  %v6095_v27 = vld [vmem:[#allocation52_spill] sm:$0xff] }
 0x6d6   :  { %v2030_v35 = vpop.xlane.xlu0 %2029  ;;  %v5204_v25 = vadd.f32 %v2024_v57, %v6095_v27  ;;  %v6100_v27 = vld [vmem:[#allocation65_spill] sm:$0xff] }
 0x6d7   :  { %v2103_v21 = vmax.f32 %v2101_v1, %v2077_v44 }
 0x6d8   :  { %v2039_v32 = vpop.xlane.xlu1 %2038 }
 0x6d9   :  { %v2079_v19 = vadd.f32 %v2039_v32, %v4760_v23 }
 0x6da   :  { %v2036_v12 = vpop.xlane.xlu0 %2035 }
 0x6dc   :  { %v2045_v30 = vpop.xlane.xlu1 %2044 }
 0x6dd   :  { %v2081_v29 = vadd.f32 %v2045_v30, %v4768_v34 }
 0x6de   :  { %v2042_v14 = vpop.xlane.xlu0 %2041 }
 0x6df   :  { %v2105_v57 = vmax.f32 %v2103_v21, %v2081_v29 }
 0x6e0   :  { %v2051_v63 = vpop.xlane.xlu1 %2050 }
 0x6e1   :  { %v2083_v13 = vadd.f32 %v2051_v63, %v6096_v11  ;;  %v6102_v11 = vld [vmem:[#allocation60_spill] sm:$0xff] }
 0x6e2   :  { %v2048_v42 = vpop.xlane.xlu0 %2047 }
 0x6e4   :  { %v2057_v39 = vpop.xlane.xlu1 %2056 }
 0x6e5   :  { %v5208_v0 = vadd.f32 %v2057_v39, %v6097_v49  ;;  %v6101_v49 = vld [vmem:[#allocation58_spill] sm:$0xff] }
 0x6e6   :  { %v2003_v52 = vpop.xlane.xlu0 %2002 }
 0x6e7   :  { %v2067_v15 = vadd.f32 %v2003_v52, %v4736_v2  ;;  %v6092_v52 = vld [vmem:[#allocation44_spill] sm:$0xff]  ;;  %v6093_v2 = vld [vmem:[#allocation43_spill] sm:$0xff] }
 0x6e8   :  { %v2064_v41 = vadd.f32 %v1994_v37, %v6092_v52  ;;  %v2066_v20 = vadd.f32 %v2000_v6, %v6093_v2  ;;  %v2063_v48 = vpop.xlane.xlu1 %2062  ;;  %v6098_v37 = vld [vmem:[#allocation54_spill] sm:$0xff]  ;;  %v6099_v6 = vld [vmem:[#allocation56_spill] sm:$0xff]  ;;  %v5224_v2 = vadd.f32 %v2048_v42, %v6102_v11 }
 0x6e9   :  { %v2100_v10 = vmax.f32 %v2067_v15, %v2071_v45  ;;  %v5213_v34 = vadd.f32 %v2030_v35, %v6098_v37  ;;  %v5216_v18 = vadd.f32 %v2036_v12, %v6099_v6  ;;  %v2087_v1 = vadd.f32 %v2063_v48, %v6100_v27 }
 0x6ea   :  { %v2054_v46 = vpop.xlane.xlu0 %2053  ;;  %v2088_v30 = vmax.f32 %v2064_v41, %v5193_v53  ;;  %v2107_v35 = vmax.f32 %v2105_v57, %v5208_v0 }
 0x6eb   :  { %v2102_v16 = vmax.f32 %v2100_v10, %v2075_v55  ;;  %v2089_v10 = vmax.f32 %v2066_v20, %v5196_v4 }
 0x6ec   :  { %v2090_v63 = vmax.f32 %v2088_v30, %v2072_v9  ;;  %v6104_v30 = vld [vmem:[#allocation62_spill] sm:$0xff] }
 0x6ed   :  { %v2104_v32 = vmax.f32 %v2102_v16, %v2079_v19  ;;  %v2091_v39 = vmax.f32 %v2089_v10, %v5204_v25  ;;  %v5221_v16 = vadd.f32 %v2042_v14, %v6101_v49  ;;  %v5233_v27 = vadd.f32 %v2054_v46, %v6104_v30 }
 0x6ee   :  { %v2060_v24 = vpop.xlane.xlu0 %2059  ;;  %v2092_v12 = vmax.f32 %v2090_v63, %v5213_v34 }
 0x6ef   :  { %v2106_v23 = vmax.f32 %v2104_v32, %v2083_v13  ;;  %v2093_v21 = vmax.f32 %v2091_v39, %v5216_v18  ;;  %v6103_v32 = vld [vmem:[#allocation64_spill] sm:$0xff] }
 0x6f0   :  { %v5230_v6 = vadd.f32 %v2060_v24, %v6103_v32  ;;  %v2094_v14 = vmax.f32 %v2092_v12, %v5221_v16 }
 0x6f1   :  { %v2108_v37 = vmax.f32 %v2106_v23, %v2087_v1  ;;  %v2095_v10 = vmax.f32 %v2093_v21, %v5224_v2 }
 0x6f2   :  { %v2096_v24 = vmax.f32 %v2094_v14, %v5233_v27 }
 0x6f3   :  { %v2109_v48 = vmax.f32 %v2107_v35, %v2108_v37  ;;  %v2097_v63 = vmax.f32 %v2095_v10, %v5230_v6 }
 0x6f5   :  { %v5237_v42 = vsub.f32 %v2065_v61, %v2109_v48  ;;  %v5239_v11 = vsub.f32 %v2067_v15, %v2109_v48  ;;  %v5241_v23 = vsub.f32 %v2069_v33, %v2109_v48  ;;  %v5243_v57 = vsub.f32 %v2071_v45, %v2109_v48 }
 0x6f6   :  { %v5247_v37 = vsub.f32 %v2073_v22, %v2109_v48  ;;  %v5252_v61 = vsub.f32 %v2075_v55, %v2109_v48  ;;  %v5255_v33 = vsub.f32 %v2077_v44, %v2109_v48  ;;  %v5257_v45 = vmax.f32 %v2096_v24, %v2097_v63 }
 0x6f7   :  { %v2136_v46 = vmul.f32 1.442695, %v5237_v42  ;;  %v2140_v39 = vmul.f32 1.442695, %v5239_v11  ;;  %v2144_v35 = vmul.f32 1.442695, %v5241_v23  ;;  %v5259_v12 = vsub.f32 %v2079_v19, %v2109_v48 }
 0x6f8   :  { %v2148_v15 = vmul.f32 1.442695, %v5243_v57  ;;  %v5261_v22 = vsub.f32 %v2081_v29, %v2109_v48  ;;  %v2152_v21 = vmul.f32 1.442695, %v5247_v37  ;;  %v5264_v14 = vsub.f32 %v2083_v13, %v2109_v48 }
 0x6f9   :  { %3747 = vpow2.f32 %v2136_v46  ;;  %v2156_v55 = vmul.f32 1.442695, %v5252_v61  ;;  %v2160_v10 = vmul.f32 1.442695, %v5255_v33  ;;  %v5269_v44 = vsub.f32 %v2064_v41, %v5257_v45 }
 0x6fa   :  { %3749 = vpow2.f32 %v2140_v39  ;;  %v2164_v63 = vmul.f32 1.442695, %v5259_v12  ;;  %v5273_v19 = vsub.f32 %v2066_v20, %v5257_v45  ;;  %v2168_v29 = vmul.f32 1.442695, %v5261_v22 }
 0x6fb   :  { %3751 = vpow2.f32 %v2144_v35  ;;  %v5278_v13 = vsub.f32 %v5193_v53, %v5257_v45  ;;  %v2172_v24 = vmul.f32 1.442695, %v5264_v14  ;;  %v5283_v46 = vsub.f32 %v5196_v4, %v5257_v45 }
 0x6fc   :  { %3753 = vpow2.f32 %v2148_v15  ;;  %v5286_v41 = vsub.f32 %v2072_v9, %v5257_v45  ;;  %v2134_v20 = vmul.f32 1.442695, %v5269_v44  ;;  %v5291_v39 = vsub.f32 %v5204_v25, %v5257_v45 }
 0x6fd   :  { %3755 = vpow2.f32 %v2152_v21  ;;  %v2138_v53 = vmul.f32 1.442695, %v5273_v19  ;;  %v5295_v15 = vsub.f32 %v5208_v0, %v2109_v48  ;;  %v5297_v21 = vsub.f32 %v2087_v1, %v2109_v48 }
 0x6fe   :  { %3757 = vpow2.f32 %v2156_v55  ;;  %v2142_v4 = vmul.f32 1.442695, %v5278_v13  ;;  %v5302_v55 = vsub.f32 %v5213_v34, %v5257_v45  ;;  %v2146_v25 = vmul.f32 1.442695, %v5283_v46 }
 0x6ff   :  { %3759 = vpow2.f32 %v2160_v10  ;;  %v6105_v10 = vunpack.c.h.bf16 %v4869_v5  ;;  %v2150_v0 = vmul.f32 1.442695, %v5286_v41  ;;  %v6106_v1 = vunpack.c.h.bf16 %v4873_v54 }
 0x700   :  { %3761 = vpow2.f32 %v2164_v63  ;;  %v6107_v34 = vunpack.c.h.bf16 %v4879_v43 }
 0x701   :  { %3763 = vpow2.f32 %v2168_v29 }
 0x702   :  { %3765 = vpow2.f32 %v2172_v24  ;;  %v2154_v24 = vmul.f32 1.442695, %v5291_v39 }
 0x703   :  { %v3748_v35 = vpop.eup %3747  ;;  %3767 = vpow2.f32 %v2134_v20  ;;  %v2176_v20 = vmul.f32 1.442695, %v5295_v15 }
 0x704   :  { %v3750_v9 = vpop.eup %3749  ;;  %v2392_v63 = vmul.f32 %v3748_v35, %v6105_v10  ;;  %3769 = vpow2.f32 %v2138_v53  ;;  %v6108_v53 = vunpack.c.h.bf16 %v4885_v28 }
 0x705   :  { %v3752_v32 = vpop.eup %3751  ;;  %v2193_v30 = vadd.f32 %v3750_v9, %v3748_v35  ;;  %v2394_v48 = vmul.f32 %v3750_v9, %v6106_v1  ;;  %3771 = vpow2.f32 %v2142_v4  ;;  %v2180_v35 = vmul.f32 1.442695, %v5297_v21 }
 0x706   :  { %v3754_v29 = vpop.eup %3753  ;;  %v2396_v49 = vmul.f32 %v3752_v32, %v6107_v34  ;;  %v2438_v52 = vsel %vm909_vm1, %v2392_v63, 0.0  ;;  %3773 = vpow2.f32 %v2146_v25 }
 0x707   :  { %v2194_v38 = vadd.f32 %v3752_v32, %v2193_v30  ;;  %v2439_v10 = vsel %vm909_vm1, %v2394_v48, 0.0  ;;  %v3756_v9 = vpop.eup %3755  ;;  %3775 = vpow2.f32 %v2150_v0  ;;  %v2398_v40 = vmul.f32 %v3754_v29, %v6108_v53 }
 0x708   :  { %v2440_v47 = vadd.f32 %v2439_v10, %v2438_v52  ;;  %v2441_v34 = vsel %vm909_vm1, %v2396_v49, 0.0  ;;  %v3758_v58 = vpop.eup %3757  ;;  %v5322_v32 = vsub.f32 %v5216_v18, %v5257_v45  ;;  %3777 = vpow2.f32 %v2154_v24 }
 0x709   :  { %v2195_v1 = vadd.f32 %v3754_v29, %v2194_v38  ;;  %v2158_v30 = vmul.f32 1.442695, %v5302_v55  ;;  %v3760_v63 = vpop.eup %3759  ;;  %v5327_v38 = vsub.f32 %v5221_v16, %v5257_v45  ;;  %3779 = vpow2.f32 %v2176_v20 }
 0x70a   :  { %6109 = vst [vmem:[#allocation74_spill] sm:$0xff] %v5322_v32  ;;  %v2442_v4 = vadd.f32 %v2441_v34, %v2440_v47  ;;  %v3762_v52 = vpop.eup %3761  ;;  %v5331_v49 = vsub.f32 %v5224_v2, %v5257_v45  ;;  %v5335_v18 = vsub.f32 %v5233_v27, %v5257_v45  ;;  %3781 = vpow2.f32 %v2180_v35 }
 0x70b   :  { %v2196_v25 = vadd.f32 %v3756_v9, %v2195_v1  ;;  %v5337_v0 = vpop.eup %3763  ;;  %v6110_v48 = vunpack.c.h.bf16 %v4891_v3  ;;  %v2443_v16 = vsel %vm909_vm1, %v2398_v40, 0.0  ;;  %3783 = vpow2.f32 %v2158_v30 }
 0x70c   :  { %v5342_v24 = vpop.eup %3765  ;;  %v2162_v10 = vmul.f32 1.442695, %v5322_v32  ;;  %v2444_v2 = vadd.f32 %v2443_v16, %v2442_v4  ;;  %v5347_v27 = vsub.f32 %v5230_v6, %v5257_v45  ;;  %v2166_v35 = vmul.f32 1.442695, %v5327_v38 }
 0x70d   :  { %v2197_v47 = vadd.f32 %v3758_v58, %v2196_v25  ;;  %v2400_v29 = vmul.f32 %v3756_v9, %v6110_v48  ;;  %v3768_v20 = vpop.eup %3767  ;;  %v2170_v34 = vmul.f32 1.442695, %v5331_v49  ;;  %v2174_v9 = vmul.f32 1.442695, %v5335_v18 }
 0x70e   :  { %v3770_v53 = vpop.eup %3769  ;;  %v6111_v40 = vunpack.c.l.bf16 %v4869_v5  ;;  %v6112_v30 = vunpack.c.h.bf16 %v4897_v7  ;;  %3785 = vpow2.f32 %v2162_v10 }
 0x70f   :  { %v2198_v1 = vadd.f32 %v3760_v63, %v2197_v47  ;;  %v3772_v4 = vpop.eup %3771  ;;  %v2182_v47 = vadd.f32 %v3770_v53, %v3768_v20  ;;  %v2393_v6 = vmul.f32 %v3770_v53, %v6113_v8  ;;  %v2445_v45 = vsel %vm909_vm1, %v2400_v29, 0.0 }
 0x710   :  { %v2391_v25 = vmul.f32 %v3768_v20, %v6111_v40  ;;  %v2402_v48 = vmul.f32 %v3758_v58, %v6112_v30  ;;  %v3774_v60 = vpop.eup %3773  ;;  %v2395_v31 = vmul.f32 %v3772_v4, %v6114_v56  ;;  %v2446_v5 = vadd.f32 %v2445_v45, %v2444_v2 }
 0x711   :  { %v2199_v16 = vadd.f32 %v3762_v52, %v2198_v1  ;;  %v3776_v40 = vpop.eup %3775  ;;  %v2183_v58 = vadd.f32 %v3772_v4, %v2182_v47  ;;  %v6115_v1 = vunpack.c.l.bf16 %v4885_v28  ;;  %v2416_v54 = vsel %vm909_vm1, %v2393_v6, 0.0 }
 0x712   :  { %v2415_v26 = vsel %vm909_vm1, %v2391_v25, 0.0  ;;  %v3778_v8 = vpop.eup %3777  ;;  %3787 = vpow2.f32 %v2166_v35  ;;  %v6116_v29 = vunpack.c.h.bf16 %v4905_v36  ;;  %v2447_v43 = vsel %vm909_vm1, %v2402_v48, 0.0 }
 0x713   :  { %v2200_v32 = vadd.f32 %v5337_v0, %v2199_v16  ;;  %v2397_v20 = vmul.f32 %v3774_v60, %v6115_v1  ;;  %v2417_v53 = vadd.f32 %v2416_v54, %v2415_v26  ;;  %v2184_v2 = vadd.f32 %v3774_v60, %v2183_v58  ;;  %v3780_v28 = vpop.eup %3779 }
 0x714   :  { %v2404_v10 = vmul.f32 %v3760_v63, %v6116_v29  ;;  %v6117_v25 = vunpack.c.l.bf16 %v4891_v3  ;;  %v2418_v4 = vsel %vm909_vm1, %v2395_v31, 0.0  ;;  %3789 = vpow2.f32 %v2170_v34  ;;  %v3782_v6 = vpop.eup %3781 }
 0x715   :  { %v2201_v56 = vadd.f32 %v5342_v24, %v2200_v32  ;;  %v2178_v16 = vmul.f32 1.442695, %v5347_v27  ;;  %v2419_v47 = vadd.f32 %v2418_v4, %v2417_v53  ;;  %v2448_v35 = vadd.f32 %v2447_v43, %v2446_v5  ;;  %v3784_v60 = vpop.eup %3783 }
 0x716   :  { %v2399_v30 = vmul.f32 %v3776_v40, %v6117_v25  ;;  %v2185_v63 = vadd.f32 %v3776_v40, %v2184_v2  ;;  %v6118_v26 = vunpack.c.l.bf16 %v4897_v7  ;;  %v2420_v32 = vsel %vm909_vm1, %v2397_v20, 0.0 }
 0x717   :  { %v2202_v45 = vadd.f32 %v3780_v28, %v2201_v56  ;;  %3791 = vpow2.f32 %v2174_v9  ;;  %v6119_v3 = vunpack.c.h.bf16 %v4921_v62  ;;  %v2421_v31 = vadd.f32 %v2420_v32, %v2419_v47 }
 0x718   :  { %v2401_v48 = vmul.f32 %v3778_v8, %v6118_v26  ;;  %v2186_v34 = vadd.f32 %v3778_v8, %v2185_v63  ;;  %v2422_v54 = vsel %vm909_vm1, %v2399_v30, 0.0  ;;  %v2449_v5 = vsel %vm909_vm1, %v2404_v10, 0.0  ;;  %v3786_v9 = vpop.eup %3785 }
 0x719   :  { %v2406_v58 = vmul.f32 %v3762_v52, %v6119_v3  ;;  %v2203_v1 = vadd.f32 %v3782_v6, %v2202_v45  ;;  %3793 = vpow2.f32 %v2178_v16  ;;  %v2423_v29 = vadd.f32 %v2422_v54, %v2421_v31 }
 0x71a   :  { %v2450_v40 = vadd.f32 %v2449_v5, %v2448_v35  ;;  %v2187_v53 = vadd.f32 %v3784_v60, %v2186_v34  ;;  %v6120_v7 = vunpack.c.l.bf16 %v4905_v36  ;;  %v2424_v20 = vsel %vm909_vm1, %v2401_v48, 0.0 }
 0x71b   :  { %3795 = vlog2.f32 %v2203_v1  ;;  %v2425_v56 = vadd.f32 %v2424_v20, %v2423_v29  ;;  %v6121_v2 = vunpack.c.h.bf16 %v4970_v51  ;;  %v2451_v25 = vsel %vm909_vm1, %v2406_v58, 0.0 }
 0x71c   :  { %v2403_v43 = vmul.f32 %v3784_v60, %v6120_v7  ;;  %v2188_v52 = vadd.f32 %v3786_v9, %v2187_v53  ;;  %v3788_v10 = vpop.eup %3787  ;;  %v2452_v30 = vadd.f32 %v2451_v25, %v2450_v40  ;;  %v6122_v16 = vunpack.c.l.bf16 %v4921_v62 }
 0x71d   :  { %v2408_v8 = vmul.f32 %v5337_v0, %v6121_v2  ;;  %v6123_v26 = vunpack.c.h.bf16 %v4983_v50  ;;  %3797 = vrcp.f32 %v2203_v1  ;;  %v6124_v58 = vunpack.c.l.bf16 %v4970_v51 }
 0x71e   :  { %v2189_v4 = vadd.f32 %v3788_v10, %v2188_v52  ;;  %v2405_v47 = vmul.f32 %v3786_v9, %v6122_v16  ;;  %v2426_v36 = vsel %vm909_vm1, %v2403_v43, 0.0  ;;  %v3790_v35 = vpop.eup %3789  ;;  %v6125_v5 = vlaneseq }
 0x71f   :  { %v2427_v45 = vadd.f32 %v2426_v36, %v2425_v56  ;;  %v2410_v48 = vmul.f32 %v5342_v24, %v6123_v26  ;;  %v2453_v32 = vsel %vm909_vm1, %v2408_v8, 0.0  ;;  %v2407_v31 = vmul.f32 %v3788_v10, %v6124_v58 }
 0x720   :  { %v2190_v63 = vadd.f32 %v3790_v35, %v2189_v4  ;;  %v2454_v60 = vadd.f32 %v2453_v32, %v2452_v30  ;;  %v2428_v62 = vsel %vm909_vm1, %v2405_v47, 0.0  ;;  %v2257_v29 = vand.u32 127, %v6125_v5 }
 0x721   :  { %v3792_v0 = vpop.eup %3791  ;;  %v2429_v54 = vadd.f32 %v2428_v62, %v2427_v45  ;;  %v6126_v53 = vunpack.c.h.bf16 %v4996_v59  ;;  %v2455_v24 = vsel %vm909_vm1, %v2410_v48, 0.0  ;;  %v6127_v1 = vunpack.c.l.bf16 %v4983_v50  ;;  %v6131_v45 = vld [vmem:[#allocation17_spill] sm:$0xff] }
 0x722   :  { %v2191_v3 = vadd.f32 %v3792_v0, %v2190_v63  ;;  %v2456_v20 = vadd.f32 %v2455_v24, %v2454_v60  ;;  %v2430_v51 = vsel %vm909_vm1, %v2407_v31, 0.0  ;;  %v2262_v52 = vadd.s32 4294967288, %v2257_v29 }
 0x723   :  { %v3794_v34 = vpop.eup %3793  ;;  %v2412_v7 = vmul.f32 %v3780_v28, %v6126_v53  ;;  %v2409_v9 = vmul.f32 %v3790_v35, %v6127_v1  ;;  %v2431_v56 = vadd.f32 %v2430_v51, %v2429_v54  ;;  %v6128_v8 = vunpack.c.h.bf16 %v5007_v17 }
 0x724   :  { %v2192_v40 = vadd.f32 %v3794_v34, %v2191_v3  ;;  %v6129_v28 = vunpack.c.l.bf16 %v4996_v59  ;;  %v6130_v50 = vunpack.c.l.bf16 %v5007_v17  ;;  %v5416_v63 = vsub.s32 %v2257_v29, %v6131_v45 }
 0x725   :  { %v3796_v43 = vpop.eup %3795  ;;  %v2414_v25 = vmul.f32 %v3782_v6, %v6128_v8  ;;  %v2457_v10 = vsel %vm909_vm1, %v2412_v7, 0.0  ;;  %v2432_v16 = vsel %vm909_vm1, %v2409_v9, 0.0  ;;  %v5419_v26 = vsub.s32 %v2262_v52, %v6131_v45  ;;  %v6132_v8 = vld [vmem:[#allocation74_spill] sm:$0xff] }
 0x726   :  { %3799 = vlog2.f32 %v2192_v40  ;;  %v5405_v2 = vmul.f32 0.6931472, %v3796_v43  ;;  %v2411_v30 = vmul.f32 %v3792_v0, %v6129_v28  ;;  %v2458_v4 = vadd.f32 %v2457_v10, %v2456_v20 }
 0x727   :  { %v2413_v47 = vmul.f32 %v3794_v34, %v6130_v50  ;;  %v2433_v36 = vadd.f32 %v2432_v16, %v2431_v56  ;;  %v3798_v35 = vpop.eup %3797  ;;  %v2459_v59 = vsel %vm909_vm1, %v2414_v25, 0.0  ;;  %3801 = vrcp.f32 %v2192_v40 }
 0x728   :  { %v2231_v6 = vsub.f32 %v5297_v21, %v5405_v2  ;;  %v2209_v48 = vsub.f32 %v5237_v42, %v5405_v2  ;;  %v2434_v17 = vsel %vm909_vm1, %v2411_v30, 0.0  ;;  %v2460_v32 = vadd.f32 %v2459_v59, %v2458_v4 }
 0x729   :  { %v2211_v0 = vsub.f32 %v5239_v11, %v5405_v2  ;;  %v2213_v60 = vsub.f32 %v5241_v23, %v5405_v2  ;;  %v2215_v3 = vsub.f32 %v5243_v57, %v5405_v2  ;;  %v2217_v21 = vsub.f32 %v5247_v37, %v5405_v2 }
 0x72a   :  { %v2435_v58 = vadd.f32 %v2434_v17, %v2433_v36  ;;  %v2436_v31 = vsel %vm909_vm1, %v2413_v47, 0.0  ;;  %v5436_v42 = vmul.f32 %v3798_v35, %v2460_v32  ;;  %v5439_v34 = vrot.slane %v2231_v6, %v5419_v26 }
 0x72b   :  { %v2219_v11 = vsub.f32 %v5252_v61, %v5405_v2  ;;  %v2221_v23 = vsub.f32 %v5255_v33, %v5405_v2  ;;  %v2223_v57 = vsub.f32 %v5259_v12, %v5405_v2  ;;  %v2225_v54 = vsub.f32 %v5261_v22, %v5405_v2 }
 0x72c   :  { %v2227_v5 = vsub.f32 %v5264_v14, %v5405_v2  ;;  %v2229_v29 = vsub.f32 %v5295_v15, %v5405_v2  ;;  %v2266_v40 = vrot.slane %v2209_v48, %v5419_v26  ;;  %v2276_v61 = vrot.slane %v2211_v0, %v5419_v26 }
 0x72d   :  { %v2285_v33 = vrot.slane %v2213_v60, %v5419_v26  ;;  %v2294_v53 = vrot.slane %v2215_v3, %v5419_v26  ;;  %v2303_v14 = vrot.slane %v2217_v21, %v5419_v26  ;;  %v2312_v24 = vrot.slane %v2219_v11, %v5419_v26 }
 0x72e   :  { %v2321_v43 = vrot.slane %v2221_v23, %v5419_v26  ;;  %v2330_v20 = vrot.slane %v2223_v57, %v5419_v26  ;;  %v2357_v10 = vrot.slane %v2229_v29, %v5419_v26 }
 0x730   :  { %v3800_v62 = vpop.eup %3799 }
 0x731   :  { %v2205_v37 = vmul.f32 0.6931472, %v3800_v62 }
 0x733   :  { %v2208_v12 = vsub.f32 %v5269_v44, %v2205_v37  ;;  %v2210_v22 = vsub.f32 %v5273_v19, %v2205_v37  ;;  %v2212_v7 = vsub.f32 %v5278_v13, %v2205_v37  ;;  %v2214_v15 = vsub.f32 %v5283_v46, %v2205_v37 }
 0x734   :  { %v2216_v1 = vsub.f32 %v5286_v41, %v2205_v37  ;;  %v2224_v44 = vsub.f32 %v5327_v38, %v2205_v37  ;;  %v2226_v19 = vsub.f32 %v5331_v49, %v2205_v37  ;;  %v2228_v13 = vsub.f32 %v5335_v18, %v2205_v37  ;;  %v3802_v49 = vpop.eup %3801 }
 0x735   :  { %v2230_v9 = vsub.f32 %v5347_v27, %v2205_v37  ;;  %v2261_v46 = vrot.slane %v2208_v12, %v5416_v63  ;;  %v2272_v51 = vrot.slane %v2210_v22, %v5416_v63  ;;  %v2281_v56 = vrot.slane %v2212_v7, %v5416_v63  ;;  %v3488_v12 = vld [vmem:[%s5893_s7 + $0x20] ss:$16 sps:$4 sm:$0xff]  }
 0x736   :  { %v2218_v52 = vsub.f32 %v5291_v39, %v2205_v37  ;;  %v2220_v2 = vsub.f32 %v5302_v55, %v2205_v37  ;;  %v2339_v41 = vrot.slane %v2225_v54, %v5419_v26  ;;  %v2348_v38 = vrot.slane %v2227_v5, %v5419_v26 }
 0x737   :  { %v2222_v18 = vsub.f32 %v6132_v8, %v2205_v37  ;;  %v2268_v25 = vsel %vm2267_vm3, %v2266_v40, %v2261_v46  ;;  %v2277_v27 = vsel %vm2267_vm3, %v2276_v61, %v2272_v51  ;;  %v2286_v28 = vsel %vm2267_vm3, %v2285_v33, %v2281_v56  ;;  %v3485_v61 = vld [vmem:[%s5893_s7] ss:$16 sps:$4 sm:$0xff]   ;;  %v3487_v33 = vld [vmem:[%s5893_s7 + $0x4] ss:$16 sps:$4 sm:$0xff]  }
 0x738   :  { %v2290_v30 = vrot.slane %v2214_v15, %v5416_v63  ;;  %v2299_v39 = vrot.slane %v2216_v1, %v5416_v63  ;;  %v2437_v55 = vadd.f32 %v2436_v31, %v2435_v58  ;;  %v2335_v4 = vrot.slane %v2224_v44, %v5416_v63  ;;  %2691 = vmatprep.subr.bf16.mxu0 %v3487_v33  ;;  %v6136_v46 = vld [vmem:[#allocation72_spill] sm:$0xff]  ;;  %v3943_v8 = vld [vmem:[%s5895_s9 + $0x1] ss:$0 sm:$0xff] }
 0x739   :  { %v2344_v16 = vrot.slane %v2226_v19, %v5416_v63  ;;  %v2353_v50 = vrot.slane %v2228_v13, %v5416_v63  ;;  %v2362_v47 = vrot.slane %v2230_v9, %v5416_v63  ;;  %v2308_v36 = vrot.slane %v2218_v52, %v5416_v63  ;;  %v3942_v13 = vld [vmem:[%s5895_s9] ss:$0 sm:$0xff] }
 0x73a   :  { %v2317_v35 = vrot.slane %v2220_v2, %v5416_v63  ;;  %v2369_v45 = vsel %vm2368_vm4, %v2277_v27, %v2268_v25  ;;  %v2463_v6 = vmul.f32 %v3802_v49, %v2437_v55  ;;  %v2326_v59 = vrot.slane %v2222_v18, %v5416_v63  ;;  %v6137_v2 = vld [vmem:[#allocation71_spill] sm:$0xff] }
 0x73b   :  { %v2340_v48 = vsel %vm2267_vm3, %v2339_v41, %v2335_v4  ;;  %v2349_v17 = vsel %vm2267_vm3, %v2348_v38, %v2344_v16  ;;  %v2358_v32 = vsel %vm2267_vm3, %v2357_v10, %v2353_v50  ;;  %v2295_v0 = vsel %vm2267_vm3, %v2294_v53, %v2290_v30  ;;  %v3490_v53 = vld [vmem:[%s5893_s7 + $0x24] ss:$16 sps:$4 sm:$0xff]  }
 0x73c   :  { %v2371_v60 = vsel %vm2370_vm5, %v2286_v28, %v2369_v45  ;;  %v2382_v3 = vsel %vm2368_vm4, %v2349_v17, %v2340_v48  ;;  %v2465_v21 = vpack.c.bf16 %v5436_v42, %v2463_v6  ;;  %v2304_v58 = vsel %vm2267_vm3, %v2303_v14, %v2299_v39  ;;  %v6134_v14 = vld [vmem:[#allocation69_spill] sm:$0xff] }
 0x73d   :  { %v2367_v31 = vsel %vm2267_vm3, %v5439_v34, %v2362_v47  ;;  %v2373_v62 = vsel %vm2372_vm6, %v2295_v0, %v2371_v60  ;;  %v2383_v11 = vsel %vm2370_vm5, %v2358_v32, %v2382_v3  ;;  %v2313_v23 = vsel %vm2267_vm3, %v2312_v24, %v2308_v36  ;;  %v3944_v36 = vld [vmem:[%s5895_s9 + $0x3] ss:$0 sm:$0xff]  ;;  %v6139_v48 = vld [vmem:[#allocation73_spill] sm:$0xff]  ;;  %v3945_v32 = vld [vmem:[%s5895_s9 + $0x2] ss:$0 sm:$0xff] }
 0x73e   :  { %v2375_v57 = vsel %vm2374_vm7, %v2304_v58, %v2373_v62  ;;  %v2384_v37 = vsel %vm2372_vm6, %v2367_v31, %v2383_v11  ;;  %3290 = vmatmul.mubr.msk.bf16.vlgmr.msra.gmra.mrb[32].mxu0 %vm909_vm1, %v2465_v21  ;;  %3403 = vmatmul.mubr.msk.bf16.vlgmr.msra.gmra.mrb[32].mxu1 %vm909_vm1, %v2465_v21  ;;  %v2322_v42 = vsel %vm2267_vm3, %v2321_v43, %v2317_v35  ;;  %v6133_v54 = vmov 0   ;;  %v6138_v35 = vld [vmem:[#allocation70_spill] sm:$0xff] }
 0x73f   :  { %v2377_v34 = vsel %vm2376_vm8, %v2313_v23, %v2375_v57  ;;  %2390 = vst.msk [vmem:[%s5896_s10 + $0x8] sm:$0xf] %vm2389_vm9, %v2384_v37  ;;  %2723 = vmatprep.mubr.bf16.mxu0 %v6133_v54  ;;  %v2331_v5 = vsel %vm2267_vm3, %v2330_v20, %v2326_v59  ;;  %2692 = vmatpush1.bf16.msra.mxu0 %v3485_v61  ;;  %v6135_v20 = vld [vmem:[#allocation68_spill] sm:$0xff]  ;;  %v6140_v54 = vld [vmem:[#allocation66_spill] sm:$0xff]  ;;  %v6141_v61 = vld [vmem:[#allocation67_spill] sm:$0xff] }
 0x740   :  { %v2379_v29 = vsel %vm2378_vm10, %v2322_v42, %v2377_v34  ;;  %2693 = vmatprep.subr.bf16.mxu0 %v3490_v53  ;;  %v2647_v45 = vadd.f32 %v3944_v36, %v6138_v35  ;;  %v2648_v17 = vadd.f32 %v3944_v36, %v6139_v48  ;;  %v6156_v36 = vld [vmem:[#allocation33_spill] sm:$0xff] }
 0x741   :  { %v2381_v40 = vsel %vm2380_vm11, %v2331_v5, %v2379_v29 }
 0x742   :  { %2388 = vst.msk [vmem:[%s5896_s10] sm:$0xff] %vm2387_vm12, %v2381_v40 }
 0x743   :  { %2694 = vmatpush1.bf16.msra.mxu0 %v3488_v12 }
 0x811   :  { %v2563_v22 = vpop.f32.mrb[32].mxu0  ;;  %v2606_v7 = vpop.f32.mrb[32].mxu1 }
 0x812   :  { %v2613_v15 = vadd.f32 %v2563_v22, %v6134_v14  ;;  %v2565_v24 = vpop.f32.mrb[33].mxu0  ;;  %v3404_v43 = vpop.f32.mrb[33].mxu1  ;;  %v2645_v0 = vadd.f32 %v3945_v32, %v2606_v7 }
 0x813   :  { %v2629_v1 = vadd.f32 %v2565_v24, %v6135_v20  ;;  %v2567_v44 = vpop.f32.mrb[34].mxu0  ;;  %v2609_v19 = vpop.f32.mrb[34].mxu1  ;;  %v6143_v43 = vld [vmem:[#allocation18_spill] sm:$0xff] }
 0x814   :  { %v2615_v9 = vadd.f32 %v3942_v13, %v2613_v15  ;;  %v2614_v51 = vadd.f32 %v2567_v44, %v6136_v46  ;;  %v2569_v56 = vpop.f32.mrb[35].mxu0  ;;  %v3405_v52 = vpop.f32.mrb[35].mxu1  ;;  %v2646_v58 = vadd.f32 %v3945_v32, %v2609_v19  ;;  %v6142_v15 = vld [vmem:[#allocation19_spill] sm:$0xff]  ;;  %v6145_v19 = vld [vmem:[#allocation22_spill] sm:$0xff] }
 0x815   :  { %v2630_v41 = vadd.f32 %v2569_v56, %v6137_v2  ;;  %v2631_v18 = vadd.f32 %v3943_v8, %v2629_v1  ;;  %v6144_v1 = vld [vmem:[#allocation23_spill] sm:$0xff]  ;;  %v6147_v56 = vld [vmem:[#allocation26_spill] sm:$0xff] }
 0x816   :  { %v3292_v38 = vmul.f32 -1.442695, %v2615_v9  ;;  %v2616_v49 = vadd.f32 %v3942_v13, %v2614_v51  ;;  %v6146_v46 = vld [vmem:[#allocation27_spill] sm:$0xff] }
 0x817   :  { %v2632_v27 = vadd.f32 %v3943_v8, %v2630_v41  ;;  %v3294_v10 = vmul.f32 -1.442695, %v2631_v18  ;;  %v6148_v2 = vld [vmem:[#allocation31_spill] sm:$0xff]  ;;  %v6150_v18 = vld [vmem:[#allocation21_spill] sm:$0xff] }
 0x818   :  { %3803 = vpow2.f32 %v3292_v38  ;;  %v3293_v25 = vmul.f32 -1.442695, %v2616_v49  ;;  %v6149_v38 = vld [vmem:[#allocation30_spill] sm:$0xff] }
 0x819   :  { %v3295_v28 = vmul.f32 -1.442695, %v2632_v27  ;;  %v6151_v27 = vld [vmem:[#allocation20_spill] sm:$0xff] }
 0x81a   :  { %3805 = vpow2.f32 %v3293_v25 }
 0x81b   :  { %3807 = vpow2.f32 %v3294_v10 }
 0x81c   :  { %3809 = vpow2.f32 %v3295_v28  ;;  %v6152_v28 = vld [vmem:[#allocation25_spill] sm:$0xff] }
 0x822   :  { %v3804_v30 = vpop.eup %3803 }
 0x823   :  { %v2623_v39 = vadd.f32 1.0, %v3804_v30 }
 0x824   :  { %v3806_v55 = vpop.eup %3805 }
 0x825   :  { %3811 = vrcp.f32 %v2623_v39  ;;  %v2624_v4 = vadd.f32 1.0, %v3806_v55  ;;  %v3808_v16 = vpop.eup %3807  ;;  %v6153_v39 = vld [vmem:[#allocation24_spill] sm:$0xff] }
 0x826   :  { %v3810_v50 = vpop.eup %3809  ;;  %v2639_v47 = vadd.f32 1.0, %v3808_v16 }
 0x827   :  { %3813 = vrcp.f32 %v2624_v4  ;;  %v2640_v6 = vadd.f32 1.0, %v3810_v50  ;;  %v6154_v4 = vld [vmem:[#allocation29_spill] sm:$0xff]  ;;  %v6155_v50 = vld [vmem:[#allocation28_spill] sm:$0xff] }
 0x828   :  { %3815 = vrcp.f32 %v2639_v47 }
 0x829   :  { %3817 = vrcp.f32 %v2640_v6 }
 0x82f   :  { %v3812_v59 = vpop.eup %3811 }
 0x830   :  { %v2649_v60 = vmul.f32 %v3812_v59, %v2647_v45  ;;  %v6157_v45 = vld [vmem:[#allocation32_spill] sm:$0xff]  ;;  %v6158_v59 = vld [vmem:[#allocation35_spill] sm:$0xff] }
 0x831   :  { %v3814_v3 = vpop.eup %3813 }
 0x832   :  { %v2651_v21 = vadd.f32 %v2649_v60, %v2645_v0  ;;  %v2650_v31 = vmul.f32 %v3814_v3, %v2648_v17  ;;  %v3816_v11 = vpop.eup %3815  ;;  %v6159_v17 = vld [vmem:[#allocation37_spill] sm:$0xff]  ;;  %v6160_v0 = vld [vmem:[#allocation34_spill] sm:$0xff]  ;;  %v6161_v3 = vld [vmem:[#allocation36_spill] sm:$0xff] }
 0x833   :  { %v3818_v23 = vpop.eup %3817  ;;  %v2655_v57 = vsub.f32 1.0, %v3816_v11  ;;  %v2659_v5 = vmul.f32 %v3816_v11, %v6140_v54 }
 0x834   :  { %3819 = vtanh.f32 %v2651_v21  ;;  %v2652_v62 = vadd.f32 %v2650_v31, %v2646_v58  ;;  %v2656_v42 = vsub.f32 1.0, %v3818_v23  ;;  %v2660_v33 = vmul.f32 %v3818_v23, %v6141_v61  ;;  %v6162_v58 = vld [vmem:[#allocation39_spill] sm:$0xff]  ;;  %v6164_v23 = vld [vmem:[#allocation38_spill] sm:$0xff] }
 0x836   :  { %3821 = vtanh.f32 %v2652_v62  ;;  %v6163_v62 = vld [vmem:[#allocation41_spill] sm:$0xff] }
 0x83e   :  { %v3820_v37 = vpop.eup %3819 }
 0x83f   :  { %v2657_v34 = vmul.f32 %v3820_v37, %v2655_v57  ;;  %v6165_v37 = vld [vmem:[#allocation40_spill] sm:$0xff] }
 0x840   :  { %v3822_v29 = vpop.eup %3821 }
 0x841   :  { %v2658_v40 = vmul.f32 %v3822_v29, %v2656_v42  ;;  %v2661_v53 = vadd.f32 %v2659_v5, %v2657_v34  ;;  %v5592_v5 = vld [vmem:[#allocation9 + $0x1] ss:$0 sm:$0xff] }
 0x843   :  { %v2662_v12 = vadd.f32 %v2660_v33, %v2658_v40 }
 0x845   :  { %v2663_v22 = vpack.c.bf16 %v2662_v12, %v2661_v53 }
 0x847   :  { %3300 = vmatmul.mubr.msk.bf16.vlgmr.msra.gmra.mrb[36].mxu0 %vm459_vm0, %v2663_v22 }
 0x91a   :  { %v2725_v7 = vpop.f32.mrb[36].mxu0 }
 0x91b   :  { %v2727_v14 = vpop.f32.mrb[37].mxu0  ;;  %v2732_v24 = vadd.f32 %v2725_v7, %v6142_v15  ;;  %v2734_v20 = vadd.f32 %v6143_v43, %v2725_v7  ;;  %v2736_v44 = vadd.f32 %v2725_v7, %v6144_v1  ;;  %v2738_v13 = vadd.f32 %v6145_v19, %v2725_v7 }
 0x91c   :  { %v2728_v9 = vpop.f32.mrb[38].mxu0  ;;  %v2740_v51 = vadd.f32 %v2725_v7, %v6146_v46  ;;  %v2742_v52 = vadd.f32 %v6147_v56, %v2725_v7  ;;  %v2744_v41 = vadd.f32 %v2725_v7, %v6148_v2  ;;  %v2746_v49 = vadd.f32 %v6149_v38, %v2725_v7 }
 0x91d   :  { %v2730_v8 = vpop.f32.mrb[39].mxu0  ;;  %3823 = vtanh.f32 %v2732_v24  ;;  %v2733_v25 = vadd.f32 %v2728_v9, %v6150_v18  ;;  %v2735_v10 = vadd.f32 %v6151_v27, %v2728_v9  ;;  %v2737_v30 = vadd.f32 %v2728_v9, %v6152_v28 }
 0x91e   :  { %3825 = vtanh.f32 %v2734_v20  ;;  %v2739_v55 = vadd.f32 %v6153_v39, %v2728_v9  ;;  %v2741_v16 = vadd.f32 %v2728_v9, %v6154_v4  ;;  %v2743_v47 = vadd.f32 %v6155_v50, %v2728_v9 }
 0x91f   :  { %3827 = vtanh.f32 %v2733_v25  ;;  %v2745_v35 = vadd.f32 %v2728_v9, %v6156_v36  ;;  %v2747_v6 = vadd.f32 %v6157_v45, %v2728_v9  ;;  %v2748_v48 = vadd.f32 %v2725_v7, %v6158_v59 }
 0x920   :  { %3829 = vtanh.f32 %v2735_v10  ;;  %v2749_v32 = vadd.f32 %v2728_v9, %v6159_v17  ;;  %v5575_v60 = vadd.f32 %v6160_v0, %v2725_v7  ;;  %v5578_v21 = vadd.f32 %v6161_v3, %v2728_v9 }
 0x921   :  { %3831 = vtanh.f32 %v2736_v44  ;;  %v5581_v31 = vadd.f32 %v2725_v7, %v6162_v58  ;;  %v5584_v11 = vadd.f32 %v2728_v9, %v6163_v62  ;;  %v5587_v57 = vadd.f32 %v6164_v23, %v2725_v7 }
 0x922   :  { %v5590_v42 = vadd.f32 %v6165_v37, %v2728_v9  ;;  %3833 = vtanh.f32 %v2737_v30 }
 0x923   :  { %3835 = vtanh.f32 %v2738_v13 }
 0x924   :  { %3837 = vtanh.f32 %v2739_v55 }
 0x925   :  { %3839 = vtanh.f32 %v2740_v51 }
 0x926   :  { %3841 = vtanh.f32 %v2741_v16 }
 0x927   :  { %v3824_v34 = vpop.eup %3823  ;;  %3843 = vtanh.f32 %v2742_v52 }
 0x928   :  { %v3826_v54 = vpop.eup %3825  ;;  %v2780_v29 = vmul.f32 %v5592_v5, %v3824_v34  ;;  %3845 = vtanh.f32 %v2743_v47 }
 0x929   :  { %v3828_v40 = vpop.eup %3827  ;;  %v2782_v12 = vmul.f32 %v5592_v5, %v3826_v54  ;;  %3847 = vtanh.f32 %v2744_v41 }
 0x92a   :  { %v3830_v61 = vpop.eup %3829  ;;  %v2804_v33 = vsel %vm459_vm0, %v2780_v29, 0.0  ;;  %v2781_v53 = vmul.f32 %v5592_v5, %v3828_v40  ;;  %3849 = vtanh.f32 %v2745_v35 }
 0x92b   :  { %v3832_v22 = vpop.eup %3831  ;;  %2805 = vadd.xlane.f32.xlu0 %v2804_v33  ;;  %v2783_v14 = vmul.f32 %v5592_v5, %v3830_v61  ;;  %v2810_v24 = vsel %vm459_vm0, %v2782_v12, 0.0  ;;  %3851 = vtanh.f32 %v2746_v49 }
 0x92c   :  { %v2807_v7 = vsel %vm459_vm0, %v2781_v53, 0.0  ;;  %v3834_v15 = vpop.eup %3833  ;;  %v2784_v43 = vmul.f32 %v5592_v5, %v3832_v22  ;;  %3853 = vtanh.f32 %v2747_v6 }
 0x92d   :  { %2808 = vadd.xlane.f32.xlu1 %v2807_v7  ;;  %v3836_v20 = vpop.eup %3835  ;;  %v2813_v1 = vsel %vm459_vm0, %v2783_v14, 0.0  ;;  %v2785_v44 = vmul.f32 %v5592_v5, %v3834_v15  ;;  %3855 = vtanh.f32 %v2748_v48 }
 0x92e   :  { %v3838_v19 = vpop.eup %3837  ;;  %v2816_v13 = vsel %vm459_vm0, %v2784_v43, 0.0  ;;  %v2786_v9 = vmul.f32 %v5592_v5, %v3836_v20  ;;  %3857 = vtanh.f32 %v2749_v32 }
 0x92f   :  { %2811 = vadd.xlane.f32.xlu0 %v2810_v24  ;;  %v3840_v46 = vpop.eup %3839  ;;  %v2819_v51 = vsel %vm459_vm0, %v2785_v44, 0.0  ;;  %v2787_v56 = vmul.f32 %v5592_v5, %v3838_v19  ;;  %3859 = vtanh.f32 %v5575_v60 }
 0x930   :  { %v3842_v52 = vpop.eup %3841  ;;  %v2822_v2 = vsel %vm459_vm0, %v2786_v9, 0.0  ;;  %v2788_v38 = vmul.f32 %v5592_v5, %v3840_v46  ;;  %3861 = vtanh.f32 %v5578_v21 }
 0x931   :  { %2814 = vadd.xlane.f32.xlu1 %v2813_v1  ;;  %v3844_v8 = vpop.eup %3843  ;;  %v2825_v41 = vsel %vm459_vm0, %v2787_v56, 0.0  ;;  %v2789_v18 = vmul.f32 %v5592_v5, %v3842_v52  ;;  %3863 = vtanh.f32 %v5581_v31 }
 0x932   :  { %v3846_v25 = vpop.eup %3845  ;;  %v2828_v27 = vsel %vm459_vm0, %v2788_v38, 0.0  ;;  %v2790_v10 = vmul.f32 %v5592_v5, %v3844_v8  ;;  %3865 = vtanh.f32 %v5584_v11 }
 0x933   :  { %2817 = vadd.xlane.f32.xlu0 %v2816_v13  ;;  %v3848_v28 = vpop.eup %3847  ;;  %v2831_v49 = vsel %vm459_vm0, %v2789_v18, 0.0  ;;  %v2791_v30 = vmul.f32 %v5592_v5, %v3846_v25  ;;  %3867 = vtanh.f32 %v5587_v57  ;;  %v6166_v18 = vld [vmem:[#allocation46_spill] sm:$0xff] }
 0x934   :  { %v3850_v39 = vpop.eup %3849  ;;  %v2834_v55 = vsel %vm459_vm0, %v2790_v10, 0.0  ;;  %v2792_v4 = vmul.f32 %v5592_v5, %v3848_v28  ;;  %3869 = vtanh.f32 %v5590_v42 }
 0x935   :  { %2820 = vadd.xlane.f32.xlu1 %v2819_v51  ;;  %v3852_v16 = vpop.eup %3851  ;;  %v2837_v50 = vsel %vm459_vm0, %v2791_v30, 0.0  ;;  %v2793_v47 = vmul.f32 %v5592_v5, %v3850_v39  ;;  %v6169_v39 = vld [vmem:[#allocation43_spill] sm:$0xff] }
 0x936   :  { %v3854_v36 = vpop.eup %3853  ;;  %v2840_v35 = vsel %vm459_vm0, %v2792_v4, 0.0  ;;  %v2794_v45 = vmul.f32 %v5592_v5, %v3852_v16  ;;  %v6170_v4 = vld [vmem:[#allocation50_spill] sm:$0xff] }
 0x937   :  { %2823 = vadd.xlane.f32.xlu0 %v2822_v2  ;;  %v3856_v6 = vpop.eup %3855  ;;  %v2843_v59 = vsel %vm459_vm0, %v2793_v47, 0.0  ;;  %v2795_v48 = vmul.f32 %v5592_v5, %v3854_v36 }
 0x938   :  { %v3858_v17 = vpop.eup %3857  ;;  %v2846_v32 = vsel %vm459_vm0, %v2794_v45, 0.0  ;;  %v2796_v0 = vmul.f32 %v5592_v5, %v3856_v6  ;;  %v6172_v6 = vld [vmem:[#allocation54_spill] sm:$0xff] }
 0x939   :  { %2826 = vadd.xlane.f32.xlu1 %v2825_v41  ;;  %v3860_v60 = vpop.eup %3859  ;;  %v2849_v3 = vsel %vm459_vm0, %v2795_v48, 0.0  ;;  %v2797_v21 = vmul.f32 %v5592_v5, %v3858_v17  ;;  %v6173_v48 = vld [vmem:[#allocation56_spill] sm:$0xff] }
 0x93a   :  { %v3862_v58 = vpop.eup %3861  ;;  %v2852_v31 = vsel %vm459_vm0, %v2796_v0, 0.0  ;;  %v2798_v62 = vmul.f32 %v5592_v5, %v3860_v60 }
 0x93b   :  { %2829 = vadd.xlane.f32.xlu0 %v2828_v27  ;;  %v3864_v11 = vpop.eup %3863  ;;  %v2855_v23 = vsel %vm459_vm0, %v2797_v21, 0.0  ;;  %v2799_v57 = vmul.f32 %v5592_v5, %v3862_v58  ;;  %v6167_v27 = vld [vmem:[#allocation48_spill] sm:$0xff]  ;;  %v6175_v58 = vld [vmem:[#allocation58_spill] sm:$0xff] }
 0x93c   :  { %v3866_v37 = vpop.eup %3865  ;;  %v2858_v42 = vsel %vm459_vm0, %v2798_v62, 0.0  ;;  %v2800_v34 = vmul.f32 %v5592_v5, %v3864_v11  ;;  %v6176_v62 = vld [vmem:[#allocation60_spill] sm:$0xff] }
 0x93d   :  { %2832 = vadd.xlane.f32.xlu1 %v2831_v49  ;;  %v3868_v54 = vpop.eup %3867  ;;  %v2861_v29 = vsel %vm459_vm0, %v2799_v57, 0.0  ;;  %v2801_v40 = vmul.f32 %v5592_v5, %v3866_v37  ;;  %v6168_v49 = vld [vmem:[#allocation44_spill] sm:$0xff]  ;;  %v6178_v37 = vld [vmem:[#allocation47_spill] sm:$0xff] }
 0x93e   :  { %v3870_v61 = vpop.eup %3869  ;;  %v2864_v33 = vsel %vm459_vm0, %v2800_v34, 0.0  ;;  %v2802_v53 = vmul.f32 %v5592_v5, %v3868_v54  ;;  %v6179_v34 = vld [vmem:[#allocation53_spill] sm:$0xff] }
 0x93f   :  { %2835 = vadd.xlane.f32.xlu0 %v2834_v55  ;;  %v2867_v12 = vsel %vm459_vm0, %v2801_v40, 0.0  ;;  %v2803_v22 = vmul.f32 %v5592_v5, %v3870_v61 }
 0x940   :  { %v2870_v7 = vsel %vm459_vm0, %v2802_v53, 0.0 }
 0x941   :  { %2838 = vadd.xlane.f32.xlu1 %v2837_v50  ;;  %v2873_v14 = vsel %vm459_vm0, %v2803_v22, 0.0  ;;  %v6171_v50 = vld [vmem:[#allocation52_spill] sm:$0xff] }
 0x943   :  { %2841 = vadd.xlane.f32.xlu0 %v2840_v35 }
 0x945   :  { %2844 = vadd.xlane.f32.xlu1 %v2843_v59 }
 0x947   :  { %2847 = vadd.xlane.f32.xlu0 %v2846_v32  ;;  %v6174_v32 = vld [vmem:[#allocation49_spill] sm:$0xff] }
 0x949   :  { %2850 = vadd.xlane.f32.xlu1 %v2849_v3 }
 0x94b   :  { %2853 = vadd.xlane.f32.xlu0 %v2852_v31 }
 0x94d   :  { %2856 = vadd.xlane.f32.xlu1 %v2855_v23  ;;  %v6177_v23 = vld [vmem:[#allocation45_spill] sm:$0xff] }
 0x94f   :  { %2859 = vadd.xlane.f32.xlu0 %v2858_v42 }
 0x951   :  { %2862 = vadd.xlane.f32.xlu1 %v2861_v29 }
 0x953   :  { %2865 = vadd.xlane.f32.xlu0 %v2864_v33  ;;  %v6180_v33 = vld [vmem:[#allocation62_spill] sm:$0xff] }
 0x955   :  { %2868 = vadd.xlane.f32.xlu1 %v2867_v12  ;;  %v6181_v12 = vld [vmem:[#allocation42_spill] sm:$0xff] }
 0x957   :  { %2871 = vadd.xlane.f32.xlu0 %v2870_v7 }
 0x959   :  { %2874 = vadd.xlane.f32.xlu1 %v2873_v14  ;;  %v6182_v14 = vld [vmem:[#allocation51_spill] sm:$0xff] }
 0x9b8   :  { %v2806_v15 = vpop.xlane.xlu0 %2805 }
 0x9b9   :  { %v2876_v30 = vadd.f32 %v2806_v15, %v6168_v49  ;;  %v6187_v49 = vld [vmem:[#allocation59_spill] sm:$0xff] }
 0x9ba   :  { %v2809_v24 = vpop.xlane.xlu1 %2808 }
 0x9bb   :  { %v2877_v22 = vadd.f32 %v2809_v24, %v6181_v12  ;;  %v6186_v24 = vld [vmem:[#allocation61_spill] sm:$0xff] }
 0x9bc   :  { %v2812_v43 = vpop.xlane.xlu0 %2811 }
 0x9bd   :  { %v2878_v55 = vadd.f32 %v2812_v43, %v6169_v39  ;;  %v6183_v43 = vld [vmem:[#allocation57_spill] sm:$0xff] }
 0x9be   :  { %v2815_v20 = vpop.xlane.xlu1 %2814 }
 0x9bf   :  { %v2879_v57 = vadd.f32 %v2815_v20, %v6177_v23 }
 0x9c0   :  { %v2818_v1 = vpop.xlane.xlu0 %2817 }
 0x9c1   :  { %v2880_v25 = vadd.f32 %v2818_v1, %v6166_v18 }
 0x9c2   :  { %v2821_v44 = vpop.xlane.xlu1 %2820 }
 0x9c3   :  { %v2900_v35 = vmax.f32 %v2876_v30, %v2880_v25  ;;  %v2881_v42 = vadd.f32 %v2821_v44, %v6178_v37 }
 0x9c4   :  { %v2824_v19 = vpop.xlane.xlu0 %2823 }
 0x9c5   :  { %v2882_v10 = vadd.f32 %v2824_v19, %v6167_v27 }
 0x9c6   :  { %v2827_v13 = vpop.xlane.xlu1 %2826 }
 0x9c7   :  { %v2901_v45 = vmax.f32 %v2878_v55, %v2882_v10  ;;  %v5657_v0 = vadd.f32 %v2827_v13, %v6174_v32  ;;  %v6184_v13 = vld [vmem:[#allocation64_spill] sm:$0xff] }
 0x9c8   :  { %v2830_v9 = vpop.xlane.xlu0 %2829 }
 0x9c9   :  { %v2884_v16 = vadd.f32 %v2830_v9, %v6170_v4  ;;  %v2912_v7 = vmax.f32 %v2879_v57, %v5657_v0  ;;  %v6188_v4 = vld [vmem:[#allocation65_spill] sm:$0xff] }
 0x9ca   :  { %v2833_v46 = vpop.xlane.xlu1 %2832 }
 0x9cb   :  { %v2902_v3 = vmax.f32 %v2900_v35, %v2884_v16  ;;  %v2885_v15 = vadd.f32 %v2833_v46, %v6182_v14 }
 0x9cc   :  { %v2836_v51 = vpop.xlane.xlu0 %2835 }
 0x9cd   :  { %v2886_v47 = vadd.f32 %v2836_v51, %v6171_v50  ;;  %v2911_v51 = vmax.f32 %v2877_v22, %v2881_v42 }
 0x9ce   :  { %v2839_v56 = vpop.xlane.xlu1 %2838 }
 0x9cf   :  { %v2903_v21 = vmax.f32 %v2901_v45, %v2886_v47  ;;  %v5664_v54 = vadd.f32 %v2839_v56, %v6179_v34  ;;  %v2913_v27 = vmax.f32 %v2911_v51, %v2885_v15 }
 0x9d0   :  { %v2842_v5 = vpop.xlane.xlu0 %2841 }
 0x9d1   :  { %v2888_v59 = vadd.f32 %v2842_v5, %v6172_v6  ;;  %v2914_v56 = vmax.f32 %v2912_v7, %v5664_v54  ;;  %v6185_v5 = vld [vmem:[#allocation55_spill] sm:$0xff] }
 0x9d2   :  { %v2845_v52 = vpop.xlane.xlu1 %2844 }
 0x9d3   :  { %v2904_v40 = vmax.f32 %v2902_v3, %v2888_v59 }
 0x9d4   :  { %v2848_v2 = vpop.xlane.xlu0 %2847 }
 0x9d5   :  { %v2890_v17 = vadd.f32 %v2848_v2, %v6173_v48  ;;  %v5678_v2 = vadd.f32 %v2845_v52, %v6185_v5 }
 0x9d6   :  { %v2851_v38 = vpop.xlane.xlu1 %2850 }
 0x9d7   :  { %v2905_v61 = vmax.f32 %v2903_v21, %v2890_v17  ;;  %v5671_v1 = vadd.f32 %v2851_v38, %v6183_v43  ;;  %v2915_v52 = vmax.f32 %v2913_v27, %v5678_v2 }
 0x9d8   :  { %v2854_v8 = vpop.xlane.xlu0 %2853 }
 0x9d9   :  { %v2892_v31 = vadd.f32 %v2854_v8, %v6175_v58 }
 0x9da   :  { %v2857_v41 = vpop.xlane.xlu1 %2856 }
 0x9db   :  { %v2906_v19 = vmax.f32 %v2904_v40, %v2892_v31  ;;  %v5686_v39 = vadd.f32 %v2857_v41, %v6187_v49 }
 0x9dc   :  { %v2860_v28 = vpop.xlane.xlu0 %2859 }
 0x9dd   :  { %v2894_v11 = vadd.f32 %v2860_v28, %v6176_v62  ;;  %v2916_v28 = vmax.f32 %v2914_v56, %v5671_v1  ;;  %v2917_v41 = vmax.f32 %v2915_v52, %v5686_v39 }
 0x9de   :  { %v2863_v36 = vpop.xlane.xlu1 %2862 }
 0x9df   :  { %v2907_v44 = vmax.f32 %v2905_v61, %v2894_v11  ;;  %v5681_v8 = vadd.f32 %v2863_v36, %v6186_v24  ;;  %v6189_v36 = vld [vmem:[#allocation63_spill] sm:$0xff] }
 0x9e0   :  { %v2866_v60 = vpop.xlane.xlu0 %2865 }
 0x9e1   :  { %v2896_v53 = vadd.f32 %v2866_v60, %v6180_v33  ;;  %v2918_v45 = vmax.f32 %v2916_v28, %v5681_v8 }
 0x9e2   :  { %v2869_v29 = vpop.xlane.xlu1 %2868 }
 0x9e3   :  { %v2908_v46 = vmax.f32 %v2906_v19, %v2896_v53  ;;  %v5694_v6 = vadd.f32 %v2869_v29, %v6189_v36 }
 0x9e4   :  { %v2872_v20 = vpop.xlane.xlu0 %2871 }
 0x9e5   :  { %v5674_v9 = vadd.f32 %v2872_v20, %v6184_v13  ;;  %v2919_v58 = vmax.f32 %v2917_v41, %v5694_v6 }
 0x9e6   :  { %v2875_v18 = vpop.xlane.xlu1 %2874 }
 0x9e7   :  { %v2909_v38 = vmax.f32 %v2907_v44, %v5674_v9  ;;  %v5689_v50 = vadd.f32 %v2875_v18, %v6188_v4 }
 0x9e9   :  { %v2910_v35 = vmax.f32 %v2908_v46, %v2909_v38  ;;  %v2920_v3 = vmax.f32 %v2918_v45, %v5689_v50 }
 0x9eb   :  { %v5696_v48 = vsub.f32 %v2876_v30, %v2910_v35  ;;  %v5698_v32 = vsub.f32 %v2878_v55, %v2910_v35  ;;  %v5700_v60 = vsub.f32 %v2880_v25, %v2910_v35  ;;  %v5704_v21 = vsub.f32 %v2882_v10, %v2910_v35 }
 0x9ec   :  { %v5709_v37 = vsub.f32 %v2884_v16, %v2910_v35  ;;  %v5712_v55 = vmax.f32 %v2919_v58, %v2920_v3  ;;  %v5714_v25 = vsub.f32 %v2886_v47, %v2910_v35  ;;  %v5717_v10 = vsub.f32 %v2888_v59, %v2910_v35 }
 0x9ed   :  { %v2946_v62 = vmul.f32 1.442695, %v5696_v48  ;;  %v2950_v23 = vmul.f32 1.442695, %v5698_v32  ;;  %v2954_v30 = vmul.f32 1.442695, %v5700_v60  ;;  %v5719_v29 = vsub.f32 %v2890_v17, %v2910_v35 }
 0x9ee   :  { %v2958_v34 = vmul.f32 1.442695, %v5704_v21  ;;  %v2962_v40 = vmul.f32 1.442695, %v5709_v37  ;;  %v5723_v16 = vsub.f32 %v2877_v22, %v5712_v55  ;;  %v2966_v61 = vmul.f32 1.442695, %v5714_v25 }
 0x9ef   :  { %3871 = vpow2.f32 %v2946_v62  ;;  %v5727_v33 = vsub.f32 %v2879_v57, %v5712_v55  ;;  %v5729_v47 = vsub.f32 %v2892_v31, %v2910_v35  ;;  %v2970_v12 = vmul.f32 1.442695, %v5717_v10 }
 0x9f0   :  { %3873 = vpow2.f32 %v2950_v23  ;;  %v2974_v59 = vmul.f32 1.442695, %v5719_v29  ;;  %v5734_v17 = vsub.f32 %v2881_v42, %v5712_v55  ;;  %v5736_v7 = vsub.f32 %v2894_v11, %v2910_v35 }
 0x9f1   :  { %3875 = vpow2.f32 %v2954_v30  ;;  %v2948_v22 = vmul.f32 1.442695, %v5723_v16  ;;  %v5741_v14 = vsub.f32 %v5657_v0, %v5712_v55  ;;  %v2952_v31 = vmul.f32 1.442695, %v5727_v33 }
 0x9f2   :  { %3877 = vpow2.f32 %v2958_v34  ;;  %v5744_v43 = vsub.f32 %v2896_v53, %v2910_v35  ;;  %v2978_v20 = vmul.f32 1.442695, %v5729_v47  ;;  %v5748_v11 = vsub.f32 %v2885_v15, %v5712_v55 }
 0x9f3   :  { %3879 = vpow2.f32 %v2962_v40  ;;  %v2956_v42 = vmul.f32 1.442695, %v5734_v17  ;;  %v2982_v44 = vmul.f32 1.442695, %v5736_v7  ;;  %v5754_v51 = vsub.f32 %v5664_v54, %v5712_v55 }
 0x9f4   :  { %3881 = vpow2.f32 %v2966_v61  ;;  %v2960_v53 = vmul.f32 1.442695, %v5741_v14  ;;  %v5758_v56 = vsub.f32 %v5674_v9, %v2910_v35  ;;  %v2986_v15 = vmul.f32 1.442695, %v5744_v43 }
 0x9f5   :  { %3883 = vpow2.f32 %v2970_v12  ;;  %v5763_v18 = vsub.f32 %v5678_v2, %v5712_v55  ;;  %v2964_v46 = vmul.f32 1.442695, %v5748_v11  ;;  %v5768_v27 = vsub.f32 %v5671_v1, %v5712_v55 }
 0x9f6   :  { %3885 = vpow2.f32 %v2974_v59  ;;  %v2968_v9 = vmul.f32 1.442695, %v5754_v51  ;;  %v2990_v28 = vmul.f32 1.442695, %v5758_v56  ;;  %v5774_v2 = vsub.f32 %v5686_v39, %v5712_v55 }
 0x9f7   :  { %3887 = vpow2.f32 %v2948_v22  ;;  %v2972_v35 = vmul.f32 1.442695, %v5763_v18  ;;  %v5779_v1 = vsub.f32 %v5681_v8, %v5712_v55  ;;  %v2976_v41 = vmul.f32 1.442695, %v5768_v27 }
 0x9f8   :  { %3889 = vpow2.f32 %v2952_v31  ;;  %v5784_v39 = vsub.f32 %v5694_v6, %v5712_v55  ;;  %v2980_v23 = vmul.f32 1.442695, %v5774_v2  ;;  %v5789_v8 = vsub.f32 %v5689_v50, %v5712_v55 }
 0x9f9   :  { %v3872_v57 = vpop.eup %3871  ;;  %3891 = vpow2.f32 %v2978_v20  ;;  %v2984_v12 = vmul.f32 1.442695, %v5779_v1 }
 0x9fa   :  { %v3874_v19 = vpop.eup %3873  ;;  %3893 = vpow2.f32 %v2956_v42  ;;  %v2988_v6 = vmul.f32 1.442695, %v5784_v39 }
 0x9fb   :  { %v2994_v13 = vadd.f32 %v3874_v19, %v3872_v57  ;;  %v3876_v0 = vpop.eup %3875  ;;  %3895 = vpow2.f32 %v2982_v44 }
 0x9fc   :  { %v3878_v24 = vpop.eup %3877  ;;  %3897 = vpow2.f32 %v2960_v53 }
 0x9fd   :  { %v2995_v5 = vadd.f32 %v3876_v0, %v2994_v13  ;;  %v3880_v38 = vpop.eup %3879  ;;  %3899 = vpow2.f32 %v2986_v15  ;;  %v2992_v13 = vmul.f32 1.442695, %v5789_v8 }
 0x9fe   :  { %v3882_v4 = vpop.eup %3881  ;;  %3901 = vpow2.f32 %v2964_v46 }
 0x9ff   :  { %v2996_v54 = vadd.f32 %v3878_v24, %v2995_v5  ;;  %v3884_v52 = vpop.eup %3883  ;;  %3903 = vpow2.f32 %v2968_v9 }
 0xa00   :  { %v3886_v36 = vpop.eup %3885  ;;  %3905 = vpow2.f32 %v2990_v28 }
 0xa01   :  { %v2997_v49 = vadd.f32 %v3880_v38, %v2996_v54  ;;  %v3888_v3 = vpop.eup %3887  ;;  %3907 = vpow2.f32 %v2972_v35 }
 0xa02   :  { %v3890_v62 = vpop.eup %3889  ;;  %3909 = vpow2.f32 %v2976_v41 }
 0xa03   :  { %v2998_v45 = vadd.f32 %v3882_v4, %v2997_v49  ;;  %v3892_v30 = vpop.eup %3891  ;;  %v3005_v40 = vadd.f32 %v3890_v62, %v3888_v3  ;;  %3911 = vpow2.f32 %v2980_v23 }
 0xa04   :  { %v3894_v61 = vpop.eup %3893  ;;  %3913 = vpow2.f32 %v2984_v12 }
 0xa05   :  { %v2999_v58 = vadd.f32 %v3884_v52, %v2998_v45  ;;  %v3896_v59 = vpop.eup %3895  ;;  %v3006_v31 = vadd.f32 %v3894_v61, %v3005_v40  ;;  %3915 = vpow2.f32 %v2988_v6 }
 0xa06   :  { %v3898_v57 = vpop.eup %3897  ;;  %3917 = vpow2.f32 %v2992_v13 }
 0xa07   :  { %v3000_v34 = vadd.f32 %v3886_v36, %v2999_v58  ;;  %v3900_v20 = vpop.eup %3899  ;;  %v3007_v42 = vadd.f32 %v3898_v57, %v3006_v31 }
 0xa08   :  { %v3902_v44 = vpop.eup %3901 }
 0xa09   :  { %v3001_v22 = vadd.f32 %v3892_v30, %v3000_v34  ;;  %v3008_v50 = vadd.f32 %v3902_v44, %v3007_v42  ;;  %v3904_v55 = vpop.eup %3903 }
 0xa0a   :  { %v3906_v53 = vpop.eup %3905 }
 0xa0b   :  { %v3002_v19 = vadd.f32 %v3896_v59, %v3001_v22  ;;  %v3009_v15 = vadd.f32 %v3904_v55, %v3008_v50  ;;  %v3908_v5 = vpop.eup %3907 }
 0xa0c   :  { %v3910_v54 = vpop.eup %3909 }
 0xa0d   :  { %v3003_v0 = vadd.f32 %v3900_v20, %v3002_v19  ;;  %v3010_v46 = vadd.f32 %v3908_v5, %v3009_v15  ;;  %v3912_v9 = vpop.eup %3911 }
 0xa0e   :  { %v3914_v49 = vpop.eup %3913 }
 0xa0f   :  { %v3004_v24 = vadd.f32 %v3906_v53, %v3003_v0  ;;  %v3011_v38 = vadd.f32 %v3910_v54, %v3010_v46  ;;  %v3916_v35 = vpop.eup %3915 }
 0xa10   :  { %v3918_v45 = vpop.eup %3917 }
 0xa11   :  { %3919 = vlog2.f32 %v3004_v24  ;;  %v3012_v28 = vadd.f32 %v3912_v9, %v3011_v38 }
 0xa13   :  { %v3013_v4 = vadd.f32 %v3914_v49, %v3012_v28 }
 0xa15   :  { %v3014_v52 = vadd.f32 %v3916_v35, %v3013_v4 }
 0xa17   :  { %v3015_v36 = vadd.f32 %v3918_v45, %v3014_v52 }
 0xa19   :  { %3921 = vlog2.f32 %v3015_v36 }
 0xa1b   :  { %v3920_v41 = vpop.eup %3919 }
 0xa1c   :  { %v5794_v3 = vmul.f32 0.6931472, %v3920_v41 }
 0xa1e   :  { %v3020_v58 = vsub.f32 %v5696_v48, %v5794_v3  ;;  %v3022_v62 = vsub.f32 %v5698_v32, %v5794_v3  ;;  %v3024_v23 = vsub.f32 %v5700_v60, %v5794_v3  ;;  %v3026_v34 = vsub.f32 %v5704_v21, %v5794_v3 }
 0xa1f   :  { %v3028_v40 = vsub.f32 %v5709_v37, %v5794_v3  ;;  %v3030_v61 = vsub.f32 %v5714_v25, %v5794_v3  ;;  %v3032_v12 = vsub.f32 %v5717_v10, %v5794_v3  ;;  %v3034_v48 = vsub.f32 %v5719_v29, %v5794_v3 }
 0xa20   :  { %v3042_v32 = vsub.f32 %v5758_v56, %v5794_v3  ;;  %v3071_v59 = vrot.slane %v3020_v58, %v5416_v63  ;;  %v3080_v21 = vrot.slane %v3022_v62, %v5416_v63  ;;  %v3089_v22 = vrot.slane %v3024_v23, %v5416_v63 }
 0xa21   :  { %v3036_v37 = vsub.f32 %v5729_v47, %v5794_v3  ;;  %v3038_v25 = vsub.f32 %v5736_v7, %v5794_v3  ;;  %v3098_v56 = vrot.slane %v3026_v34, %v5416_v63  ;;  %v3107_v57 = vrot.slane %v3028_v40, %v5416_v63 }
 0xa22   :  { %v3040_v6 = vsub.f32 %v5744_v43, %v5794_v3  ;;  %v3116_v43 = vrot.slane %v3030_v61, %v5416_v63  ;;  %v3125_v24 = vrot.slane %v3032_v12, %v5416_v63  ;;  %v3170_v46 = vrot.slane %v3042_v32, %v5416_v63 }
 0xa23   :  { %v3922_v30 = vpop.eup %3921  ;;  %v3134_v62 = vrot.slane %v3034_v48, %v5416_v63 }
 0xa24   :  { %v3019_v60 = vmul.f32 0.6931472, %v3922_v30 }
 0xa26   :  { %v3021_v10 = vsub.f32 %v5723_v16, %v3019_v60  ;;  %v3023_v29 = vsub.f32 %v5727_v33, %v3019_v60  ;;  %v3025_v31 = vsub.f32 %v5734_v17, %v3019_v60  ;;  %v3027_v20 = vsub.f32 %v5741_v14, %v3019_v60 }
 0xa27   :  { %v3029_v47 = vsub.f32 %v5748_v11, %v3019_v60  ;;  %v3037_v19 = vsub.f32 %v5774_v2, %v3019_v60  ;;  %v3039_v7 = vsub.f32 %v5779_v1, %v3019_v60  ;;  %v3041_v16 = vsub.f32 %v5784_v39, %v3019_v60 }
 0xa28   :  { %v3043_v33 = vsub.f32 %v5789_v8, %v3019_v60  ;;  %v3075_v17 = vrot.slane %v3021_v10, %v5419_v26  ;;  %v3084_v42 = vrot.slane %v3023_v29, %v5419_v26  ;;  %v3093_v44 = vrot.slane %v3025_v31, %v5419_v26 }
 0xa29   :  { %v3143_v14 = vrot.slane %v3036_v37, %v5416_v63  ;;  %v3152_v11 = vrot.slane %v3038_v25, %v5416_v63  ;;  %v3031_v2 = vsub.f32 %v5754_v51, %v3019_v60  ;;  %v3161_v1 = vrot.slane %v3040_v6, %v5416_v63 }
 0xa2a   :  { %v3033_v39 = vsub.f32 %v5763_v18, %v3019_v60  ;;  %v3076_v8 = vsel %vm2267_vm3, %v3075_v17, %v3071_v59  ;;  %v3085_v13 = vsel %vm2267_vm3, %v3084_v42, %v3080_v21  ;;  %v3035_v0 = vsub.f32 %v5768_v27, %v3019_v60 }
 0xa2b   :  { %v3094_v50 = vsel %vm2267_vm3, %v3093_v44, %v3089_v22  ;;  %v3102_v55 = vrot.slane %v3027_v20, %v5419_v26  ;;  %v3111_v53 = vrot.slane %v3029_v47, %v5419_v26  ;;  %v3147_v15 = vrot.slane %v3037_v19, %v5419_v26 }
 0xa2c   :  { %v3156_v51 = vrot.slane %v3039_v7, %v5419_v26  ;;  %v3165_v5 = vrot.slane %v3041_v16, %v5419_v26  ;;  %v3174_v18 = vrot.slane %v3043_v33, %v5419_v26  ;;  %v3120_v27 = vrot.slane %v3031_v2, %v5419_v26 }
 0xa2d   :  { %v3176_v54 = vsel %vm2368_vm4, %v3085_v13, %v3076_v8  ;;  %v3129_v38 = vrot.slane %v3033_v39, %v5419_v26  ;;  %v3148_v9 = vsel %vm2267_vm3, %v3147_v15, %v3143_v14  ;;  %v3103_v4 = vsel %vm2267_vm3, %v3102_v55, %v3098_v56 }
 0xa2e   :  { %v3157_v28 = vsel %vm2267_vm3, %v3156_v51, %v3152_v11  ;;  %v3166_v49 = vsel %vm2267_vm3, %v3165_v5, %v3161_v1  ;;  %v3138_v35 = vrot.slane %v3035_v0, %v5419_v26  ;;  %v3177_v52 = vsel %vm2370_vm5, %v3094_v50, %v3176_v54 }
 0xa2f   :  { %v3183_v45 = vsel %vm2368_vm4, %v3157_v28, %v3148_v9  ;;  %v3112_v36 = vsel %vm2267_vm3, %v3111_v53, %v3107_v57  ;;  %v3175_v41 = vsel %vm2267_vm3, %v3174_v18, %v3170_v46  ;;  %v3178_v3 = vsel %vm2372_vm6, %v3103_v4, %v3177_v52 }
 0xa30   :  { %v3184_v58 = vsel %vm2370_vm5, %v3166_v49, %v3183_v45  ;;  %v3121_v23 = vsel %vm2267_vm3, %v3120_v27, %v3116_v43  ;;  %v3179_v30 = vsel %vm2374_vm7, %v3112_v36, %v3178_v3  ;;  %v3130_v34 = vsel %vm2267_vm3, %v3129_v38, %v3125_v24 }
 0xa31   :  { %v3185_v26 = vsel %vm2372_vm6, %v3175_v41, %v3184_v58  ;;  %v3180_v40 = vsel %vm2376_vm8, %v3121_v23, %v3179_v30  ;;  %v3139_v61 = vsel %vm2267_vm3, %v3138_v35, %v3134_v62 }
 0xa32   :  { %3302 = vst.msk [vmem:[%s5896_s10 + $0x18] sm:$0xf] %vm2389_vm9, %v3185_v26  ;;  %v3181_v12 = vsel %vm2378_vm10, %v3130_v34, %v3180_v40 }
 0xa33   :  { %v3182_v63 = vsel %vm2380_vm11, %v3139_v61, %v3181_v12 }
 0xa34   :  { %3301 = vst.msk [vmem:[%s5896_s10 + $0x10] sm:$0xff] %vm2387_vm12, %v3182_v63 }
 0xa35   :  { %3195 = vsyncpa [#allocation3], 1 }
 0xa36   :  { %3196 = vsyncpa [#allocation5], 1 }
 0xa37   :  { %3197 = vsyncpa [#allocation8], 1 }
 0xa38   :  { %3198 = vsyncpa [#allocation11], 1 }

</bundles_post_ra>
